<compile_context>
chip_gen: v5e
topology: v5e:2x2
jax: 0.10.0
libtpu: 0.0.40
codegen_flags: <defaults>
</compile_context>

<pallas_src>
import jax
import jax.numpy as jnp
from jax import lax
from jax.experimental import pallas as pl
from jax.experimental.pallas import tpu as pltpu

LANE = 128   # lane-dense padding for activations / encoder / text / projections
PRJ = 128    # d_prjh padded width


def _gate_group(h):
    """Per-gate lane-group width (4 gates packed into as few lanes as possible)."""
    for g in (32, 64, 128):
        if h <= g:
            return g
    raise ValueError("hidden size > 128 not supported by this kernel")


# -----------------------------------------------------------------------------
# The single fused kernel
# -----------------------------------------------------------------------------
def _make_fused_kernel(T, B, H, HG):
    GW = 4 * HG            # packed gate width (one 128-lane group for H<=32)
    inv_b = 1.0 / B

    def kernel(x_ref, len_ref, wih_ref, whh_ref, bias_ref, wlin_ref, blin_ref,
               text_ref, w1mm_ref, b1mm_ref, w2mm_ref, b2mm_ref,
               w1f_ref, b1f_ref, w2f_ref, b2f_ref, w3f_ref, b3f_ref,
               wcpc_ref, bcpc_ref,
               preds_ref, scal_ref, vis_sc):
        f32 = jnp.float32
        m = pl.program_id(0)

        # ---------------- RNNEncoder for modality m ----------------
        # (1) Input projection hoisted out of the recurrence: ONE matmul with
        #     M = T*B, bias added once.
        xproj = (jnp.dot(x_ref[...], wih_ref[...], preferred_element_type=f32)
                 + bias_ref[...])                                  # (T*B, GW)

        # (2) Recurrence.  W_hh loaded once (weight-stationary); gates share a
        #     single 128-lane group and are re-aligned with XLU rolls.
        whh = whh_ref[...]                                         # (GW, GW)
        lens = len_ref[...]                                        # (B, GW) f32
        gmask = jax.lax.broadcasted_iota(jnp.int32, (B, GW), 1) < H

        h = jnp.zeros((B, GW), f32)
        c = jnp.zeros((B, GW), f32)
        for t in range(T):                                         # unrolled
            gates = (xproj[t * B:(t + 1) * B, :]
                     + jnp.dot(h, whh, preferred_element_type=f32))
            sig = jax.nn.sigmoid(gates)
            tnh = jnp.tanh(gates)
            i_g = sig                                              # group 0
            f_g = pltpu.roll(sig, shift=GW - HG, axis=1)           # group 1 -> 0
            g_g = jnp.where(gmask,
                            pltpu.roll(tnh, shift=GW - 2 * HG, axis=1), 0.0)
            o_g = pltpu.roll(sig, shift=GW - 3 * HG, axis=1)       # group 3 -> 0
            c_new = f_g * c + i_g * g_g       # zero beyond lane H (g_g masked)
            h_new = o_g * jnp.tanh(c_new)
            valid = lens > float(t)           # pack_padded_sequence semantics
            h = jnp.where(valid, h_new, h)
            c = jnp.where(valid, c_new, c)

        enc = (jnp.dot(h, wlin_ref[...], preferred_element_type=f32)
               + blin_ref[...])               # (B, LANE) zero-padded > d_out

        @pl.when(m == 0)
        def _():                              # keep the visual encoding
            vis_sc[...] = enc

        # ---------------- fused head on the LAST grid step ----------------
        @pl.when(m == pl.num_programs(0) - 1)
        def _():
            text = text_ref[...]              # (B, LANE) zero-padded
            vis = vis_sc[...]                 # modality 0 = visual
            aco = enc                         # modality 1 = acoustic (local)

            # ---- MMILB(text,vis) & MMILB(text,aco): mu/logvar MLPs ----
            h1 = jnp.maximum(
                jnp.dot(text, w1mm_ref[...], preferred_element_type=f32)
                + b1mm_ref[...], 0.0)         # (B, 4*LANE), ReLU

            def l2(g):                        # 128-aligned layer-2 per head
                return (jnp.dot(h1[:, g * LANE:(g + 1) * LANE], w2mm_ref[g],
                                preferred_element_type=f32) + b2mm_ref[g])

            mu_tv, lv_tv, mu_ta, lv_ta = l2(0), l2(1), l2(2), l2(3)
            pos_tv = -0.5 * (mu_tv - vis) ** 2 * jnp.exp(-lv_tv)
            pos_ta = -0.5 * (mu_ta - aco) ** 2 * jnp.exp(-lv_ta)
            lld = (jnp.sum(jnp.sum(pos_tv, axis=1, keepdims=True),
                           axis=0, keepdims=True)
                   + jnp.sum(jnp.sum(pos_ta, axis=1, keepdims=True),
                             axis=0, keepdims=True)) * inv_b       # (1, 1)

            # ---- SubNet: concat([text, acoustic, visual]) as 3 summed dots ----
            y1 = jnp.tanh(
                jnp.dot(text, w1f_ref[0], preferred_element_type=f32)
                + jnp.dot(aco, w1f_ref[1], preferred_element_type=f32)
                + jnp.dot(vis, w1f_ref[2], preferred_element_type=f32)
                + b1f_ref[...])
            fusion = jnp.tanh(
                jnp.dot(y1, w2f_ref[...], preferred_element_type=f32)
                + b2f_ref[...])                                    # (B, PRJ)
            preds_ref[...] = (jnp.dot(fusion, w3f_ref[...],
                                      preferred_element_type=f32)
                              + b3f_ref[...])                      # (B, LANE)

            # ---- CPC heads: three predictors as ONE merged matmul ----
            xp = (jnp.dot(fusion, wcpc_ref[...], preferred_element_type=f32)
                  + bcpc_ref[...])                                 # (B, 3*LANE)

            def nce_head(x, x_pred):
                x_pred = x_pred * lax.rsqrt(
                    jnp.sum(x_pred * x_pred, axis=-1, keepdims=True))
                xn = x * lax.rsqrt(jnp.sum(x * x, axis=-1, keepdims=True))
                pos = jnp.sum(xn * x_pred, axis=-1, keepdims=True)       # (B,1)
                scores = lax.dot_general(                                # (B,B)
                    xn, x_pred, (((1,), (1,)), ((), ())),
                    preferred_element_type=f32)
                mx = jnp.max(scores, axis=-1, keepdims=True)
                neg = mx + jnp.log(
                    jnp.sum(jnp.exp(scores - mx), axis=-1, keepdims=True))
                return -(jnp.sum(pos - neg, axis=0, keepdims=True) * inv_b)

            nce = (nce_head(text, xp[:, 0:LANE])
                   + nce_head(vis, xp[:, LANE:2 * LANE])
                   + nce_head(aco, xp[:, 2 * LANE:3 * LANE]))      # (1, 1)

            lane = jax.lax.broadcasted_iota(jnp.int32, (1, LANE), 1)
            scal_ref[...] = (jnp.where(lane == 0, lld, 0.0)
                             + jnp.where(lane == 1, nce, 0.0))

    return kernel


def build_mmim_call(hp, T, B):
    H = max(hp['d_vh'], hp['d_ah'])
    HG = _gate_group(H)
    GW = 4 * HG
    DIN_P = LANE * pl.cdiv(max(hp['d_vin'], hp['d_ain']), LANE)

    kernel = _make_fused_kernel(T, B, H, HG)

    grid_spec = pltpu.PrefetchScalarGridSpec(
        num_scalar_prefetch=0,
        grid=(2,),                             # modality axis (seq: head at m=1)
        in_specs=[
            pl.BlockSpec((None, T * B, DIN_P), lambda m: (m, 0, 0)),   # x_s
            pl.BlockSpec((None, B, GW), lambda m: (m, 0, 0)),          # lens
            pl.BlockSpec((None, DIN_P, GW), lambda m: (m, 0, 0)),      # W_ih
            pl.BlockSpec((None, GW, GW), lambda m: (m, 0, 0)),         # W_hh
            pl.BlockSpec((None, 1, GW), lambda m: (m, 0, 0)),          # bias
            pl.BlockSpec((None, GW, LANE), lambda m: (m, 0, 0)),       # W_lin
            pl.BlockSpec((None, 1, LANE), lambda m: (m, 0, 0)),        # b_lin
            pl.BlockSpec((B, LANE), lambda m: (0, 0)),                 # text
            pl.BlockSpec((LANE, 4 * LANE), lambda m: (0, 0)),          # w1mm
            pl.BlockSpec((1, 4 * LANE), lambda m: (0, 0)),             # b1mm
            pl.BlockSpec((4, LANE, LANE), lambda m: (0, 0, 0)),        # w2mm
            pl.BlockSpec((4, 1, LANE), lambda m: (0, 0, 0)),           # b2mm
            pl.BlockSpec((3, LANE, PRJ), lambda m: (0, 0, 0)),         # w1f
            pl.BlockSpec((1, PRJ), lambda m: (0, 0)),                  # b1f
            pl.BlockSpec((PRJ, PRJ), lambda m: (0, 0)),                # w2f
            pl.BlockSpec((1, PRJ), lambda m: (0, 0)),                  # b2f
            pl.BlockSpec((PRJ, LANE), lambda m: (0, 0)),               # w3f
            pl.BlockSpec((1, LANE), lambda m: (0, 0)),                 # b3f
            pl.BlockSpec((PRJ, 3 * LANE), lambda m: (0, 0)),           # wcpc
            pl.BlockSpec((1, 3 * LANE), lambda m: (0, 0)),             # bcpc
        ],
        out_specs=[
            pl.BlockSpec((B, LANE), lambda m: (0, 0)),                 # preds
            pl.BlockSpec((1, LANE), lambda m: (0, 0)),                 # lld/nce
        ],
        scratch_shapes=[pltpu.VMEM((B, LANE), jnp.float32)],           # visual enc
    )

    call = pl.pallas_call(
        kernel,
        out_shape=(jax.ShapeDtypeStruct((B, LANE), jnp.float32),
                   jax.ShapeDtypeStruct((1, LANE), jnp.float32)),
        grid_spec=grid_spec,
        compiler_params=pltpu.CompilerParams(
            dimension_semantics=("arbitrary",)),   # sequential: scratch carry
        cost_estimate=pl.CostEstimate(flops=20_000_000,
                                      transcendentals=200_000,
                                      bytes_accessed=4_000_000),
    )
    return call, DIN_P, GW


# -----------------------------------------------------------------------------
# Parameter construction (PyTorch layout) + one-time kernel-ready preparation
# -----------------------------------------------------------------------------
def _dense(key, in_dim, out_dim, scale=0.1):
    kw, kb = jax.random.split(key)
    w = jax.random.normal(kw, (out_dim, in_dim), jnp.float32) * scale  # (out,in)
    b = jax.random.normal(kb, (out_dim,), jnp.float32) * scale
    return w, b


def init_params(key, hp):
    ks = iter(jax.random.split(key, 64))
    p = {}
    p['embed'] = jax.random.normal(next(ks), (hp['vocab'], hp['d_tin']),
                                   jnp.float32) * 0.1

    def lstm_enc(d_in, d_h, d_out):
        w_ih, b_ih = _dense(next(ks), d_in, 4 * d_h)
        w_hh, b_hh = _dense(next(ks), d_h, 4 * d_h)
        w_lin, b_lin = _dense(next(ks), d_h, d_out)
        return dict(W_ih=w_ih, W_hh=w_hh, b_ih=b_ih, b_hh=b_hh,
                    W_lin=w_lin, b_lin=b_lin)

    p['visual_enc'] = lstm_enc(hp['d_vin'], hp['d_vh'], hp['d_vout'])
    p['acoustic_enc'] = lstm_enc(hp['d_ain'], hp['d_ah'], hp['d_aout'])

    def mmilb_p(x_size, y_size):
        mw1, mb1 = _dense(next(ks), x_size, y_size)
        mw2, mb2 = _dense(next(ks), y_size, y_size)
        lw1, lb1 = _dense(next(ks), x_size, y_size)
        lw2, lb2 = _dense(next(ks), y_size, y_size)
        return dict(mu_w1=mw1, mu_b1=mb1, mu_w2=mw2, mu_b2=mb2,
                    lv_w1=lw1, lv_b1=lb1, lv_w2=lw2, lv_b2=lb2)

    p['mi_tv'] = mmilb_p(hp['d_tout'], hp['d_vout'])
    p['mi_ta'] = mmilb_p(hp['d_tout'], hp['d_aout'])

    def cpc_p(x_size, y_size):
        w, b = _dense(next(ks), y_size, x_size)     # Linear(y_size -> x_size)
        return dict(w=w, b=b)

    p['cpc_zt'] = cpc_p(hp['d_tout'], hp['d_prjh'])
    p['cpc_zv'] = cpc_p(hp['d_vout'], hp['d_prjh'])
    p['cpc_za'] = cpc_p(hp['d_aout'], hp['d_prjh'])

    dim_sum = hp['d_tout'] + hp['d_aout'] + hp['d_vout']
    w1, b1 = _dense(next(ks), dim_sum, hp['d_prjh'])
    w2, b2 = _dense(next(ks), hp['d_prjh'], hp['d_prjh'])
    w3, b3 = _dense(next(ks), hp['d_prjh'], hp['n_class'])
    p['fusion_prj'] = dict(w1=w1, b1=b1, w2=w2, b2=b2, w3=w3, b3=b3)
    return p


def _pad2(a, shape):
    out = jnp.zeros(shape, jnp.float32)
    return out.at[:a.shape[0], :a.shape[1]].set(a)


def _prep_lstm(enc_p, din_p, hg):
    """Gate-packed, pre-transposed LSTM weights.  Every pad region is zero
    (the kernel's padded-lane invariants rely on it)."""
    W_ih, W_hh = enc_p['W_ih'], enc_p['W_hh']            # (4H, Din), (4H, H)
    b = enc_p['b_ih'] + enc_p['b_hh']                    # fused bias
    W_lin, b_lin = enc_p['W_lin'], enc_p['b_lin']        # (Dout, H), (Dout,)
    H = W_hh.shape[1]
    Din = W_ih.shape[1]
    Dout = W_lin.shape[0]
    GW = 4 * hg
    wih = jnp.zeros((din_p, GW), jnp.float32)
    whh = jnp.zeros((GW, GW), jnp.float32)
    bias = jnp.zeros((1, GW), jnp.float32)
    wih_t, whh_t = W_ih.T, W_hh.T                        # (Din,4H), (H,4H)
    for g in range(4):                                   # gate order i,f,g,o
        wih = wih.at[:Din, g * hg:g * hg + H].set(wih_t[:, g * H:(g + 1) * H])
        whh = whh.at[:H, g * hg:g * hg + H].set(whh_t[:, g * H:(g + 1) * H])
        bias = bias.at[0, g * hg:g * hg + H].set(b[g * H:(g + 1) * H])
    wlin = jnp.zeros((GW, LANE), jnp.float32).at[:H, :Dout].set(W_lin.T)
    blin = jnp.zeros((1, LANE), jnp.float32).at[0, :Dout].set(b_lin)
    return wih, whh, bias, wlin, blin


def prepare_params(p, hp, din_p, hg):
    d_t, d_v, d_a = hp['d_tout'], hp['d_vout'], hp['d_aout']
    d_p, n_class = hp['d_prjh'], hp['n_class']

    kp = {}
    kp['embed'] = _pad2(p['embed'], (p['embed'].shape[0], LANE))

    v = _prep_lstm(p['visual_enc'], din_p, hg)
    a = _prep_lstm(p['acoustic_enc'], din_p, hg)
    kp['wih'] = jnp.stack([v[0], a[0]])
    kp['whh'] = jnp.stack([v[1], a[1]])
    kp['bias'] = jnp.stack([v[2], a[2]])
    kp['wlin'] = jnp.stack([v[3], a[3]])
    kp['blin'] = jnp.stack([v[4], a[4]])

    # MMILB heads [mu_tv, lv_tv, mu_ta, lv_ta], each in its own 128-lane group
    heads = [(p['mi_tv']['mu_w1'], p['mi_tv']['mu_b1'],
              p['mi_tv']['mu_w2'], p['mi_tv']['mu_b2']),
             (p['mi_tv']['lv_w1'], p['mi_tv']['lv_b1'],
              p['mi_tv']['lv_w2'], p['mi_tv']['lv_b2']),
             (p['mi_ta']['mu_w1'], p['mi_ta']['mu_b1'],
              p['mi_ta']['mu_w2'], p['mi_ta']['mu_b2']),
             (p['mi_ta']['lv_w1'], p['mi_ta']['lv_b1'],
              p['mi_ta']['lv_w2'], p['mi_ta']['lv_b2'])]
    w1mm = jnp.zeros((LANE, 4 * LANE), jnp.float32)
    b1mm = jnp.zeros((1, 4 * LANE), jnp.float32)
    w2mm = jnp.zeros((4, LANE, LANE), jnp.float32)
    b2mm = jnp.zeros((4, 1, LANE), jnp.float32)
    for g, (w1r, b1r, w2r, b2r) in enumerate(heads):
        ysz, xin = w1r.shape
        w1mm = w1mm.at[:xin, g * LANE:g * LANE + ysz].set(w1r.T)
        b1mm = b1mm.at[0, g * LANE:g * LANE + ysz].set(b1r)
        w2mm = w2mm.at[g, :ysz, :ysz].set(w2r.T)
        b2mm = b2mm.at[g, 0, :ysz].set(b2r)
    kp.update(w1mm=w1mm, b1mm=b1mm, w2mm=w2mm, b2mm=b2mm)

    # SubNet: W1 split by the concat order [text | acoustic | visual]
    fp = p['fusion_prj']
    w1t = fp['w1'].T                                     # (d_t+d_a+d_v, d_prjh)
    w1f = jnp.zeros((3, LANE, PRJ), jnp.float32)
    w1f = w1f.at[0, :d_t, :d_p].set(w1t[:d_t])
    w1f = w1f.at[1, :d_a, :d_p].set(w1t[d_t:d_t + d_a])
    w1f = w1f.at[2, :d_v, :d_p].set(w1t[d_t + d_a:])
    kp['w1f'] = w1f
    kp['b1f'] = jnp.zeros((1, PRJ), jnp.float32).at[0, :d_p].set(fp['b1'])
    kp['w2f'] = _pad2(fp['w2'].T, (PRJ, PRJ))
    kp['b2f'] = jnp.zeros((1, PRJ), jnp.float32).at[0, :d_p].set(fp['b2'])
    kp['w3f'] = _pad2(fp['w3'].T, (PRJ, LANE))
    kp['b3f'] = jnp.zeros((1, LANE), jnp.float32).at[0, :n_class].set(fp['b3'])

    # CPC zt / zv / za merged along the output axis, each padded to LANE
    wcpc = jnp.zeros((PRJ, 3 * LANE), jnp.float32)
    bcpc = jnp.zeros((1, 3 * LANE), jnp.float32)
    for gi, name in enumerate(('cpc_zt', 'cpc_zv', 'cpc_za')):
        w, b = p[name]['w'], p[name]['b']                # (x_size, d_prjh)
        xs = w.shape[0]
        wcpc = wcpc.at[:d_p, gi * LANE:gi * LANE + xs].set(w.T)
        bcpc = bcpc.at[0, gi * LANE:gi * LANE + xs].set(b)
    kp['wcpc'] = wcpc
    kp['bcpc'] = bcpc
    return kp


# -----------------------------------------------------------------------------
# Forward (y=None / no-memory branch, add_va=False)
# -----------------------------------------------------------------------------
def build_forward(kp, hp, T, B):
    call, din_p, gw = build_mmim_call(hp, T, B)
    n_class = hp['n_class']

    def forward(visual, acoustic, v_len, a_len, bert_sent):
        # TODO(synk): full BERT LanguageEmbeddingLayer not reimplemented; the
        # use_bert=False embedding path is used and text = embed(bert_sent[:,0]).
        text_p = jnp.take(kp['embed'], bert_sent[:, 0], axis=0)      # (B, LANE)

        def prep_seq(x):                       # (B,T,Din) -> (T,B,DIN_P)
            xt = jnp.transpose(x, (1, 0, 2)).astype(jnp.float32)
            return jnp.pad(xt, ((0, 0), (0, 0), (0, din_p - x.shape[2])))

        x_s = jnp.stack([prep_seq(visual), prep_seq(acoustic)], axis=0)
        x_s = x_s.reshape(2, T * B, din_p)     # time-major rows: [t*B + b]
        lens = jnp.stack([v_len, a_len]).astype(jnp.float32)         # (2, B)
        len_s = jnp.broadcast_to(lens[:, :, None], (2, B, gw))

        preds_pad, scal = call(
            x_s, len_s, kp['wih'], kp['whh'], kp['bias'], kp['wlin'],
            kp['blin'], text_p, kp['w1mm'], kp['b1mm'], kp['w2mm'], kp['b2mm'],
            kp['w1f'], kp['b1f'], kp['w2f'], kp['b2f'], kp['w3f'], kp['b3f'],
            kp['wcpc'], kp['bcpc'])
        return scal[0, 0], scal[0, 1], preds_pad[:, :n_class]        # lld, nce

    return jax.jit(forward)


def mmim_forward(fwd, sentences, visual, acoustic, v_len, a_len,
                 bert_sent, bert_sent_type, bert_sent_mask):
    del sentences, bert_sent_type, bert_sent_mask        # unused (TODO above)
    lld, nce, preds = fwd(visual, acoustic, v_len, a_len, bert_sent)
    pn_dic = {'tv': {'pos': None, 'neg': None},
              'ta': {'pos': None, 'neg': None},
              'va': None}
    return lld, nce, preds, pn_dic, 0.0


# -----------------------------------------------------------------------------
# Driver
# -----------------------------------------------------------------------------
if __name__ == "__main__":
    hp = dict(d_tin=32, d_tout=32,
              d_vin=20, d_vh=16, d_vout=16,
              d_ain=12, d_ah=16, d_aout=16,
              d_prjh=32, n_class=1, vocab=64)

    B, T_mod, T_txt = 8, 8, 10   # batch, modality seq len, bert seq len (+2)

    key = jax.random.PRNGKey(0)
    kpar, kv, ka, kb = jax.random.split(key, 4)
    raw_params = init_params(kpar, hp)

    H_max = max(hp['d_vh'], hp['d_ah'])
    hg = _gate_group(H_max)
    din_p = LANE * pl.cdiv(max(hp['d_vin'], hp['d_ain']), LANE)
    kparams = prepare_params(raw_params, hp, din_p, hg)
    fwd = build_forward(kparams, hp, T_mod, B)

    visual = jax.random.normal(kv, (B, T_mod, hp['d_vin']), jnp.float32)
    acoustic = jax.random.normal(ka, (B, T_mod, hp['d_ain']), jnp.float32)
    v_len = jnp.array([8, 7, 6, 5, 8, 4, 3, 8], jnp.int32)
    a_len = jnp.array([8, 8, 5, 6, 7, 4, 8, 2], jnp.int32)
    bert_sent = jax.random.randint(kb, (B, T_txt), 0, hp['vocab'], jnp.int32)
    bert_sent_type = jnp.zeros((B, T_txt), jnp.int32)
    bert_sent_mask = jnp.ones((B, T_txt), jnp.float32)
    sentences = bert_sent[:, 1:-1]   # unused in the embedding path

    lld, nce, preds, pn_dic, H = mmim_forward(
        fwd, sentences, visual, acoustic, v_len, a_len,
        bert_sent, bert_sent_type, bert_sent_mask)

    jax.block_until_ready((lld, nce, preds))
    assert preds.shape == (B, hp['n_class'])
    assert bool(jnp.isfinite(lld)) and bool(jnp.isfinite(nce))
    assert bool(jnp.all(jnp.isfinite(preds)))
    print("KERNEL_OK")
</pallas_src>

<mosaic_0001>
module attributes {stable_mosaic.version = 11 : i64} {
  func.func @kernel(%arg0: i32, %arg1: memref<1x64x128xf32, #tpu.memory_space<vmem>>, %arg2: memref<1x8x128xf32, #tpu.memory_space<vmem>>, %arg3: memref<1x128x128xf32, #tpu.memory_space<vmem>>, %arg4: memref<1x128x128xf32, #tpu.memory_space<vmem>>, %arg5: memref<1x1x128xf32, #tpu.memory_space<vmem>>, %arg6: memref<1x128x128xf32, #tpu.memory_space<vmem>>, %arg7: memref<1x1x128xf32, #tpu.memory_space<vmem>>, %arg8: memref<8x128xf32, #tpu.memory_space<vmem>>, %arg9: memref<128x512xf32, #tpu.memory_space<vmem>>, %arg10: memref<1x512xf32, #tpu.memory_space<vmem>>, %arg11: memref<4x128x128xf32, #tpu.memory_space<vmem>>, %arg12: memref<4x1x128xf32, #tpu.memory_space<vmem>>, %arg13: memref<3x128x128xf32, #tpu.memory_space<vmem>>, %arg14: memref<1x128xf32, #tpu.memory_space<vmem>>, %arg15: memref<128x128xf32, #tpu.memory_space<vmem>>, %arg16: memref<1x128xf32, #tpu.memory_space<vmem>>, %arg17: memref<128x128xf32, #tpu.memory_space<vmem>>, %arg18: memref<1x128xf32, #tpu.memory_space<vmem>>, %arg19: memref<128x384xf32, #tpu.memory_space<vmem>>, %arg20: memref<1x384xf32, #tpu.memory_space<vmem>>, %arg21: memref<8x128xf32, #tpu.memory_space<vmem>>, %arg22: memref<1x128xf32, #tpu.memory_space<vmem>>, %arg23: memref<8x128xf32, #tpu.memory_space<vmem>>) attributes {dimension_semantics = [#tpu.dimension_semantics<arbitrary>], iteration_bounds = array<i64: 2>, scalar_prefetch = 0 : i64, scratch_operands = 1 : i64, tpu.core_type = #tpu.core_type<tc>, window_params = [{transform_indices = @transform_0, window_bounds = array<i64: 1, 64, 128>}, {transform_indices = @transform_1, window_bounds = array<i64: 1, 8, 128>}, {transform_indices = @transform_2, window_bounds = array<i64: 1, 128, 128>}, {transform_indices = @transform_3, window_bounds = array<i64: 1, 128, 128>}, {transform_indices = @transform_4, window_bounds = array<i64: 1, 1, 128>}, {transform_indices = @transform_5, window_bounds = array<i64: 1, 128, 128>}, {transform_indices = @transform_6, window_bounds = array<i64: 1, 1, 128>}, {pipeline_mode = #tpu.pipeline_mode<synchronous>, transform_indices = @transform_7, window_bounds = array<i64: 8, 128>}, {pipeline_mode = #tpu.pipeline_mode<synchronous>, transform_indices = @transform_8, window_bounds = array<i64: 128, 512>}, {pipeline_mode = #tpu.pipeline_mode<synchronous>, transform_indices = @transform_9, window_bounds = array<i64: 1, 512>}, {pipeline_mode = #tpu.pipeline_mode<synchronous>, transform_indices = @transform_10, window_bounds = array<i64: 4, 128, 128>}, {pipeline_mode = #tpu.pipeline_mode<synchronous>, transform_indices = @transform_11, window_bounds = array<i64: 4, 1, 128>}, {pipeline_mode = #tpu.pipeline_mode<synchronous>, transform_indices = @transform_12, window_bounds = array<i64: 3, 128, 128>}, {pipeline_mode = #tpu.pipeline_mode<synchronous>, transform_indices = @transform_13, window_bounds = array<i64: 1, 128>}, {pipeline_mode = #tpu.pipeline_mode<synchronous>, transform_indices = @transform_14, window_bounds = array<i64: 128, 128>}, {pipeline_mode = #tpu.pipeline_mode<synchronous>, transform_indices = @transform_15, window_bounds = array<i64: 1, 128>}, {pipeline_mode = #tpu.pipeline_mode<synchronous>, transform_indices = @transform_16, window_bounds = array<i64: 128, 128>}, {pipeline_mode = #tpu.pipeline_mode<synchronous>, transform_indices = @transform_17, window_bounds = array<i64: 1, 128>}, {pipeline_mode = #tpu.pipeline_mode<synchronous>, transform_indices = @transform_18, window_bounds = array<i64: 128, 384>}, {pipeline_mode = #tpu.pipeline_mode<synchronous>, transform_indices = @transform_19, window_bounds = array<i64: 1, 384>}, {pipeline_mode = #tpu.pipeline_mode<synchronous>, transform_indices = @transform_20, window_bounds = array<i64: 8, 128>}, {pipeline_mode = #tpu.pipeline_mode<synchronous>, transform_indices = @transform_21, window_bounds = array<i64: 1, 128>}]} {
    %c0 = arith.constant 0 : index
    %c0_0 = arith.constant 0 : index
    %c0_1 = arith.constant 0 : index
    %0 = vector.load %arg1[%c0, %c0_0, %c0_1] : memref<1x64x128xf32, #tpu.memory_space<vmem>>, vector<1x64x128xf32>
    %1 = vector.shape_cast %0 : vector<1x64x128xf32> to vector<64x128xf32>
    %c0_2 = arith.constant 0 : index
    %c0_3 = arith.constant 0 : index
    %c0_4 = arith.constant 0 : index
    %2 = vector.load %arg3[%c0_2, %c0_3, %c0_4] : memref<1x128x128xf32, #tpu.memory_space<vmem>>, vector<1x128x128xf32>
    %3 = vector.shape_cast %2 : vector<1x128x128xf32> to vector<128x128xf32>
    %cst = arith.constant dense<0.000000e+00> : vector<64x128xf32>
    %4 = tpu.matmul %1, %3, %cst {dimension_numbers = #tpu.dot_dimension_numbers<[1], [0], [0], [1], [0, 0, 1, 1], [], []>} : vector<64x128xf32>, vector<128x128xf32>, vector<64x128xf32> -> vector<64x128xf32>
    %c0_5 = arith.constant 0 : index
    %c0_6 = arith.constant 0 : index
    %c0_7 = arith.constant 0 : index
    %5 = vector.load %arg5[%c0_5, %c0_6, %c0_7] : memref<1x1x128xf32, #tpu.memory_space<vmem>>, vector<1x1x128xf32>
    %6 = vector.shape_cast %5 : vector<1x1x128xf32> to vector<1x128xf32>
    %7 = vector.broadcast %6 : vector<1x128xf32> to vector<64x128xf32>
    %8 = arith.addf %4, %7 : vector<64x128xf32>
    %c0_8 = arith.constant 0 : index
    %c0_9 = arith.constant 0 : index
    %c0_10 = arith.constant 0 : index
    %9 = vector.load %arg4[%c0_8, %c0_9, %c0_10] : memref<1x128x128xf32, #tpu.memory_space<vmem>>, vector<1x128x128xf32>
    %10 = vector.shape_cast %9 : vector<1x128x128xf32> to vector<128x128xf32>
    %c0_11 = arith.constant 0 : index
    %c0_12 = arith.constant 0 : index
    %c0_13 = arith.constant 0 : index
    %11 = vector.load %arg2[%c0_11, %c0_12, %c0_13] : memref<1x8x128xf32, #tpu.memory_space<vmem>>, vector<1x8x128xf32>
    %12 = vector.shape_cast %11 : vector<1x8x128xf32> to vector<8x128xf32>
    %13 = tpu.iota {dimensions = array<i32: 1>} : vector<8x128xi32>
    %c16_i32 = arith.constant 16 : i32
    %14 = vector.broadcast %c16_i32 : i32 to vector<8x128xi32>
    %15 = arith.cmpi slt, %13, %14 : vector<8x128xi32>
    %cst_14 = arith.constant 0.000000e+00 : f32
    %16 = vector.broadcast %cst_14 : f32 to vector<8x128xf32>
    %cst_15 = arith.constant 0.000000e+00 : f32
    %17 = vector.broadcast %cst_15 : f32 to vector<8x128xf32>
    %18 = vector.extract_strided_slice %8 {offsets = [0, 0], sizes = [8, 128], strides = [1, 1]} : vector<64x128xf32> to vector<8x128xf32>
    %cst_16 = arith.constant dense<0.000000e+00> : vector<8x128xf32>
    %19 = tpu.matmul %16, %10, %cst_16 {dimension_numbers = #tpu.dot_dimension_numbers<[1], [0], [0], [1], [0, 0, 1, 1], [], []>} : vector<8x128xf32>, vector<128x128xf32>, vector<8x128xf32> -> vector<8x128xf32>
    %20 = arith.addf %18, %19 : vector<8x128xf32>
    %21 = arith.negf %20 : vector<8x128xf32>
    %22 = math.exp %21 : vector<8x128xf32>
    %cst_17 = arith.constant 1.000000e+00 : f32
    %23 = vector.broadcast %cst_17 : f32 to vector<8x128xf32>
    %24 = arith.addf %23, %22 : vector<8x128xf32>
    %25 = arith.divf %23, %24 : vector<8x128xf32>
    %26 = math.tanh %20 : vector<8x128xf32>
    %c96_i32 = arith.constant 96 : i32
    %27 = tpu.dynamic_rotate %25 by %c96_i32 dim 1 : vector<8x128xf32>, i32 -> vector<8x128xf32>
    %c64_i32 = arith.constant 64 : i32
    %28 = tpu.dynamic_rotate %26 by %c64_i32 dim 1 : vector<8x128xf32>, i32 -> vector<8x128xf32>
    %cst_18 = arith.constant 0.000000e+00 : f32
    %29 = vector.broadcast %cst_18 : f32 to vector<8x128xf32>
    %30 = arith.select %15, %28, %29 : vector<8x128xi1>, vector<8x128xf32>
    %c32_i32 = arith.constant 32 : i32
    %31 = tpu.dynamic_rotate %25 by %c32_i32 dim 1 : vector<8x128xf32>, i32 -> vector<8x128xf32>
    %32 = arith.mulf %27, %17 : vector<8x128xf32>
    %33 = arith.mulf %25, %30 : vector<8x128xf32>
    %34 = arith.addf %32, %33 : vector<8x128xf32>
    %35 = math.tanh %34 : vector<8x128xf32>
    %36 = arith.mulf %31, %35 : vector<8x128xf32>
    %cst_19 = arith.constant 0.000000e+00 : f32
    %37 = vector.broadcast %cst_19 : f32 to vector<8x128xf32>
    %38 = arith.cmpf ogt, %12, %37 : vector<8x128xf32>
    %39 = arith.select %38, %36, %16 : vector<8x128xi1>, vector<8x128xf32>
    %40 = arith.select %38, %34, %17 : vector<8x128xi1>, vector<8x128xf32>
    %41 = vector.extract_strided_slice %8 {offsets = [8, 0], sizes = [8, 128], strides = [1, 1]} : vector<64x128xf32> to vector<8x128xf32>
    %cst_20 = arith.constant dense<0.000000e+00> : vector<8x128xf32>
    %42 = tpu.matmul %39, %10, %cst_20 {dimension_numbers = #tpu.dot_dimension_numbers<[1], [0], [0], [1], [0, 0, 1, 1], [], []>} : vector<8x128xf32>, vector<128x128xf32>, vector<8x128xf32> -> vector<8x128xf32>
    %43 = arith.addf %41, %42 : vector<8x128xf32>
    %44 = arith.negf %43 : vector<8x128xf32>
    %45 = math.exp %44 : vector<8x128xf32>
    %cst_21 = arith.constant 1.000000e+00 : f32
    %46 = vector.broadcast %cst_21 : f32 to vector<8x128xf32>
    %47 = arith.addf %46, %45 : vector<8x128xf32>
    %48 = arith.divf %46, %47 : vector<8x128xf32>
    %49 = math.tanh %43 : vector<8x128xf32>
    %c96_i32_22 = arith.constant 96 : i32
    %50 = tpu.dynamic_rotate %48 by %c96_i32_22 dim 1 : vector<8x128xf32>, i32 -> vector<8x128xf32>
    %c64_i32_23 = arith.constant 64 : i32
    %51 = tpu.dynamic_rotate %49 by %c64_i32_23 dim 1 : vector<8x128xf32>, i32 -> vector<8x128xf32>
    %cst_24 = arith.constant 0.000000e+00 : f32
    %52 = vector.broadcast %cst_24 : f32 to vector<8x128xf32>
    %53 = arith.select %15, %51, %52 : vector<8x128xi1>, vector<8x128xf32>
    %c32_i32_25 = arith.constant 32 : i32
    %54 = tpu.dynamic_rotate %48 by %c32_i32_25 dim 1 : vector<8x128xf32>, i32 -> vector<8x128xf32>
    %55 = arith.mulf %50, %40 : vector<8x128xf32>
    %56 = arith.mulf %48, %53 : vector<8x128xf32>
    %57 = arith.addf %55, %56 : vector<8x128xf32>
    %58 = math.tanh %57 : vector<8x128xf32>
    %59 = arith.mulf %54, %58 : vector<8x128xf32>
    %cst_26 = arith.constant 1.000000e+00 : f32
    %60 = vector.broadcast %cst_26 : f32 to vector<8x128xf32>
    %61 = arith.cmpf ogt, %12, %60 : vector<8x128xf32>
    %62 = arith.select %61, %59, %39 : vector<8x128xi1>, vector<8x128xf32>
    %63 = arith.select %61, %57, %40 : vector<8x128xi1>, vector<8x128xf32>
    %64 = vector.extract_strided_slice %8 {offsets = [16, 0], sizes = [8, 128], strides = [1, 1]} : vector<64x128xf32> to vector<8x128xf32>
    %cst_27 = arith.constant dense<0.000000e+00> : vector<8x128xf32>
    %65 = tpu.matmul %62, %10, %cst_27 {dimension_numbers = #tpu.dot_dimension_numbers<[1], [0], [0], [1], [0, 0, 1, 1], [], []>} : vector<8x128xf32>, vector<128x128xf32>, vector<8x128xf32> -> vector<8x128xf32>
    %66 = arith.addf %64, %65 : vector<8x128xf32>
    %67 = arith.negf %66 : vector<8x128xf32>
    %68 = math.exp %67 : vector<8x128xf32>
    %cst_28 = arith.constant 1.000000e+00 : f32
    %69 = vector.broadcast %cst_28 : f32 to vector<8x128xf32>
    %70 = arith.addf %69, %68 : vector<8x128xf32>
    %71 = arith.divf %69, %70 : vector<8x128xf32>
    %72 = math.tanh %66 : vector<8x128xf32>
    %c96_i32_29 = arith.constant 96 : i32
    %73 = tpu.dynamic_rotate %71 by %c96_i32_29 dim 1 : vector<8x128xf32>, i32 -> vector<8x128xf32>
    %c64_i32_30 = arith.constant 64 : i32
    %74 = tpu.dynamic_rotate %72 by %c64_i32_30 dim 1 : vector<8x128xf32>, i32 -> vector<8x128xf32>
    %cst_31 = arith.constant 0.000000e+00 : f32
    %75 = vector.broadcast %cst_31 : f32 to vector<8x128xf32>
    %76 = arith.select %15, %74, %75 : vector<8x128xi1>, vector<8x128xf32>
    %c32_i32_32 = arith.constant 32 : i32
    %77 = tpu.dynamic_rotate %71 by %c32_i32_32 dim 1 : vector<8x128xf32>, i32 -> vector<8x128xf32>
    %78 = arith.mulf %73, %63 : vector<8x128xf32>
    %79 = arith.mulf %71, %76 : vector<8x128xf32>
    %80 = arith.addf %78, %79 : vector<8x128xf32>
    %81 = math.tanh %80 : vector<8x128xf32>
    %82 = arith.mulf %77, %81 : vector<8x128xf32>
    %cst_33 = arith.constant 2.000000e+00 : f32
    %83 = vector.broadcast %cst_33 : f32 to vector<8x128xf32>
    %84 = arith.cmpf ogt, %12, %83 : vector<8x128xf32>
    %85 = arith.select %84, %82, %62 : vector<8x128xi1>, vector<8x128xf32>
    %86 = arith.select %84, %80, %63 : vector<8x128xi1>, vector<8x128xf32>
    %87 = vector.extract_strided_slice %8 {offsets = [24, 0], sizes = [8, 128], strides = [1, 1]} : vector<64x128xf32> to vector<8x128xf32>
    %cst_34 = arith.constant dense<0.000000e+00> : vector<8x128xf32>
    %88 = tpu.matmul %85, %10, %cst_34 {dimension_numbers = #tpu.dot_dimension_numbers<[1], [0], [0], [1], [0, 0, 1, 1], [], []>} : vector<8x128xf32>, vector<128x128xf32>, vector<8x128xf32> -> vector<8x128xf32>
    %89 = arith.addf %87, %88 : vector<8x128xf32>
    %90 = arith.negf %89 : vector<8x128xf32>
    %91 = math.exp %90 : vector<8x128xf32>
    %cst_35 = arith.constant 1.000000e+00 : f32
    %92 = vector.broadcast %cst_35 : f32 to vector<8x128xf32>
    %93 = arith.addf %92, %91 : vector<8x128xf32>
    %94 = arith.divf %92, %93 : vector<8x128xf32>
    %95 = math.tanh %89 : vector<8x128xf32>
    %c96_i32_36 = arith.constant 96 : i32
    %96 = tpu.dynamic_rotate %94 by %c96_i32_36 dim 1 : vector<8x128xf32>, i32 -> vector<8x128xf32>
    %c64_i32_37 = arith.constant 64 : i32
    %97 = tpu.dynamic_rotate %95 by %c64_i32_37 dim 1 : vector<8x128xf32>, i32 -> vector<8x128xf32>
    %cst_38 = arith.constant 0.000000e+00 : f32
    %98 = vector.broadcast %cst_38 : f32 to vector<8x128xf32>
    %99 = arith.select %15, %97, %98 : vector<8x128xi1>, vector<8x128xf32>
    %c32_i32_39 = arith.constant 32 : i32
    %100 = tpu.dynamic_rotate %94 by %c32_i32_39 dim 1 : vector<8x128xf32>, i32 -> vector<8x128xf32>
    %101 = arith.mulf %96, %86 : vector<8x128xf32>
    %102 = arith.mulf %94, %99 : vector<8x128xf32>
    %103 = arith.addf %101, %102 : vector<8x128xf32>
    %104 = math.tanh %103 : vector<8x128xf32>
    %105 = arith.mulf %100, %104 : vector<8x128xf32>
    %cst_40 = arith.constant 3.000000e+00 : f32
    %106 = vector.broadcast %cst_40 : f32 to vector<8x128xf32>
    %107 = arith.cmpf ogt, %12, %106 : vector<8x128xf32>
    %108 = arith.select %107, %105, %85 : vector<8x128xi1>, vector<8x128xf32>
    %109 = arith.select %107, %103, %86 : vector<8x128xi1>, vector<8x128xf32>
    %110 = vector.extract_strided_slice %8 {offsets = [32, 0], sizes = [8, 128], strides = [1, 1]} : vector<64x128xf32> to vector<8x128xf32>
    %cst_41 = arith.constant dense<0.000000e+00> : vector<8x128xf32>
    %111 = tpu.matmul %108, %10, %cst_41 {dimension_numbers = #tpu.dot_dimension_numbers<[1], [0], [0], [1], [0, 0, 1, 1], [], []>} : vector<8x128xf32>, vector<128x128xf32>, vector<8x128xf32> -> vector<8x128xf32>
    %112 = arith.addf %110, %111 : vector<8x128xf32>
    %113 = arith.negf %112 : vector<8x128xf32>
    %114 = math.exp %113 : vector<8x128xf32>
    %cst_42 = arith.constant 1.000000e+00 : f32
    %115 = vector.broadcast %cst_42 : f32 to vector<8x128xf32>
    %116 = arith.addf %115, %114 : vector<8x128xf32>
    %117 = arith.divf %115, %116 : vector<8x128xf32>
    %118 = math.tanh %112 : vector<8x128xf32>
    %c96_i32_43 = arith.constant 96 : i32
    %119 = tpu.dynamic_rotate %117 by %c96_i32_43 dim 1 : vector<8x128xf32>, i32 -> vector<8x128xf32>
    %c64_i32_44 = arith.constant 64 : i32
    %120 = tpu.dynamic_rotate %118 by %c64_i32_44 dim 1 : vector<8x128xf32>, i32 -> vector<8x128xf32>
    %cst_45 = arith.constant 0.000000e+00 : f32
    %121 = vector.broadcast %cst_45 : f32 to vector<8x128xf32>
    %122 = arith.select %15, %120, %121 : vector<8x128xi1>, vector<8x128xf32>
    %c32_i32_46 = arith.constant 32 : i32
    %123 = tpu.dynamic_rotate %117 by %c32_i32_46 dim 1 : vector<8x128xf32>, i32 -> vector<8x128xf32>
    %124 = arith.mulf %119, %109 : vector<8x128xf32>
    %125 = arith.mulf %117, %122 : vector<8x128xf32>
    %126 = arith.addf %124, %125 : vector<8x128xf32>
    %127 = math.tanh %126 : vector<8x128xf32>
    %128 = arith.mulf %123, %127 : vector<8x128xf32>
    %cst_47 = arith.constant 4.000000e+00 : f32
    %129 = vector.broadcast %cst_47 : f32 to vector<8x128xf32>
    %130 = arith.cmpf ogt, %12, %129 : vector<8x128xf32>
    %131 = arith.select %130, %128, %108 : vector<8x128xi1>, vector<8x128xf32>
    %132 = arith.select %130, %126, %109 : vector<8x128xi1>, vector<8x128xf32>
    %133 = vector.extract_strided_slice %8 {offsets = [40, 0], sizes = [8, 128], strides = [1, 1]} : vector<64x128xf32> to vector<8x128xf32>
    %cst_48 = arith.constant dense<0.000000e+00> : vector<8x128xf32>
    %134 = tpu.matmul %131, %10, %cst_48 {dimension_numbers = #tpu.dot_dimension_numbers<[1], [0], [0], [1], [0, 0, 1, 1], [], []>} : vector<8x128xf32>, vector<128x128xf32>, vector<8x128xf32> -> vector<8x128xf32>
    %135 = arith.addf %133, %134 : vector<8x128xf32>
    %136 = arith.negf %135 : vector<8x128xf32>
    %137 = math.exp %136 : vector<8x128xf32>
    %cst_49 = arith.constant 1.000000e+00 : f32
    %138 = vector.broadcast %cst_49 : f32 to vector<8x128xf32>
    %139 = arith.addf %138, %137 : vector<8x128xf32>
    %140 = arith.divf %138, %139 : vector<8x128xf32>
    %141 = math.tanh %135 : vector<8x128xf32>
    %c96_i32_50 = arith.constant 96 : i32
    %142 = tpu.dynamic_rotate %140 by %c96_i32_50 dim 1 : vector<8x128xf32>, i32 -> vector<8x128xf32>
    %c64_i32_51 = arith.constant 64 : i32
    %143 = tpu.dynamic_rotate %141 by %c64_i32_51 dim 1 : vector<8x128xf32>, i32 -> vector<8x128xf32>
    %cst_52 = arith.constant 0.000000e+00 : f32
    %144 = vector.broadcast %cst_52 : f32 to vector<8x128xf32>
    %145 = arith.select %15, %143, %144 : vector<8x128xi1>, vector<8x128xf32>
    %c32_i32_53 = arith.constant 32 : i32
    %146 = tpu.dynamic_rotate %140 by %c32_i32_53 dim 1 : vector<8x128xf32>, i32 -> vector<8x128xf32>
    %147 = arith.mulf %142, %132 : vector<8x128xf32>
    %148 = arith.mulf %140, %145 : vector<8x128xf32>
    %149 = arith.addf %147, %148 : vector<8x128xf32>
    %150 = math.tanh %149 : vector<8x128xf32>
    %151 = arith.mulf %146, %150 : vector<8x128xf32>
    %cst_54 = arith.constant 5.000000e+00 : f32
    %152 = vector.broadcast %cst_54 : f32 to vector<8x128xf32>
    %153 = arith.cmpf ogt, %12, %152 : vector<8x128xf32>
    %154 = arith.select %153, %151, %131 : vector<8x128xi1>, vector<8x128xf32>
    %155 = arith.select %153, %149, %132 : vector<8x128xi1>, vector<8x128xf32>
    %156 = vector.extract_strided_slice %8 {offsets = [48, 0], sizes = [8, 128], strides = [1, 1]} : vector<64x128xf32> to vector<8x128xf32>
    %cst_55 = arith.constant dense<0.000000e+00> : vector<8x128xf32>
    %157 = tpu.matmul %154, %10, %cst_55 {dimension_numbers = #tpu.dot_dimension_numbers<[1], [0], [0], [1], [0, 0, 1, 1], [], []>} : vector<8x128xf32>, vector<128x128xf32>, vector<8x128xf32> -> vector<8x128xf32>
    %158 = arith.addf %156, %157 : vector<8x128xf32>
    %159 = arith.negf %158 : vector<8x128xf32>
    %160 = math.exp %159 : vector<8x128xf32>
    %cst_56 = arith.constant 1.000000e+00 : f32
    %161 = vector.broadcast %cst_56 : f32 to vector<8x128xf32>
    %162 = arith.addf %161, %160 : vector<8x128xf32>
    %163 = arith.divf %161, %162 : vector<8x128xf32>
    %164 = math.tanh %158 : vector<8x128xf32>
    %c96_i32_57 = arith.constant 96 : i32
    %165 = tpu.dynamic_rotate %163 by %c96_i32_57 dim 1 : vector<8x128xf32>, i32 -> vector<8x128xf32>
    %c64_i32_58 = arith.constant 64 : i32
    %166 = tpu.dynamic_rotate %164 by %c64_i32_58 dim 1 : vector<8x128xf32>, i32 -> vector<8x128xf32>
    %cst_59 = arith.constant 0.000000e+00 : f32
    %167 = vector.broadcast %cst_59 : f32 to vector<8x128xf32>
    %168 = arith.select %15, %166, %167 : vector<8x128xi1>, vector<8x128xf32>
    %c32_i32_60 = arith.constant 32 : i32
    %169 = tpu.dynamic_rotate %163 by %c32_i32_60 dim 1 : vector<8x128xf32>, i32 -> vector<8x128xf32>
    %170 = arith.mulf %165, %155 : vector<8x128xf32>
    %171 = arith.mulf %163, %168 : vector<8x128xf32>
    %172 = arith.addf %170, %171 : vector<8x128xf32>
    %173 = math.tanh %172 : vector<8x128xf32>
    %174 = arith.mulf %169, %173 : vector<8x128xf32>
    %cst_61 = arith.constant 6.000000e+00 : f32
    %175 = vector.broadcast %cst_61 : f32 to vector<8x128xf32>
    %176 = arith.cmpf ogt, %12, %175 : vector<8x128xf32>
    %177 = arith.select %176, %174, %154 : vector<8x128xi1>, vector<8x128xf32>
    %178 = arith.select %176, %172, %155 : vector<8x128xi1>, vector<8x128xf32>
    %179 = vector.extract_strided_slice %8 {offsets = [56, 0], sizes = [8, 128], strides = [1, 1]} : vector<64x128xf32> to vector<8x128xf32>
    %cst_62 = arith.constant dense<0.000000e+00> : vector<8x128xf32>
    %180 = tpu.matmul %177, %10, %cst_62 {dimension_numbers = #tpu.dot_dimension_numbers<[1], [0], [0], [1], [0, 0, 1, 1], [], []>} : vector<8x128xf32>, vector<128x128xf32>, vector<8x128xf32> -> vector<8x128xf32>
    %181 = arith.addf %179, %180 : vector<8x128xf32>
    %182 = arith.negf %181 : vector<8x128xf32>
    %183 = math.exp %182 : vector<8x128xf32>
    %cst_63 = arith.constant 1.000000e+00 : f32
    %184 = vector.broadcast %cst_63 : f32 to vector<8x128xf32>
    %185 = arith.addf %184, %183 : vector<8x128xf32>
    %186 = arith.divf %184, %185 : vector<8x128xf32>
    %187 = math.tanh %181 : vector<8x128xf32>
    %c96_i32_64 = arith.constant 96 : i32
    %188 = tpu.dynamic_rotate %186 by %c96_i32_64 dim 1 : vector<8x128xf32>, i32 -> vector<8x128xf32>
    %c64_i32_65 = arith.constant 64 : i32
    %189 = tpu.dynamic_rotate %187 by %c64_i32_65 dim 1 : vector<8x128xf32>, i32 -> vector<8x128xf32>
    %cst_66 = arith.constant 0.000000e+00 : f32
    %190 = vector.broadcast %cst_66 : f32 to vector<8x128xf32>
    %191 = arith.select %15, %189, %190 : vector<8x128xi1>, vector<8x128xf32>
    %c32_i32_67 = arith.constant 32 : i32
    %192 = tpu.dynamic_rotate %186 by %c32_i32_67 dim 1 : vector<8x128xf32>, i32 -> vector<8x128xf32>
    %193 = arith.mulf %188, %178 : vector<8x128xf32>
    %194 = arith.mulf %186, %191 : vector<8x128xf32>
    %195 = arith.addf %193, %194 : vector<8x128xf32>
    %196 = math.tanh %195 : vector<8x128xf32>
    %197 = arith.mulf %192, %196 : vector<8x128xf32>
    %cst_68 = arith.constant 7.000000e+00 : f32
    %198 = vector.broadcast %cst_68 : f32 to vector<8x128xf32>
    %199 = arith.cmpf ogt, %12, %198 : vector<8x128xf32>
    %200 = arith.select %199, %197, %177 : vector<8x128xi1>, vector<8x128xf32>
    %c0_69 = arith.constant 0 : index
    %c0_70 = arith.constant 0 : index
    %c0_71 = arith.constant 0 : index
    %201 = vector.load %arg6[%c0_69, %c0_70, %c0_71] : memref<1x128x128xf32, #tpu.memory_space<vmem>>, vector<1x128x128xf32>
    %202 = vector.shape_cast %201 : vector<1x128x128xf32> to vector<128x128xf32>
    %cst_72 = arith.constant dense<0.000000e+00> : vector<8x128xf32>
    %203 = tpu.matmul %200, %202, %cst_72 {dimension_numbers = #tpu.dot_dimension_numbers<[1], [0], [0], [1], [0, 0, 1, 1], [], []>} : vector<8x128xf32>, vector<128x128xf32>, vector<8x128xf32> -> vector<8x128xf32>
    %c0_73 = arith.constant 0 : index
    %c0_74 = arith.constant 0 : index
    %c0_75 = arith.constant 0 : index
    %204 = vector.load %arg7[%c0_73, %c0_74, %c0_75] : memref<1x1x128xf32, #tpu.memory_space<vmem>>, vector<1x1x128xf32>
    %205 = vector.shape_cast %204 : vector<1x1x128xf32> to vector<1x128xf32>
    %206 = vector.broadcast %205 : vector<1x128xf32> to vector<8x128xf32>
    %207 = arith.addf %203, %206 : vector<8x128xf32>
    %c0_i32 = arith.constant 0 : i32
    %208 = arith.cmpi eq, %arg0, %c0_i32 : i32
    %209 = arith.extui %208 : i1 to i32
    %c0_i32_76 = arith.constant 0 : i32
    %210 = arith.cmpi ne, %209, %c0_i32_76 : i32
    scf.if %210 {
      %c0_78 = arith.constant 0 : index
      %c0_79 = arith.constant 0 : index
      %214 = vector.load %arg23[%c0_78, %c0_79] : memref<8x128xf32, #tpu.memory_space<vmem>>, vector<8x128xf32>
      tpu.vector_store %arg23[%c0_78, %c0_79], %207 {strides = array<i32>} : memref<8x128xf32, #tpu.memory_space<vmem>>, vector<8x128xf32>,
    } else {
    }
    %c1_i32 = arith.constant 1 : i32
    %211 = arith.cmpi eq, %arg0, %c1_i32 : i32
    %212 = arith.extui %211 : i1 to i32
    %c0_i32_77 = arith.constant 0 : i32
    %213 = arith.cmpi ne, %212, %c0_i32_77 : i32
    scf.if %213 {
      %c0_78 = arith.constant 0 : index
      %c0_79 = arith.constant 0 : index
      %214 = vector.load %arg8[%c0_78, %c0_79] : memref<8x128xf32, #tpu.memory_space<vmem>>, vector<8x128xf32>
      %c0_80 = arith.constant 0 : index
      %c0_81 = arith.constant 0 : index
      %215 = vector.load %arg23[%c0_80, %c0_81] : memref<8x128xf32, #tpu.memory_space<vmem>>, vector<8x128xf32>
      %c0_82 = arith.constant 0 : index
      %c0_83 = arith.constant 0 : index
      %216 = vector.load %arg9[%c0_82, %c0_83] : memref<128x512xf32, #tpu.memory_space<vmem>>, vector<128x512xf32>
      %cst_84 = arith.constant dense<0.000000e+00> : vector<8x512xf32>
      %217 = tpu.matmul %214, %216, %cst_84 {dimension_numbers = #tpu.dot_dimension_numbers<[1], [0], [0], [1], [0, 0, 1, 1], [], []>} : vector<8x128xf32>, vector<128x512xf32>, vector<8x512xf32> -> vector<8x512xf32>
      %c0_85 = arith.constant 0 : index
      %c0_86 = arith.constant 0 : index
      %218 = vector.load %arg10[%c0_85, %c0_86] : memref<1x512xf32, #tpu.memory_space<vmem>>, vector<1x512xf32>
      %219 = vector.broadcast %218 : vector<1x512xf32> to vector<8x512xf32>
      %220 = arith.addf %217, %219 : vector<8x512xf32>
      %cst_87 = arith.constant 0.000000e+00 : f32
      %221 = vector.broadcast %cst_87 : f32 to vector<8x512xf32>
      %222 = arith.maximumf %220, %221 : vector<8x512xf32>
      %223 = vector.extract_strided_slice %222 {offsets = [0, 0], sizes = [8, 128], strides = [1, 1]} : vector<8x512xf32> to vector<8x128xf32>
      %c0_88 = arith.constant 0 : index
      %c0_89 = arith.constant 0 : index
      %c0_90 = arith.constant 0 : index
      %224 = vector.load %arg11[%c0_88, %c0_89, %c0_90] : memref<4x128x128xf32, #tpu.memory_space<vmem>>, vector<1x128x128xf32>
      %225 = vector.shape_cast %224 : vector<1x128x128xf32> to vector<128x128xf32>
      %cst_91 = arith.constant dense<0.000000e+00> : vector<8x128xf32>
      %226 = tpu.matmul %223, %225, %cst_91 {dimension_numbers = #tpu.dot_dimension_numbers<[1], [0], [0], [1], [0, 0, 1, 1], [], []>} : vector<8x128xf32>, vector<128x128xf32>, vector<8x128xf32> -> vector<8x128xf32>
      %c0_92 = arith.constant 0 : index
      %c0_93 = arith.constant 0 : index
      %c0_94 = arith.constant 0 : index
      %227 = vector.load %arg12[%c0_92, %c0_93, %c0_94] : memref<4x1x128xf32, #tpu.memory_space<vmem>>, vector<1x1x128xf32>
      %228 = vector.shape_cast %227 : vector<1x1x128xf32> to vector<1x128xf32>
      %229 = vector.broadcast %228 : vector<1x128xf32> to vector<8x128xf32>
      %230 = arith.addf %226, %229 : vector<8x128xf32>
      %231 = vector.extract_strided_slice %222 {offsets = [0, 128], sizes = [8, 128], strides = [1, 1]} : vector<8x512xf32> to vector<8x128xf32>
      %c1 = arith.constant 1 : index
      %c0_95 = arith.constant 0 : index
      %c0_96 = arith.constant 0 : index
      %232 = vector.load %arg11[%c1, %c0_95, %c0_96] : memref<4x128x128xf32, #tpu.memory_space<vmem>>, vector<1x128x128xf32>
      %233 = vector.shape_cast %232 : vector<1x128x128xf32> to vector<128x128xf32>
      %cst_97 = arith.constant dense<0.000000e+00> : vector<8x128xf32>
      %234 = tpu.matmul %231, %233, %cst_97 {dimension_numbers = #tpu.dot_dimension_numbers<[1], [0], [0], [1], [0, 0, 1, 1], [], []>} : vector<8x128xf32>, vector<128x128xf32>, vector<8x128xf32> -> vector<8x128xf32>
      %c1_98 = arith.constant 1 : index
      %c0_99 = arith.constant 0 : index
      %c0_100 = arith.constant 0 : index
      %235 = vector.load %arg12[%c1_98, %c0_99, %c0_100] : memref<4x1x128xf32, #tpu.memory_space<vmem>>, vector<1x1x128xf32>
      %236 = vector.shape_cast %235 : vector<1x1x128xf32> to vector<1x128xf32>
      %237 = vector.broadcast %236 : vector<1x128xf32> to vector<8x128xf32>
      %238 = arith.addf %234, %237 : vector<8x128xf32>
      %239 = vector.extract_strided_slice %222 {offsets = [0, 256], sizes = [8, 128], strides = [1, 1]} : vector<8x512xf32> to vector<8x128xf32>
      %c2 = arith.constant 2 : index
      %c0_101 = arith.constant 0 : index
      %c0_102 = arith.constant 0 : index
      %240 = vector.load %arg11[%c2, %c0_101, %c0_102] : memref<4x128x128xf32, #tpu.memory_space<vmem>>, vector<1x128x128xf32>
      %241 = vector.shape_cast %240 : vector<1x128x128xf32> to vector<128x128xf32>
      %cst_103 = arith.constant dense<0.000000e+00> : vector<8x128xf32>
      %242 = tpu.matmul %239, %241, %cst_103 {dimension_numbers = #tpu.dot_dimension_numbers<[1], [0], [0], [1], [0, 0, 1, 1], [], []>} : vector<8x128xf32>, vector<128x128xf32>, vector<8x128xf32> -> vector<8x128xf32>
      %c2_104 = arith.constant 2 : index
      %c0_105 = arith.constant 0 : index
      %c0_106 = arith.constant 0 : index
      %243 = vector.load %arg12[%c2_104, %c0_105, %c0_106] : memref<4x1x128xf32, #tpu.memory_space<vmem>>, vector<1x1x128xf32>
      %244 = vector.shape_cast %243 : vector<1x1x128xf32> to vector<1x128xf32>
      %245 = vector.broadcast %244 : vector<1x128xf32> to vector<8x128xf32>
      %246 = arith.addf %242, %245 : vector<8x128xf32>
      %247 = vector.extract_strided_slice %222 {offsets = [0, 384], sizes = [8, 128], strides = [1, 1]} : vector<8x512xf32> to vector<8x128xf32>
      %c3 = arith.constant 3 : index
      %c0_107 = arith.constant 0 : index
      %c0_108 = arith.constant 0 : index
      %248 = vector.load %arg11[%c3, %c0_107, %c0_108] : memref<4x128x128xf32, #tpu.memory_space<vmem>>, vector<1x128x128xf32>
      %249 = vector.shape_cast %248 : vector<1x128x128xf32> to vector<128x128xf32>
      %cst_109 = arith.constant dense<0.000000e+00> : vector<8x128xf32>
      %250 = tpu.matmul %247, %249, %cst_109 {dimension_numbers = #tpu.dot_dimension_numbers<[1], [0], [0], [1], [0, 0, 1, 1], [], []>} : vector<8x128xf32>, vector<128x128xf32>, vector<8x128xf32> -> vector<8x128xf32>
      %c3_110 = arith.constant 3 : index
      %c0_111 = arith.constant 0 : index
      %c0_112 = arith.constant 0 : index
      %251 = vector.load %arg12[%c3_110, %c0_111, %c0_112] : memref<4x1x128xf32, #tpu.memory_space<vmem>>, vector<1x1x128xf32>
      %252 = vector.shape_cast %251 : vector<1x1x128xf32> to vector<1x128xf32>
      %253 = vector.broadcast %252 : vector<1x128xf32> to vector<8x128xf32>
      %254 = arith.addf %250, %253 : vector<8x128xf32>
      %255 = arith.subf %230, %215 : vector<8x128xf32>
      %256 = arith.mulf %255, %255 : vector<8x128xf32>
      %cst_113 = arith.constant -5.000000e-01 : f32
      %257 = vector.broadcast %cst_113 : f32 to vector<8x128xf32>
      %258 = arith.mulf %257, %256 : vector<8x128xf32>
      %cst_114 = arith.constant 0.000000e+00 : f32
      %259 = vector.broadcast %cst_114 : f32 to vector<8x128xf32>
      %260 = arith.subf %259, %238 : vector<8x128xf32>
      %261 = math.exp %260 : vector<8x128xf32>
      %262 = arith.mulf %258, %261 : vector<8x128xf32>
      %263 = arith.subf %246, %207 : vector<8x128xf32>
      %264 = arith.mulf %263, %263 : vector<8x128xf32>
      %cst_115 = arith.constant -5.000000e-01 : f32
      %265 = vector.broadcast %cst_115 : f32 to vector<8x128xf32>
      %266 = arith.mulf %265, %264 : vector<8x128xf32>
      %cst_116 = arith.constant 0.000000e+00 : f32
      %267 = vector.broadcast %cst_116 : f32 to vector<8x128xf32>
      %268 = arith.subf %267, %254 : vector<8x128xf32>
      %269 = math.exp %268 : vector<8x128xf32>
      %270 = arith.mulf %266, %269 : vector<8x128xf32>
      %cst_117 = arith.constant dense<0.000000e+00> : vector<8xf32>
      %271 = vector.multi_reduction <add>, %262, %cst_117 [1] : vector<8x128xf32> to vector<8xf32>
      %272 = vector.shape_cast %271 : vector<8xf32> to vector<8x1xf32>
      %cst_118 = arith.constant dense<0.000000e+00> : vector<1xf32>
      %273 = vector.multi_reduction <add>, %272, %cst_118 [0] : vector<8x1xf32> to vector<1xf32>
      %274 = vector.shape_cast %273 : vector<1xf32> to vector<1x1xf32>
      %cst_119 = arith.constant dense<0.000000e+00> : vector<8xf32>
      %275 = vector.multi_reduction <add>, %270, %cst_119 [1] : vector<8x128xf32> to vector<8xf32>
      %276 = vector.shape_cast %275 : vector<8xf32> to vector<8x1xf32>
      %cst_120 = arith.constant dense<0.000000e+00> : vector<1xf32>
      %277 = vector.multi_reduction <add>, %276, %cst_120 [0] : vector<8x1xf32> to vector<1xf32>
      %278 = vector.shape_cast %277 : vector<1xf32> to vector<1x1xf32>
      %279 = arith.addf %274, %278 : vector<1x1xf32>
      %cst_121 = arith.constant 1.250000e-01 : f32
      %280 = vector.broadcast %cst_121 : f32 to vector<1x1xf32>
      %281 = arith.mulf %279, %280 : vector<1x1xf32>
      %c0_122 = arith.constant 0 : index
      %c0_123 = arith.constant 0 : index
      %c0_124 = arith.constant 0 : index
      %282 = vector.load %arg13[%c0_122, %c0_123, %c0_124] : memref<3x128x128xf32, #tpu.memory_space<vmem>>, vector<1x128x128xf32>
      %283 = vector.shape_cast %282 : vector<1x128x128xf32> to vector<128x128xf32>
      %cst_125 = arith.constant dense<0.000000e+00> : vector<8x128xf32>
      %284 = tpu.matmul %214, %283, %cst_125 {dimension_numbers = #tpu.dot_dimension_numbers<[1], [0], [0], [1], [0, 0, 1, 1], [], []>} : vector<8x128xf32>, vector<128x128xf32>, vector<8x128xf32> -> vector<8x128xf32>
      %c1_126 = arith.constant 1 : index
      %c0_127 = arith.constant 0 : index
      %c0_128 = arith.constant 0 : index
      %285 = vector.load %arg13[%c1_126, %c0_127, %c0_128] : memref<3x128x128xf32, #tpu.memory_space<vmem>>, vector<1x128x128xf32>
      %286 = vector.shape_cast %285 : vector<1x128x128xf32> to vector<128x128xf32>
      %cst_129 = arith.constant dense<0.000000e+00> : vector<8x128xf32>
      %287 = tpu.matmul %207, %286, %cst_129 {dimension_numbers = #tpu.dot_dimension_numbers<[1], [0], [0], [1], [0, 0, 1, 1], [], []>} : vector<8x128xf32>, vector<128x128xf32>, vector<8x128xf32> -> vector<8x128xf32>
      %288 = arith.addf %284, %287 : vector<8x128xf32>
      %c2_130 = arith.constant 2 : index
      %c0_131 = arith.constant 0 : index
      %c0_132 = arith.constant 0 : index
      %289 = vector.load %arg13[%c2_130, %c0_131, %c0_132] : memref<3x128x128xf32, #tpu.memory_space<vmem>>, vector<1x128x128xf32>
      %290 = vector.shape_cast %289 : vector<1x128x128xf32> to vector<128x128xf32>
      %cst_133 = arith.constant dense<0.000000e+00> : vector<8x128xf32>
      %291 = tpu.matmul %215, %290, %cst_133 {dimension_numbers = #tpu.dot_dimension_numbers<[1], [0], [0], [1], [0, 0, 1, 1], [], []>} : vector<8x128xf32>, vector<128x128xf32>, vector<8x128xf32> -> vector<8x128xf32>
      %292 = arith.addf %288, %291 : vector<8x128xf32>
      %c0_134 = arith.constant 0 : index
      %c0_135 = arith.constant 0 : index
      %293 = vector.load %arg14[%c0_134, %c0_135] : memref<1x128xf32, #tpu.memory_space<vmem>>, vector<1x128xf32>
      %294 = vector.broadcast %293 : vector<1x128xf32> to vector<8x128xf32>
      %295 = arith.addf %292, %294 : vector<8x128xf32>
      %296 = math.tanh %295 : vector<8x128xf32>
      %c0_136 = arith.constant 0 : index
      %c0_137 = arith.constant 0 : index
      %297 = vector.load %arg15[%c0_136, %c0_137] : memref<128x128xf32, #tpu.memory_space<vmem>>, vector<128x128xf32>
      %cst_138 = arith.constant dense<0.000000e+00> : vector<8x128xf32>
      %298 = tpu.matmul %296, %297, %cst_138 {dimension_numbers = #tpu.dot_dimension_numbers<[1], [0], [0], [1], [0, 0, 1, 1], [], []>} : vector<8x128xf32>, vector<128x128xf32>, vector<8x128xf32> -> vector<8x128xf32>
      %c0_139 = arith.constant 0 : index
      %c0_140 = arith.constant 0 : index
      %299 = vector.load %arg16[%c0_139, %c0_140] : memref<1x128xf32, #tpu.memory_space<vmem>>, vector<1x128xf32>
      %300 = vector.broadcast %299 : vector<1x128xf32> to vector<8x128xf32>
      %301 = arith.addf %298, %300 : vector<8x128xf32>
      %302 = math.tanh %301 : vector<8x128xf32>
      %c0_141 = arith.constant 0 : index
      %c0_142 = arith.constant 0 : index
      %303 = vector.load %arg17[%c0_141, %c0_142] : memref<128x128xf32, #tpu.memory_space<vmem>>, vector<128x128xf32>
      %cst_143 = arith.constant dense<0.000000e+00> : vector<8x128xf32>
      %304 = tpu.matmul %302, %303, %cst_143 {dimension_numbers = #tpu.dot_dimension_numbers<[1], [0], [0], [1], [0, 0, 1, 1], [], []>} : vector<8x128xf32>, vector<128x128xf32>, vector<8x128xf32> -> vector<8x128xf32>
      %c0_144 = arith.constant 0 : index
      %c0_145 = arith.constant 0 : index
      %305 = vector.load %arg18[%c0_144, %c0_145] : memref<1x128xf32, #tpu.memory_space<vmem>>, vector<1x128xf32>
      %306 = vector.broadcast %305 : vector<1x128xf32> to vector<8x128xf32>
      %307 = arith.addf %304, %306 : vector<8x128xf32>
      %c0_146 = arith.constant 0 : index
      %c0_147 = arith.constant 0 : index
      %308 = vector.load %arg21[%c0_146, %c0_147] : memref<8x128xf32, #tpu.memory_space<vmem>>, vector<8x128xf32>
      tpu.vector_store %arg21[%c0_146, %c0_147], %307 {strides = array<i32>} : memref<8x128xf32, #tpu.memory_space<vmem>>, vector<8x128xf32>,
      %c0_148 = arith.constant 0 : index
      %c0_149 = arith.constant 0 : index
      %309 = vector.load %arg19[%c0_148, %c0_149] : memref<128x384xf32, #tpu.memory_space<vmem>>, vector<128x384xf32>
      %cst_150 = arith.constant dense<0.000000e+00> : vector<8x384xf32>
      %310 = tpu.matmul %302, %309, %cst_150 {dimension_numbers = #tpu.dot_dimension_numbers<[1], [0], [0], [1], [0, 0, 1, 1], [], []>} : vector<8x128xf32>, vector<128x384xf32>, vector<8x384xf32> -> vector<8x384xf32>
      %c0_151 = arith.constant 0 : index
      %c0_152 = arith.constant 0 : index
      %311 = vector.load %arg20[%c0_151, %c0_152] : memref<1x384xf32, #tpu.memory_space<vmem>>, vector<1x384xf32>
      %312 = vector.broadcast %311 : vector<1x384xf32> to vector<8x384xf32>
      %313 = arith.addf %310, %312 : vector<8x384xf32>
      %314 = vector.extract_strided_slice %313 {offsets = [0, 0], sizes = [8, 128], strides = [1, 1]} : vector<8x384xf32> to vector<8x128xf32>
      %315 = arith.mulf %314, %314 : vector<8x128xf32>
      %cst_153 = arith.constant dense<0.000000e+00> : vector<8xf32>
      %316 = vector.multi_reduction <add>, %315, %cst_153 [1] : vector<8x128xf32> to vector<8xf32>
      %317 = vector.shape_cast %316 : vector<8xf32> to vector<8x1xf32>
      %318 = math.rsqrt %317 : vector<8x1xf32>
      %319 = vector.broadcast %318 : vector<8x1xf32> to vector<8x128xf32>
      %320 = arith.mulf %314, %319 : vector<8x128xf32>
      %321 = arith.mulf %214, %214 : vector<8x128xf32>
      %cst_154 = arith.constant dense<0.000000e+00> : vector<8xf32>
      %322 = vector.multi_reduction <add>, %321, %cst_154 [1] : vector<8x128xf32> to vector<8xf32>
      %323 = vector.shape_cast %322 : vector<8xf32> to vector<8x1xf32>
      %324 = math.rsqrt %323 : vector<8x1xf32>
      %325 = vector.broadcast %324 : vector<8x1xf32> to vector<8x128xf32>
      %326 = arith.mulf %214, %325 : vector<8x128xf32>
      %327 = arith.mulf %326, %320 : vector<8x128xf32>
      %cst_155 = arith.constant dense<0.000000e+00> : vector<8xf32>
      %328 = vector.multi_reduction <add>, %327, %cst_155 [1] : vector<8x128xf32> to vector<8xf32>
      %329 = vector.shape_cast %328 : vector<8xf32> to vector<8x1xf32>
      %cst_156 = arith.constant dense<0.000000e+00> : vector<8x8xf32>
      %330 = tpu.matmul %326, %320, %cst_156 {dimension_numbers = #tpu.dot_dimension_numbers<[1], [1], [0], [0], [0, 0, 1, 0], [], []>} : vector<8x128xf32>, vector<8x128xf32>, vector<8x8xf32> -> vector<8x8xf32>
      %cst_157 = arith.constant dense<0xFF800000> : vector<8xf32>
      %331 = vector.multi_reduction <maximumf>, %330, %cst_157 [1] : vector<8x8xf32> to vector<8xf32>
      %332 = vector.shape_cast %331 : vector<8xf32> to vector<8x1xf32>
      %333 = vector.broadcast %332 : vector<8x1xf32> to vector<8x8xf32>
      %334 = arith.subf %330, %333 : vector<8x8xf32>
      %335 = math.exp %334 : vector<8x8xf32>
      %cst_158 = arith.constant dense<0.000000e+00> : vector<8xf32>
      %336 = vector.multi_reduction <add>, %335, %cst_158 [1] : vector<8x8xf32> to vector<8xf32>
      %337 = vector.shape_cast %336 : vector<8xf32> to vector<8x1xf32>
      %338 = math.log %337 : vector<8x1xf32>
      %339 = arith.addf %332, %338 : vector<8x1xf32>
      %340 = arith.subf %329, %339 : vector<8x1xf32>
      %cst_159 = arith.constant dense<0.000000e+00> : vector<1xf32>
      %341 = vector.multi_reduction <add>, %340, %cst_159 [0] : vector<8x1xf32> to vector<1xf32>
      %342 = vector.shape_cast %341 : vector<1xf32> to vector<1x1xf32>
      %cst_160 = arith.constant 1.250000e-01 : f32
      %343 = vector.broadcast %cst_160 : f32 to vector<1x1xf32>
      %344 = arith.mulf %342, %343 : vector<1x1xf32>
      %cst_161 = arith.constant 0.000000e+00 : f32
      %345 = vector.broadcast %cst_161 : f32 to vector<1x1xf32>
      %346 = arith.subf %345, %344 : vector<1x1xf32>
      %347 = vector.extract_strided_slice %313 {offsets = [0, 128], sizes = [8, 128], strides = [1, 1]} : vector<8x384xf32> to vector<8x128xf32>
      %348 = arith.mulf %347, %347 : vector<8x128xf32>
      %cst_162 = arith.constant dense<0.000000e+00> : vector<8xf32>
      %349 = vector.multi_reduction <add>, %348, %cst_162 [1] : vector<8x128xf32> to vector<8xf32>
      %350 = vector.shape_cast %349 : vector<8xf32> to vector<8x1xf32>
      %351 = math.rsqrt %350 : vector<8x1xf32>
      %352 = vector.broadcast %351 : vector<8x1xf32> to vector<8x128xf32>
      %353 = arith.mulf %347, %352 : vector<8x128xf32>
      %354 = arith.mulf %215, %215 : vector<8x128xf32>
      %cst_163 = arith.constant dense<0.000000e+00> : vector<8xf32>
      %355 = vector.multi_reduction <add>, %354, %cst_163 [1] : vector<8x128xf32> to vector<8xf32>
      %356 = vector.shape_cast %355 : vector<8xf32> to vector<8x1xf32>
      %357 = math.rsqrt %356 : vector<8x1xf32>
      %358 = vector.broadcast %357 : vector<8x1xf32> to vector<8x128xf32>
      %359 = arith.mulf %215, %358 : vector<8x128xf32>
      %360 = arith.mulf %359, %353 : vector<8x128xf32>
      %cst_164 = arith.constant dense<0.000000e+00> : vector<8xf32>
      %361 = vector.multi_reduction <add>, %360, %cst_164 [1] : vector<8x128xf32> to vector<8xf32>
      %362 = vector.shape_cast %361 : vector<8xf32> to vector<8x1xf32>
      %cst_165 = arith.constant dense<0.000000e+00> : vector<8x8xf32>
      %363 = tpu.matmul %359, %353, %cst_165 {dimension_numbers = #tpu.dot_dimension_numbers<[1], [1], [0], [0], [0, 0, 1, 0], [], []>} : vector<8x128xf32>, vector<8x128xf32>, vector<8x8xf32> -> vector<8x8xf32>
      %cst_166 = arith.constant dense<0xFF800000> : vector<8xf32>
      %364 = vector.multi_reduction <maximumf>, %363, %cst_166 [1] : vector<8x8xf32> to vector<8xf32>
      %365 = vector.shape_cast %364 : vector<8xf32> to vector<8x1xf32>
      %366 = vector.broadcast %365 : vector<8x1xf32> to vector<8x8xf32>
      %367 = arith.subf %363, %366 : vector<8x8xf32>
      %368 = math.exp %367 : vector<8x8xf32>
      %cst_167 = arith.constant dense<0.000000e+00> : vector<8xf32>
      %369 = vector.multi_reduction <add>, %368, %cst_167 [1] : vector<8x8xf32> to vector<8xf32>
      %370 = vector.shape_cast %369 : vector<8xf32> to vector<8x1xf32>
      %371 = math.log %370 : vector<8x1xf32>
      %372 = arith.addf %365, %371 : vector<8x1xf32>
      %373 = arith.subf %362, %372 : vector<8x1xf32>
      %cst_168 = arith.constant dense<0.000000e+00> : vector<1xf32>
      %374 = vector.multi_reduction <add>, %373, %cst_168 [0] : vector<8x1xf32> to vector<1xf32>
      %375 = vector.shape_cast %374 : vector<1xf32> to vector<1x1xf32>
      %cst_169 = arith.constant 1.250000e-01 : f32
      %376 = vector.broadcast %cst_169 : f32 to vector<1x1xf32>
      %377 = arith.mulf %375, %376 : vector<1x1xf32>
      %cst_170 = arith.constant 0.000000e+00 : f32
      %378 = vector.broadcast %cst_170 : f32 to vector<1x1xf32>
      %379 = arith.subf %378, %377 : vector<1x1xf32>
      %380 = arith.addf %346, %379 : vector<1x1xf32>
      %381 = vector.extract_strided_slice %313 {offsets = [0, 256], sizes = [8, 128], strides = [1, 1]} : vector<8x384xf32> to vector<8x128xf32>
      %382 = arith.mulf %381, %381 : vector<8x128xf32>
      %cst_171 = arith.constant dense<0.000000e+00> : vector<8xf32>
      %383 = vector.multi_reduction <add>, %382, %cst_171 [1] : vector<8x128xf32> to vector<8xf32>
      %384 = vector.shape_cast %383 : vector<8xf32> to vector<8x1xf32>
      %385 = math.rsqrt %384 : vector<8x1xf32>
      %386 = vector.broadcast %385 : vector<8x1xf32> to vector<8x128xf32>
      %387 = arith.mulf %381, %386 : vector<8x128xf32>
      %388 = arith.mulf %207, %207 : vector<8x128xf32>
      %cst_172 = arith.constant dense<0.000000e+00> : vector<8xf32>
      %389 = vector.multi_reduction <add>, %388, %cst_172 [1] : vector<8x128xf32> to vector<8xf32>
      %390 = vector.shape_cast %389 : vector<8xf32> to vector<8x1xf32>
      %391 = math.rsqrt %390 : vector<8x1xf32>
      %392 = vector.broadcast %391 : vector<8x1xf32> to vector<8x128xf32>
      %393 = arith.mulf %207, %392 : vector<8x128xf32>
      %394 = arith.mulf %393, %387 : vector<8x128xf32>
      %cst_173 = arith.constant dense<0.000000e+00> : vector<8xf32>
      %395 = vector.multi_reduction <add>, %394, %cst_173 [1] : vector<8x128xf32> to vector<8xf32>
      %396 = vector.shape_cast %395 : vector<8xf32> to vector<8x1xf32>
      %cst_174 = arith.constant dense<0.000000e+00> : vector<8x8xf32>
      %397 = tpu.matmul %393, %387, %cst_174 {dimension_numbers = #tpu.dot_dimension_numbers<[1], [1], [0], [0], [0, 0, 1, 0], [], []>} : vector<8x128xf32>, vector<8x128xf32>, vector<8x8xf32> -> vector<8x8xf32>
      %cst_175 = arith.constant dense<0xFF800000> : vector<8xf32>
      %398 = vector.multi_reduction <maximumf>, %397, %cst_175 [1] : vector<8x8xf32> to vector<8xf32>
      %399 = vector.shape_cast %398 : vector<8xf32> to vector<8x1xf32>
      %400 = vector.broadcast %399 : vector<8x1xf32> to vector<8x8xf32>
      %401 = arith.subf %397, %400 : vector<8x8xf32>
      %402 = math.exp %401 : vector<8x8xf32>
      %cst_176 = arith.constant dense<0.000000e+00> : vector<8xf32>
      %403 = vector.multi_reduction <add>, %402, %cst_176 [1] : vector<8x8xf32> to vector<8xf32>
      %404 = vector.shape_cast %403 : vector<8xf32> to vector<8x1xf32>
      %405 = math.log %404 : vector<8x1xf32>
      %406 = arith.addf %399, %405 : vector<8x1xf32>
      %407 = arith.subf %396, %406 : vector<8x1xf32>
      %cst_177 = arith.constant dense<0.000000e+00> : vector<1xf32>
      %408 = vector.multi_reduction <add>, %407, %cst_177 [0] : vector<8x1xf32> to vector<1xf32>
      %409 = vector.shape_cast %408 : vector<1xf32> to vector<1x1xf32>
      %cst_178 = arith.constant 1.250000e-01 : f32
      %410 = vector.broadcast %cst_178 : f32 to vector<1x1xf32>
      %411 = arith.mulf %409, %410 : vector<1x1xf32>
      %cst_179 = arith.constant 0.000000e+00 : f32
      %412 = vector.broadcast %cst_179 : f32 to vector<1x1xf32>
      %413 = arith.subf %412, %411 : vector<1x1xf32>
      %414 = arith.addf %380, %413 : vector<1x1xf32>
      %415 = tpu.iota {dimensions = array<i32: 1>} : vector<1x128xi32>
      %c0_i32_180 = arith.constant 0 : i32
      %416 = vector.broadcast %c0_i32_180 : i32 to vector<1x128xi32>
      %417 = arith.cmpi eq, %415, %416 : vector<1x128xi32>
      %cst_181 = arith.constant 0.000000e+00 : f32
      %418 = vector.shape_cast %281 : vector<1x1xf32> to vector<1x1xf32>
      %419 = vector.broadcast %418 : vector<1x1xf32> to vector<1x128xf32>
      %420 = vector.broadcast %cst_181 : f32 to vector<1x128xf32>
      %421 = arith.select %417, %419, %420 : vector<1x128xi1>, vector<1x128xf32>
      %c1_i32_182 = arith.constant 1 : i32
      %422 = vector.broadcast %c1_i32_182 : i32 to vector<1x128xi32>
      %423 = arith.cmpi eq, %415, %422 : vector<1x128xi32>
      %cst_183 = arith.constant 0.000000e+00 : f32
      %424 = vector.shape_cast %414 : vector<1x1xf32> to vector<1x1xf32>
      %425 = vector.broadcast %424 : vector<1x1xf32> to vector<1x128xf32>
      %426 = vector.broadcast %cst_183 : f32 to vector<1x128xf32>
      %427 = arith.select %423, %425, %426 : vector<1x128xi1>, vector<1x128xf32>
      %428 = arith.addf %421, %427 : vector<1x128xf32>
      %c0_184 = arith.constant 0 : index
      %c0_185 = arith.constant 0 : index
      %429 = vector.load %arg22[%c0_184, %c0_185] : memref<1x128xf32, #tpu.memory_space<vmem>>, vector<1x128xf32>
      tpu.vector_store %arg22[%c0_184, %c0_185], %428 {strides = array<i32>} : memref<1x128xf32, #tpu.memory_space<vmem>>, vector<1x128xf32>,
    } else {
    }
    return
  }
  func.func @transform_0(%arg0: i32) -> (i32, i32, i32) {
    %c0_i32 = arith.constant 0 : i32
    %c0_i32_0 = arith.constant 0 : i32
    %c0_i32_1 = arith.constant 0 : i32
    return %arg0, %c0_i32, %c0_i32_0 : i32, i32, i32
  }
  func.func @transform_1(%arg0: i32) -> (i32, i32, i32) {
    %c0_i32 = arith.constant 0 : i32
    %c0_i32_0 = arith.constant 0 : i32
    %c0_i32_1 = arith.constant 0 : i32
    return %arg0, %c0_i32, %c0_i32_0 : i32, i32, i32
  }
  func.func @transform_2(%arg0: i32) -> (i32, i32, i32) {
    %c0_i32 = arith.constant 0 : i32
    %c0_i32_0 = arith.constant 0 : i32
    %c0_i32_1 = arith.constant 0 : i32
    return %arg0, %c0_i32, %c0_i32_0 : i32, i32, i32
  }
  func.func @transform_3(%arg0: i32) -> (i32, i32, i32) {
    %c0_i32 = arith.constant 0 : i32
    %c0_i32_0 = arith.constant 0 : i32
    %c0_i32_1 = arith.constant 0 : i32
    return %arg0, %c0_i32, %c0_i32_0 : i32, i32, i32
  }
  func.func @transform_4(%arg0: i32) -> (i32, i32, i32) {
    %c0_i32 = arith.constant 0 : i32
    %c0_i32_0 = arith.constant 0 : i32
    %c0_i32_1 = arith.constant 0 : i32
    return %arg0, %c0_i32, %c0_i32_0 : i32, i32, i32
  }
  func.func @transform_5(%arg0: i32) -> (i32, i32, i32) {
    %c0_i32 = arith.constant 0 : i32
    %c0_i32_0 = arith.constant 0 : i32
    %c0_i32_1 = arith.constant 0 : i32
    return %arg0, %c0_i32, %c0_i32_0 : i32, i32, i32
  }
  func.func @transform_6(%arg0: i32) -> (i32, i32, i32) {
    %c0_i32 = arith.constant 0 : i32
    %c0_i32_0 = arith.constant 0 : i32
    %c0_i32_1 = arith.constant 0 : i32
    return %arg0, %c0_i32, %c0_i32_0 : i32, i32, i32
  }
  func.func @transform_7(%arg0: i32) -> (i32, i32) {
    %c0_i32 = arith.constant 0 : i32
    %c0_i32_0 = arith.constant 0 : i32
    %c0_i32_1 = arith.constant 0 : i32
    return %c0_i32, %c0_i32_0 : i32, i32
  }
  func.func @transform_8(%arg0: i32) -> (i32, i32) {
    %c0_i32 = arith.constant 0 : i32
    %c0_i32_0 = arith.constant 0 : i32
    %c0_i32_1 = arith.constant 0 : i32
    return %c0_i32, %c0_i32_0 : i32, i32
  }
  func.func @transform_9(%arg0: i32) -> (i32, i32) {
    %c0_i32 = arith.constant 0 : i32
    %c0_i32_0 = arith.constant 0 : i32
    %c0_i32_1 = arith.constant 0 : i32
    return %c0_i32, %c0_i32_0 : i32, i32
  }
  func.func @transform_10(%arg0: i32) -> (i32, i32, i32) {
    %c0_i32 = arith.constant 0 : i32
    %c0_i32_0 = arith.constant 0 : i32
    %c0_i32_1 = arith.constant 0 : i32
    %c0_i32_2 = arith.constant 0 : i32
    return %c0_i32, %c0_i32_0, %c0_i32_1 : i32, i32, i32
  }
  func.func @transform_11(%arg0: i32) -> (i32, i32, i32) {
    %c0_i32 = arith.constant 0 : i32
    %c0_i32_0 = arith.constant 0 : i32
    %c0_i32_1 = arith.constant 0 : i32
    %c0_i32_2 = arith.constant 0 : i32
    return %c0_i32, %c0_i32_0, %c0_i32_1 : i32, i32, i32
  }
  func.func @transform_12(%arg0: i32) -> (i32, i32, i32) {
    %c0_i32 = arith.constant 0 : i32
    %c0_i32_0 = arith.constant 0 : i32
    %c0_i32_1 = arith.constant 0 : i32
    %c0_i32_2 = arith.constant 0 : i32
    return %c0_i32, %c0_i32_0, %c0_i32_1 : i32, i32, i32
  }
  func.func @transform_13(%arg0: i32) -> (i32, i32) {
    %c0_i32 = arith.constant 0 : i32
    %c0_i32_0 = arith.constant 0 : i32
    %c0_i32_1 = arith.constant 0 : i32
    return %c0_i32, %c0_i32_0 : i32, i32
  }
  func.func @transform_14(%arg0: i32) -> (i32, i32) {
    %c0_i32 = arith.constant 0 : i32
    %c0_i32_0 = arith.constant 0 : i32
    %c0_i32_1 = arith.constant 0 : i32
    return %c0_i32, %c0_i32_0 : i32, i32
  }
  func.func @transform_15(%arg0: i32) -> (i32, i32) {
    %c0_i32 = arith.constant 0 : i32
    %c0_i32_0 = arith.constant 0 : i32
    %c0_i32_1 = arith.constant 0 : i32
    return %c0_i32, %c0_i32_0 : i32, i32
  }
  func.func @transform_16(%arg0: i32) -> (i32, i32) {
    %c0_i32 = arith.constant 0 : i32
    %c0_i32_0 = arith.constant 0 : i32
    %c0_i32_1 = arith.constant 0 : i32
    return %c0_i32, %c0_i32_0 : i32, i32
  }
  func.func @transform_17(%arg0: i32) -> (i32, i32) {
    %c0_i32 = arith.constant 0 : i32
    %c0_i32_0 = arith.constant 0 : i32
    %c0_i32_1 = arith.constant 0 : i32
    return %c0_i32, %c0_i32_0 : i32, i32
  }
  func.func @transform_18(%arg0: i32) -> (i32, i32) {
    %c0_i32 = arith.constant 0 : i32
    %c0_i32_0 = arith.constant 0 : i32
    %c0_i32_1 = arith.constant 0 : i32
    return %c0_i32, %c0_i32_0 : i32, i32
  }
  func.func @transform_19(%arg0: i32) -> (i32, i32) {
    %c0_i32 = arith.constant 0 : i32
    %c0_i32_0 = arith.constant 0 : i32
    %c0_i32_1 = arith.constant 0 : i32
    return %c0_i32, %c0_i32_0 : i32, i32
  }
  func.func @transform_20(%arg0: i32) -> (i32, i32) {
    %c0_i32 = arith.constant 0 : i32
    %c0_i32_0 = arith.constant 0 : i32
    %c0_i32_1 = arith.constant 0 : i32
    return %c0_i32, %c0_i32_0 : i32, i32
  }
  func.func @transform_21(%arg0: i32) -> (i32, i32) {
    %c0_i32 = arith.constant 0 : i32
    %c0_i32_0 = arith.constant 0 : i32
    %c0_i32_1 = arith.constant 0 : i32
    return %c0_i32, %c0_i32_0 : i32, i32
  }
}

</mosaic_0001>

<bundles_post_ra>
// kernel: forward.1
= control target key start
LH: loop header
LB: loop body
LE: loop exit
PB: predicated region body
PF: predicated region fallthrough
CT: control target
= control target key end

     0   :  { %s4160_s0 = inlined_call_operand.vmem [shape: f32[2,64,128], index: 0, kind: input, shape index: {}]   ;;  %s4161_s1 = inlined_call_operand.vmem [shape: f32[2,8,128], index: 1, kind: input, shape index: {}]   ;;  %s4162_s2 = inlined_call_operand.hbm [shape: f32[2,128,128], index: 2, kind: input, shape index: {}]   ;;  %s4163_s3 = inlined_call_operand.hbm [shape: f32[2,128,128], index: 3, kind: input, shape index: {}]   ;;  %s4164_s4 = inlined_call_operand.vmem [shape: f32[2,1,128], index: 4, kind: input, shape index: {}]   ;;  %s4165_s5 = inlined_call_operand.hbm [shape: f32[2,128,128], index: 5, kind: input, shape index: {}]   ;;  %s4166_s6 = inlined_call_operand.vmem [shape: f32[2,1,128], index: 6, kind: input, shape index: {}]   ;;  %s4167_s7 = inlined_call_operand.vmem [shape: f32[8,128], index: 7, kind: input, shape index: {}]   ;;  %s4168_s8 = inlined_call_operand.vmem [shape: f32[128,512], index: 8, kind: input, shape index: {}]   ;;  %s4169_s9 = inlined_call_operand.vmem [shape: f32[1,512], index: 9, kind: input, shape index: {}]   ;;  %s4170_s10 = inlined_call_operand.hbm [shape: f32[4,128,128], index: 10, kind: input, shape index: {}]   ;;  %s4171_s11 = inlined_call_operand.vmem [shape: f32[4,1,128], index: 11, kind: input, shape index: {}]   ;;  %s4172_s12 = inlined_call_operand.vmem [shape: f32[3,128,128], index: 12, kind: input, shape index: {}]   ;;  %s4173_s13 = inlined_call_operand.vmem [shape: f32[1,128], index: 13, kind: input, shape index: {}]   ;;  %s4174_s14 = inlined_call_operand.hbm [shape: f32[128,128], index: 14, kind: input, shape index: {}]   ;;  %s4175_s15 = inlined_call_operand.vmem [shape: f32[1,128], index: 15, kind: input, shape index: {}]   ;;  %s4176_s16 = inlined_call_operand.hbm [shape: f32[128,128], index: 16, kind: input, shape index: {}]   ;;  %s4177_s17 = inlined_call_operand.vmem [shape: f32[1,128], index: 17, kind: input, shape index: {}]   ;;  %s4178_s18 = inlined_call_operand.hbm [shape: f32[128,384], index: 18, kind: input, shape index: {}]   ;;  %s4179_s19 = inlined_call_operand.vmem [shape: f32[1,384], index: 19, kind: input, shape index: {}]   ;;  %s4180_s20 = inlined_call_operand.vmem [shape: f32[8,128], index: 20, kind: output, shape index: {0}]   ;;  %s4181_s21 = inlined_call_operand.vmem [shape: f32[1,128], index: 21, kind: output, shape index: {1}]  }
   0x1   :  { %4196 = sst [smem:[#allocation20_spill]] %s4160_s0 }
   0x2   :  { %4197 = sst [smem:[#allocation21_spill]] %s4161_s1 }
   0x3   :  { %4198 = sst [smem:[#allocation22_spill]] %s4162_s2 }
   0x4   :  { %4199 = sst [smem:[#allocation23_spill]] %s4163_s3 }
   0x5   :  { %4200 = sst [smem:[#allocation24_spill]] %s4164_s4 }
   0x6   :  { %4201 = sst [smem:[#allocation25_spill]] %s4165_s5 }
   0x7   :  { %4202 = sst [smem:[#allocation26_spill]] %s4169_s9 }
   0x8   :  { %4203 = sst [smem:[#allocation27_spill]] %s4170_s10 }
   0x9   :  { %4204 = sst [smem:[#allocation28_spill]] %s4171_s11 }
   0xa   :  { %4205 = sst [smem:[#allocation29_spill]] %s4172_s12 }
   0xb   :  { %4206 = sst [smem:[#allocation30_spill]] %s4173_s13 }
   0xc   :  { %4207 = sst [smem:[#allocation31_spill]] %s4174_s14 }
   0xd   :  { %4208 = sst [smem:[#allocation32_spill]] %s4175_s15 }
   0xe   :  { %4209 = sst [smem:[#allocation33_spill]] %s4176_s16 }
   0xf   :  { %4210 = sst [smem:[#allocation34_spill]] %s4177_s17 }
  0x10   :  { %4211 = sst [smem:[#allocation35_spill]] %s4178_s18 }
  0x11   :  { %4212 = sst [smem:[#allocation36_spill]] %s4179_s19 }
  0x12   :  { %4213 = sst [smem:[#allocation37_spill]] %s4180_s20 }
  0x13   :  { %4214 = sst [smem:[#allocation38_spill]] %s4181_s21 }
  0x14   :  { %27 = vsyncpa [#allocation4], 0 }
  0x15   :  { %29 = vsyncpa [#allocation4 + $0x1], 0 }
  0x16   :  { %30 = vsyncpa [#allocation6], 0 }
  0x17   :  { %32 = vsyncpa [#allocation6 + $0x1], 0 }
  0x18   :  { %33 = vsyncpa [#allocation9], 0 }
  0x19   :  { %34 = vsyncpa [#allocation12], 0  ;;  %s3188_s2 = smov 0   ;;  %s3190_s25 = smov 0  }
  0x1a   :  { %s3192_s26 = smov 0   ;;  %s3194_s27 = smov 0  }
  0x1b LB: > { %s3207_s3 = sadd.s32 4294967295, %s3064_s27   ;;  %p112_p0 = scmp.ne.s32.totalorder %s3056_s25, %s3052_s2  ;;  %s3064_s27 = sphi %s3194_s27, %s4248_s27   ;;  %s3060_s26 = sphi %s3192_s26, %s4252_s26   ;;  %s3056_s25 = sphi %s3190_s25, %s4251_s25   ;;  %s3052_s2 = sphi %s3188_s2, %s4250_s2  }
  0x1c   : > { %p113_p1 = scmp.eq.s32.totalorder %s3207_s3, 0  ;;  %p2526_p2 = scmp.ge.s32.totalorder %s3064_s27, 1 }
  0x1d   : > { %p542_p3 = scmp.lt.s32.totalorder %s3064_s27, 3  ;;  %p2527_p4 = scmp.ne.s32.totalorder %s3207_s3, 0 }
  0x1e   : > { %p3216_p5 = por %p113_p1, %p112_p0  ;;  %s4216_s10 = sld [smem:[#allocation27_spill]] }
  0x1f   : > { %p3223_p6 = pnand %p2526_p2, %p542_p3  ;;  %s3066_s5 = smov [#allocation8]  }
  0x20   : > { %s564_s22 = sshll.u32 %s3066_s5, 4  ;;  %s4219_s16 = sld [smem:[#allocation33_spill]]  ;;  %s565_s22 = int_to_ptr.vmem [resolvable:$true] %s564_s22 }
  0x21   : > { %p2626_p7 = pneg %p3223_p6  ;;  %s4186_s29 = smov 128  }
  0x22   : > { %s4188_s0 = smov 8   ;;  %s3069_s5 = smov [#allocation11]  }
  0x23   : > { %p3231_p8 = pnand %p2626_p7, %p113_p1  ;;  %s3249_s1 = sadd.s32 1, %s3064_s27  }
  0x24   : > { %s562_s4 = sshll.u32 %s4216_s10, 4  ;;  %s604_s10 = sshll.u32 %s3069_s5, 4  ;;  %s563_s4 = int_to_ptr.hbm [resolvable:$true] %s562_s4  ;;  %s605_s10 = int_to_ptr.vmem [resolvable:$true] %s604_s10 }
  0x25   : > { %2629 = dma.hbm_to_vmem [thread:$0]  (!%p3231_p8), %s563_s4, 8192, %s565_s22, [#allocation9], %s4186_s29, %s4186_s29, %s4188_s0  }
  0x26   : > { %s602_s2 = sshll.u32 %s4219_s16, 4  ;;  %4220 = sst [smem:[#allocation18_spill]] %s3249_s1  ;;  %s603_s2 = int_to_ptr.hbm [resolvable:$true] %s602_s2 }
  0x27   : > { %2635 = dma.hbm_to_vmem [thread:$0]  (!%p3231_p8), %s603_s2, 2048, %s605_s10, [#allocation12], %s4186_s29, %s4186_s29, %s4188_s0  }
  0x28   : > { %s99_s24 = sadd.s32 1, %s3060_s26  ;;  %s96_s16 = ssub.s32 %s3064_s27, %s3249_s1 }
  0x29   : > { %p106_p9 = scmp.ne.s32.totalorder %s3060_s26, %s3056_s25  ;;  %p97_p10 = scmp.eq.s32.totalorder %s96_s16, 0 }
  0x2a   : > { %p107_p11 = scmp.eq.s32.totalorder %s3064_s27, 0  ;;  %p2653_p12 = scmp.lt.s32.totalorder %s3064_s27, 2 }
  0x2b   : > { %s4192_s4 = sand.u32 1, %s3060_s26   ;;  %s3267_s21 = sshll.u32 %s3064_s27, 7 }
  0x2c   : > { %s3260_s22 = scalar_select %p97_p10, %s3060_s26, %s99_s24  }
  0x2d   : > { %p108_p13 = por %p107_p11, %p106_p9  ;;  %s3264_s5 = sshll.u32 %s4192_s4, 7 }
  0x2e   : > { %4221 = sst [smem:[#allocation19_spill]] %s3260_s22  ;;  %s675_s10 = sand.u32 1, %s3064_s27  }
  0x2f   : > { %p3270_p0 = pnand %p2653_p12, %p108_p13  ;;  %s4223_s0 = sld [smem:[#allocation23_spill]] }
  0x30   : > { %s679_s1 = scalar_lea.vmem [#allocation5], %s3264_s5  ;;  %s4224_s14 = sld [smem:[#allocation31_spill]] }
  0x31   : > { %s687_s4 = sshll.u32 %s679_s1, 4  ;;  %s3282_s27 = scalar_lea.sflag [#allocation6], %s675_s10  ;;  %s688_s4 = int_to_ptr.vmem [resolvable:$true] %s687_s4 }
  0x32   : > { %p2872_p3 = pneg %p3270_p0 }
  0x35   : > { %s684_s24 = scalar_lea.hbm %s4223_s0, %s3267_s21  ;;  %s2875_s1 = scalar_lea.hbm %s4223_s0, 256 }
  0x36   : > { %s685_s22 = sshll.u32 %s684_s24, 4  ;;  %s585_s19 = sshll.u32 %s4224_s14, 4  ;;  %s686_s22 = int_to_ptr.hbm [resolvable:$true] %s685_s22  ;;  %s586_s19 = int_to_ptr.hbm [resolvable:$true] %s585_s19 }
  0x37   : > { %s2868_s15 = sshra.s32 %s686_s22, 4  ;;  %s2869_s15 = int_to_ptr.hbm [resolvable:$true] %s2868_s15 }
  0x38   : > { %s2870_s13 = scalar_lea.hbm %s2869_s15, 128  ;;  %p2876_p10 = scmp.lt.s32.totalorder %s2869_s15, %s4223_s0 }
  0x39   : > { %p2871_p2 = scmp.ne.s32.totalorder %s2869_s15, %s2870_s13  ;;  %p2877_p11 = scmp.lt.s32.totalorder %s2875_s1, %s2870_s13 }
  0x3b   : > { %p2873_p7 = pnand %p2872_p3, %p2871_p2  ;;  %p2878_p12 = por %p2877_p11, %p2876_p10 }
  0x3d   : > { %p2874_p9 = pneg %p2873_p7 }
  0x3f   : > { %p2879_p13 = pnand %p2878_p12, %p2874_p9 }
  0x41   : > { %2882 = shalt.err (!%p2879_p13)
}
  0x42   : > { %s4225_s17 = smov 8   ;;  %s4226_s20 = smov 128  }
  0x43   : > { %2645 = dma.hbm_to_vmem [thread:$0]  (!%p3270_p0), %s686_s22, 2048, %s688_s4, %s3282_s27, %s4226_s20, %s4226_s20, %s4225_s17  }
  0x44   : > { %s3070_s10 = smov [#allocation10]   ;;  %s4227_s18 = sld [smem:[#allocation35_spill]] }
  0x45   : > { %s587_s29 = sshll.u32 %s3070_s10, 4  ;;  %s3071_s16 = smov [#allocation13]   ;;  %s588_s29 = int_to_ptr.vmem [resolvable:$true] %s587_s29 }
  0x46   : > { %2632 = dma.hbm_to_vmem [thread:$0]  (!%p3231_p8), %s586_s19, 2048, %s588_s29, [#allocation9], %s4226_s20, %s4226_s20, %s4225_s17  }
  0x47   : > { %s621_s1 = sshll.u32 %s3071_s16, 4  ;;  %s3072_s4 = smov 384   ;;  %s622_s1 = int_to_ptr.vmem [resolvable:$true] %s621_s1 }
  0x48   : > { %s3073_s22 = smov 24   ;;  %s4228_s11 = sld [smem:[#allocation22_spill]] }
  0x49   : > { %s657_s14 = scalar_lea.vmem [#allocation3], %s3264_s5  ;;  %s4229_s9 = sand.u32 1, %s3060_s26  }
  0x4a   : > { %s619_s13 = sshll.u32 %s4227_s18, 4  ;;  %s665_s18 = sshll.u32 %s657_s14, 4  ;;  %s620_s13 = int_to_ptr.hbm [resolvable:$true] %s619_s13  ;;  %s666_s18 = int_to_ptr.vmem [resolvable:$true] %s665_s18 }
  0x4b   : > { %2638 = dma.hbm_to_vmem [thread:$0]  (!%p3231_p8), %s620_s13, 6144, %s622_s1, [#allocation12], %s3072_s4, %s3072_s4, %s3073_s22  }
  0x4c   : > { %s654_s12 = scalar_lea.sflag [#allocation4], %s4229_s9 }
  0x4e   : > { %s662_s15 = scalar_lea.hbm %s4228_s11, %s3267_s21  ;;  %s2965_s16 = scalar_lea.hbm %s4228_s11, 256 }
  0x4f   : > { %s663_s0 = sshll.u32 %s662_s15, 4  ;;  %s664_s0 = int_to_ptr.hbm [resolvable:$true] %s663_s0 }
  0x50   : > { %s2958_s19 = sshra.s32 %s664_s0, 4  ;;  %s2959_s19 = int_to_ptr.hbm [resolvable:$true] %s2958_s19 }
  0x51   : > { %s2960_s29 = scalar_lea.hbm %s2959_s19, 128  ;;  %p2966_p8 = scmp.lt.s32.totalorder %s2959_s19, %s4228_s11 }
  0x52   : > { %p2961_p2 = scmp.ne.s32.totalorder %s2959_s19, %s2960_s29  ;;  %p2967_p10 = scmp.lt.s32.totalorder %s2965_s16, %s2960_s29 }
  0x54   : > { %p2963_p7 = pnand %p2961_p2, %p2872_p3  ;;  %p2968_p11 = por %p2967_p10, %p2966_p8 }
  0x56   : > { %p2964_p9 = pneg %p2963_p7 }
  0x58   : > { %p2969_p12 = pnand %p2968_p11, %p2964_p9 }
  0x5a   : > { %2972 = shalt.err (!%p2969_p12)
}
  0x5b   : > { %2642 = dma.hbm_to_vmem [thread:$0]  (!%p3270_p0), %s664_s0, 2048, %s666_s18, %s654_s12, %s4226_s20, %s4226_s20, %s4225_s17  }
  0x5c   : > { %s4230_s22 = sld [smem:[#allocation25_spill]]  ;;  %s707_s15 = scalar_lea.vmem [#allocation7], %s3264_s5 }
  0x5d   : > { %s715_s19 = sshll.u32 %s707_s15, 4  ;;  %s716_s19 = int_to_ptr.vmem [resolvable:$true] %s715_s19 }
  0x62   : > { %s712_s24 = scalar_lea.hbm %s4230_s22, %s3267_s21  ;;  %s2995_s12 = scalar_lea.hbm %s4230_s22, 256 }
  0x63   : > { %s713_s10 = sshll.u32 %s712_s24, 4  ;;  %s714_s10 = int_to_ptr.hbm [resolvable:$true] %s713_s10 }
  0x64   : > { %s2988_s29 = sshra.s32 %s714_s10, 4  ;;  %s2989_s29 = int_to_ptr.hbm [resolvable:$true] %s2988_s29 }
  0x65   : > { %s2990_s23 = scalar_lea.hbm %s2989_s29, 128  ;;  %p2996_p9 = scmp.lt.s32.totalorder %s2989_s29, %s4230_s22 }
  0x66   : > { %p2991_p13 = scmp.ne.s32.totalorder %s2989_s29, %s2990_s23  ;;  %p2997_p8 = scmp.lt.s32.totalorder %s2995_s12, %s2990_s23 }
  0x68   : > { %p2993_p2 = pnand %p2991_p13, %p2872_p3  ;;  %p2998_p10 = por %p2997_p8, %p2996_p9 }
  0x6a   : > { %p2994_p7 = pneg %p2993_p2 }
  0x6c   : > { %p2999_p11 = pnand %p2998_p10, %p2994_p7 }
  0x6e   : > { %3002 = shalt.err (!%p2999_p11)
}
  0x6f   : > { %2648 = dma.hbm_to_vmem [thread:$0]  (!%p3270_p0), %s714_s10, 2048, %s716_s19, %s3282_s27, %s4226_s20, %s4226_s20, %s4225_s17  }
  0x70   : > { %733 = sbr.rel (%p3223_p6) target bundleno = 3737 (0xe99), region = 100  ;;  %s735_s21 = sand.u32 (!%p3223_p6), 1, %s3056_s25  }
  0x71   : > { %s2542_s5 = sshll.u32 (!%p3223_p6), %s735_s21, 7  ;;  %s736_s1 = scalar_lea.sflag (!%p3223_p6), [#allocation4], %s735_s21 }
  0x72   : > { %s3355_s4 = scalar_lea.vmem (!%p3223_p6), [#allocation3], %s2542_s5 }
  0x75   : > { %3035 = dma.done.wait (%p3216_p5), %s736_s1, 2048  }
  0x76   : > { %3037 = vsyncadd (%p3216_p5), %s736_s1, 4294965248  ;;  %s745_s2 = sand.u32 1, %s3207_s3   ;;  %s3362_s27 = scalar_lea.vmem [#allocation5], %s2542_s5 }
  0x77   : > { %s746_s9 = scalar_lea.sflag [#allocation6], %s745_s2 }
  0x78   : > { %3039 = dma.done.wait (%p3216_p5), %s746_s9, 4096  }
  0x79   : > { %3041 = vsyncadd (%p3216_p5), %s746_s9, 4294963200  ;;  %s3368_s30 = scalar_lea.vmem [#allocation7], %s2542_s5 }
  0x7a   : > { %3043 = dma.done.wait (%p113_p1), [#allocation9], 10240  }
  0x7b   : > { %3045 = vsyncadd (%p113_p1), [#allocation9], 4294957056 }
  0x7c   : > { %3047 = dma.done.wait (%p113_p1), [#allocation12], 8192  }
  0x7d   : > { %3049 = vsyncadd (%p113_p1), [#allocation12], 4294959104  ;;  %v897_v0 = vld [vmem:[%s3355_s4 + $0x78] sm:$0xff]  ;;  %v896_v1 = vld [vmem:[%s3355_s4 + $0x70] sm:$0xff]  ;;  %p859_p1 = scmp.lt.s32.totalorder %s3207_s3, 1  ;;  %s4231_s14 = sld [smem:[#allocation24_spill]]  ;;  %v960_v54 = vlaneseq }
  0x7e   : > { %v3381_v2 = vld [vmem:[%s3362_s27 + $0x78] sm:$0xff]  ;;  %902 = vmatpush.msra.mxu0 %v897_v0  ;;  %v3385_v3 = vld [vmem:[%s3362_s27 + $0x70] sm:$0xff]  ;;  %v895_v4 = vld [vmem:[%s3355_s4 + $0x68] sm:$0xff]  ;;  %s4232_s29 = sld [smem:[#allocation20_spill]]  ;;  %v3074_v33 = vmov 0.0   ;;  %s3075_s12 = smov 64  }
  0x7f   : > { %963 = vmatpush.msra.mxu1 %v3381_v2  ;;  %v3389_v5 = vld [vmem:[%s3362_s27 + $0x68] sm:$0xff]  ;;  %1019 = vmatpush.msra.mxu2 %v3381_v2  ;;  %v894_v6 = vld [vmem:[%s3355_s4 + $0x60] sm:$0xff]  ;;  %v893_v8 = vld [vmem:[%s3355_s4 + $0x58] sm:$0xff]  ;;  %s3414_s28 = scalar_select %p859_p1, %s3207_s3, 1  ;;  %v3597_v55 = vand.u32 127, %v960_v54 }
  0x80   : > { %1075 = vmatpush.msra.mxu3 %v3381_v2  ;;  %903 = vmatpush.msra.mxu0 %v896_v1  ;;  %v3396_v7 = vld [vmem:[%s3362_s27 + $0x60] sm:$0xff]  ;;  %v3404_v9 = vld [vmem:[%s3362_s27 + $0x58] sm:$0xff]  ;;  %v892_v10 = vld [vmem:[%s3355_s4 + $0x50] sm:$0xff]  ;;  %s3076_s18 = smov 32   ;;  %s3077_s0 = smov 96  }
  0x81   : > { %964 = vmatpush.msra.mxu1 %v3385_v3  ;;  %1020 = vmatpush.msra.mxu2 %v3385_v3  ;;  %v3411_v11 = vld [vmem:[%s3362_s27 + $0x50] sm:$0xff]  ;;  %v891_v12 = vld [vmem:[%s3355_s4 + $0x48] sm:$0xff]  ;;  %v890_v14 = vld [vmem:[%s3355_s4 + $0x40] sm:$0xff]  ;;  %s2603_s10 = sshll.u32 %s3414_s28, 6  ;;  %s2551_s21 = sshll.u32 %s3414_s28, 3  ;;  %vm962_vm4 = vcmp.lt.s32.totalorder %v3597_v55, 16 }
  0x82   : > { %1076 = vmatpush.msra.mxu3 %v3385_v3  ;;  %904 = vmatpush.msra.mxu0 %v895_v4  ;;  %v3421_v13 = vld [vmem:[%s3362_s27 + $0x48] sm:$0xff]  ;;  %v3432_v15 = vld [vmem:[%s3362_s27 + $0x40] sm:$0xff]  ;;  %v889_v16 = vld [vmem:[%s3355_s4 + $0x38] sm:$0xff]  ;;  %s873_s17 = scalar_lea.vmem %s4166_s6, %s3414_s28 }
  0x83   : > { %965 = vmatpush.msra.mxu1 %v3389_v5  ;;  %1021 = vmatpush.msra.mxu2 %v3389_v5  ;;  %s870_s24 = scalar_lea.vmem %s4231_s14, %s3414_s28  ;;  %v3439_v17 = vld [vmem:[%s3362_s27 + $0x38] sm:$0xff]  ;;  %v888_v18 = vld [vmem:[%s3355_s4 + $0x30] sm:$0xff]  ;;  %v887_v20 = vld [vmem:[%s3355_s4 + $0x28] sm:$0xff] }
  0x84   : > { %1077 = vmatpush.msra.mxu3 %v3389_v5  ;;  %905 = vmatpush.msra.mxu0 %v894_v6  ;;  %v3446_v19 = vld [vmem:[%s3362_s27 + $0x30] sm:$0xff]  ;;  %v3453_v21 = vld [vmem:[%s3362_s27 + $0x28] sm:$0xff]  ;;  %v886_v22 = vld [vmem:[%s3355_s4 + $0x20] sm:$0xff]  ;;  %s3487_s23 = scalar_lea.vmem %s4232_s29, %s2603_s10 }
  0x85   : > { %966 = vmatpush.msra.mxu1 %v3396_v7  ;;  %1022 = vmatpush.msra.mxu2 %v3396_v7  ;;  %v3460_v23 = vld [vmem:[%s3362_s27 + $0x20] sm:$0xff]  ;;  %v885_v24 = vld [vmem:[%s3355_s4 + $0x18] sm:$0xff]  ;;  %v884_v26 = vld [vmem:[%s3355_s4 + $0x10] sm:$0xff] }
  0x86   : > { %1078 = vmatpush.msra.mxu3 %v3396_v7  ;;  %906 = vmatpush.msra.mxu0 %v893_v8  ;;  %v3467_v25 = vld [vmem:[%s3362_s27 + $0x18] sm:$0xff]  ;;  %v3475_v27 = vld [vmem:[%s3362_s27 + $0x10] sm:$0xff]  ;;  %v883_v28 = vld [vmem:[%s3355_s4 + $0x8] sm:$0xff] }
  0x87   : > { %967 = vmatpush.msra.mxu1 %v3404_v9  ;;  %1023 = vmatpush.msra.mxu2 %v3404_v9  ;;  %v3482_v29 = vld [vmem:[%s3362_s27 + $0x8] sm:$0xff]  ;;  %v882_v30 = vld [vmem:[%s3355_s4] sm:$0xff]  ;;  %v874_v32 = vld [vmem:[%s3487_s23] sm:$0xff]  ;;  %s4233_s4 = sld [smem:[#allocation21_spill]] }
  0x88   : > { %1079 = vmatpush.msra.mxu3 %v3404_v9  ;;  %907 = vmatpush.msra.mxu0 %v892_v10  ;;  %v3494_v31 = vld [vmem:[%s3362_s27] sm:$0xff]  ;;  %v3590_v34 = vld [vmem:[%s870_s24] ss:$0 sm:$0xff] }
  0x89   : > { %968 = vmatpush.msra.mxu1 %v3411_v11  ;;  %1024 = vmatpush.msra.mxu2 %v3411_v11  ;;  %v875_v53 = vld [vmem:[%s3487_s23 + $0x8] sm:$0xff] }
  0x8a   : > { %1080 = vmatpush.msra.mxu3 %v3411_v11  ;;  %908 = vmatpush.msra.mxu0 %v891_v12 }
  0x8b   : > { %969 = vmatpush.msra.mxu1 %v3421_v13  ;;  %1025 = vmatpush.msra.mxu2 %v3421_v13 }
  0x8c   : > { %1081 = vmatpush.msra.mxu3 %v3421_v13  ;;  %909 = vmatpush.msra.mxu0 %v890_v14 }
  0x8d   : > { %970 = vmatpush.msra.mxu1 %v3432_v15  ;;  %1026 = vmatpush.msra.mxu2 %v3432_v15  ;;  %s867_s2 = scalar_lea.vmem %s4233_s4, %s2551_s21 }
  0x8e   : > { %1082 = vmatpush.msra.mxu3 %v3432_v15  ;;  %910 = vmatpush.msra.mxu0 %v889_v16  ;;  %v3606_v58 = vld [vmem:[%s867_s2] sm:$0xff] }
  0x8f   : > { %971 = vmatpush.msra.mxu1 %v3439_v17  ;;  %1027 = vmatpush.msra.mxu2 %v3439_v17  ;;  %vm1016_vm5 = vcmp.gt.f32.partialorder %v3606_v58, 0.0  ;;  %vm1072_vm10 = vcmp.gt.f32.partialorder %v3606_v58, 1.0  ;;  %vm1128_vm15 = vcmp.gt.f32.partialorder %v3606_v58, 2.0 }
  0x90   : > { %1083 = vmatpush.msra.mxu3 %v3439_v17  ;;  %911 = vmatpush.msra.mxu0 %v888_v18 }
  0x91   : > { %972 = vmatpush.msra.mxu1 %v3446_v19  ;;  %1028 = vmatpush.msra.mxu2 %v3446_v19 }
  0x92   : > { %1084 = vmatpush.msra.mxu3 %v3446_v19  ;;  %912 = vmatpush.msra.mxu0 %v887_v20 }
  0x93   : > { %973 = vmatpush.msra.mxu1 %v3453_v21  ;;  %1029 = vmatpush.msra.mxu2 %v3453_v21 }
  0x94   : > { %1085 = vmatpush.msra.mxu3 %v3453_v21  ;;  %913 = vmatpush.msra.mxu0 %v886_v22  ;;  %v876_v22 = vld [vmem:[%s3487_s23 + $0x10] sm:$0xff] }
  0x95   : > { %974 = vmatpush.msra.mxu1 %v3460_v23  ;;  %1030 = vmatpush.msra.mxu2 %v3460_v23 }
  0x96   : > { %1086 = vmatpush.msra.mxu3 %v3460_v23  ;;  %914 = vmatpush.msra.mxu0 %v885_v24 }
  0x97   : > { %975 = vmatpush.msra.mxu1 %v3467_v25  ;;  %1031 = vmatpush.msra.mxu2 %v3467_v25 }
  0x98   : > { %1087 = vmatpush.msra.mxu3 %v3467_v25  ;;  %915 = vmatpush.msra.mxu0 %v884_v26 }
  0x99   : > { %976 = vmatpush.msra.mxu1 %v3475_v27  ;;  %1032 = vmatpush.msra.mxu2 %v3475_v27 }
  0x9a   : > { %1088 = vmatpush.msra.mxu3 %v3475_v27  ;;  %916 = vmatpush.msra.mxu0 %v883_v28 }
  0x9b   : > { %977 = vmatpush.msra.mxu1 %v3482_v29  ;;  %1033 = vmatpush.msra.mxu2 %v3482_v29 }
  0x9c   : > { %1089 = vmatpush.msra.mxu3 %v3482_v29  ;;  %917 = vmatpush.msra.mxu0 %v882_v30 }
  0x9d   : > { %978 = vmatpush.msra.mxu1 %v3494_v31  ;;  %918 = vmatmul.f32.vlgmr.msra.gmra.mxu0 %v874_v32 }
  0x9e   : > { %979 = vmatmul.f32.vlgmr.msra.gmra.mxu1 %v3074_v33  ;;  %1034 = vmatpush.msra.mxu2 %v3494_v31 }
  0x9f   : > { %1090 = vmatpush.msra.mxu3 %v3494_v31  ;;  %1131 = vmatpush.msrb.mxu1 %v3381_v2 }
  0xa0   : > { %1187 = vmatpush.msrb.mxu2 %v3381_v2  ;;  %1299 = vmatpush.msrb.mxu0 %v3381_v2 }
  0xa1   : > { %1243 = vmatpush.msrb.mxu3 %v3381_v2  ;;  %1132 = vmatpush.msrb.mxu1 %v3385_v3 }
  0xa2   : > { %1188 = vmatpush.msrb.mxu2 %v3385_v3  ;;  %1300 = vmatpush.msrb.mxu0 %v3385_v3 }
  0xa3   : > { %1244 = vmatpush.msrb.mxu3 %v3385_v3  ;;  %1133 = vmatpush.msrb.mxu1 %v3389_v5 }
  0xa4   : > { %1189 = vmatpush.msrb.mxu2 %v3389_v5  ;;  %1301 = vmatpush.msrb.mxu0 %v3389_v5 }
  0xa5   : > { %1245 = vmatpush.msrb.mxu3 %v3389_v5  ;;  %1134 = vmatpush.msrb.mxu1 %v3396_v7 }
  0xa6   : > { %1190 = vmatpush.msrb.mxu2 %v3396_v7  ;;  %1302 = vmatpush.msrb.mxu0 %v3396_v7 }
  0xa7   : > { %1246 = vmatpush.msrb.mxu3 %v3396_v7  ;;  %1135 = vmatpush.msrb.mxu1 %v3404_v9 }
  0xa8   : > { %1191 = vmatpush.msrb.mxu2 %v3404_v9  ;;  %1303 = vmatpush.msrb.mxu0 %v3404_v9 }
  0xa9   : > { %1247 = vmatpush.msrb.mxu3 %v3404_v9  ;;  %1136 = vmatpush.msrb.mxu1 %v3411_v11 }
  0xaa   : > { %1192 = vmatpush.msrb.mxu2 %v3411_v11  ;;  %1304 = vmatpush.msrb.mxu0 %v3411_v11 }
  0xab   : > { %1248 = vmatpush.msrb.mxu3 %v3411_v11  ;;  %1137 = vmatpush.msrb.mxu1 %v3421_v13 }
  0xac   : > { %1193 = vmatpush.msrb.mxu2 %v3421_v13  ;;  %1305 = vmatpush.msrb.mxu0 %v3421_v13 }
  0xad   : > { %1249 = vmatpush.msrb.mxu3 %v3421_v13  ;;  %1138 = vmatpush.msrb.mxu1 %v3432_v15 }
  0xae   : > { %1194 = vmatpush.msrb.mxu2 %v3432_v15  ;;  %1306 = vmatpush.msrb.mxu0 %v3432_v15 }
  0xaf   : > { %1250 = vmatpush.msrb.mxu3 %v3432_v15  ;;  %1139 = vmatpush.msrb.mxu1 %v3439_v17 }
  0xb0   : > { %1195 = vmatpush.msrb.mxu2 %v3439_v17  ;;  %1307 = vmatpush.msrb.mxu0 %v3439_v17 }
  0xb1   : > { %1251 = vmatpush.msrb.mxu3 %v3439_v17  ;;  %1140 = vmatpush.msrb.mxu1 %v3446_v19 }
  0xb2   : > { %1196 = vmatpush.msrb.mxu2 %v3446_v19  ;;  %1308 = vmatpush.msrb.mxu0 %v3446_v19 }
  0xb3   : > { %1252 = vmatpush.msrb.mxu3 %v3446_v19  ;;  %1141 = vmatpush.msrb.mxu1 %v3453_v21 }
  0xb4   : > { %1197 = vmatpush.msrb.mxu2 %v3453_v21  ;;  %1309 = vmatpush.msrb.mxu0 %v3453_v21 }
  0xb5   : > { %1253 = vmatpush.msrb.mxu3 %v3453_v21  ;;  %1142 = vmatpush.msrb.mxu1 %v3460_v23 }
  0xb6   : > { %1198 = vmatpush.msrb.mxu2 %v3460_v23  ;;  %1310 = vmatpush.msrb.mxu0 %v3460_v23 }
  0xb7   : > { %1254 = vmatpush.msrb.mxu3 %v3460_v23  ;;  %1143 = vmatpush.msrb.mxu1 %v3467_v25 }
  0xb8   : > { %1199 = vmatpush.msrb.mxu2 %v3467_v25  ;;  %1311 = vmatpush.msrb.mxu0 %v3467_v25 }
  0xb9   : > { %1255 = vmatpush.msrb.mxu3 %v3467_v25  ;;  %1144 = vmatpush.msrb.mxu1 %v3475_v27 }
  0xba   : > { %1200 = vmatpush.msrb.mxu2 %v3475_v27  ;;  %1312 = vmatpush.msrb.mxu0 %v3475_v27 }
  0xbb   : > { %1256 = vmatpush.msrb.mxu3 %v3475_v27  ;;  %1145 = vmatpush.msrb.mxu1 %v3482_v29 }
  0xbc   : > { %1201 = vmatpush.msrb.mxu2 %v3482_v29  ;;  %1313 = vmatpush.msrb.mxu0 %v3482_v29 }
  0xbd   : > { %1257 = vmatpush.msrb.mxu3 %v3482_v29  ;;  %1146 = vmatpush.msrb.mxu1 %v3494_v31 }
  0xbe   : > { %1202 = vmatpush.msrb.mxu2 %v3494_v31  ;;  %1314 = vmatpush.msrb.mxu0 %v3494_v31 }
  0xbf   : > { %1258 = vmatpush.msrb.mxu3 %v3494_v31  ;;  %1355 = vmatpush.msra.mxu1 %v3381_v2 }
  0xc0   : > { %921 = vmatmul.f32.gmra.mxu0 %v875_v53  ;;  %v877_v53 = vld [vmem:[%s3487_s23 + $0x18] sm:$0xff] }
  0xc1   : > { %1356 = vmatpush.msra.mxu1 %v3385_v3 }
  0xc3   : > { %1357 = vmatpush.msra.mxu1 %v3389_v5 }
  0xc5   : > { %1358 = vmatpush.msra.mxu1 %v3396_v7 }
  0xc7   : > { %1359 = vmatpush.msra.mxu1 %v3404_v9 }
  0xc8   : > { %924 = vmatmul.f32.gmra.mxu0 %v876_v22 }
  0xc9   : > { %1360 = vmatpush.msra.mxu1 %v3411_v11 }
  0xcb   : > { %1361 = vmatpush.msra.mxu1 %v3421_v13 }
  0xcd   : > { %1362 = vmatpush.msra.mxu1 %v3432_v15 }
  0xcf   : > { %1363 = vmatpush.msra.mxu1 %v3439_v17 }
  0xd0   : > { %927 = vmatmul.f32.gmra.mxu0 %v877_v53 }
  0xd1   : > { %1364 = vmatpush.msra.mxu1 %v3446_v19 }
  0xd3   : > { %1365 = vmatpush.msra.mxu1 %v3453_v21 }
  0xd5   : > { %1366 = vmatpush.msra.mxu1 %v3460_v23 }
  0xd7   : > { %1367 = vmatpush.msra.mxu1 %v3467_v25 }
  0xd9   : > { %1368 = vmatpush.msra.mxu1 %v3475_v27 }
  0xdb   : > { %1369 = vmatpush.msra.mxu1 %v3482_v29 }
  0xdd   : > { %1370 = vmatpush.msra.mxu1 %v3494_v31 }
 0x11a   : > { %v919_v35 = vpop.f32.mrf.mxu0 }
 0x11b   : > { %v980_v36 = vpop.f32.mrf.mxu1  ;;  %v920_v37 = vadd.f32 %v3590_v34, %v919_v35 }
 0x11d   : > { %v983_v38 = vadd.f32 %v980_v36, %v920_v37 }
 0x11f   : > { %v2552_v39 = vmul.f32 -1.442695, %v983_v38  ;;  %2704 = vtanh.f32 %v983_v38 }
 0x121   : > { %2706 = vpow2.f32 %v2552_v39 }
 0x125   : > { %v2705_v40 = vpop.eup %2704 }
 0x126   : > { %1006 = vrot.lane.b32.xlu0 %v2705_v40, %s3075_s12 }
 0x127   : > { %v2707_v41 = vpop.eup %2706 }
 0x128   : > { %v987_v42 = vadd.f32 1.0, %v2707_v41 }
 0x12a   : > { %2708 = vrcp.f32 %v987_v42  ;;  %v999_v46 = vand.u32 2147483648, %v987_v42  ;;  %v997_v48 = vand.u32 2147483647, %v987_v42  ;;  %vm993_vm1 = vweird.f32 %v987_v42 }
 0x12c   : > { %v1000_v50 = vor.u32 1.1754944e-38, %v999_v46  ;;  %vm998_vm3 = vcmp.eq.f32.partialorder %v997_v48, 8.507059e+37 }
 0x130   : > { %v2709_v43 = vpop.eup %2708 }
 0x131   : > { %v989_v44 = vmul.f32 %v2709_v43, %v987_v42  ;;  %vm994_vm0 = vweird.f32 %v2709_v43 }
 0x132   : > { %vm995_vm2 = vmor %vm993_vm1, %vm994_vm0 }
 0x133   : > { %v990_v45 = vsub.f32 1.0, %v989_v44 }
 0x135   : > { %v991_v47 = vmul.f32 %v2709_v43, %v990_v45 }
 0x137   : > { %v992_v49 = vadd.f32 %v2709_v43, %v991_v47 }
 0x139   : > { %v996_v51 = vsel %vm995_vm2, %v2709_v43, %v992_v49 }
 0x13a   : > { %v1001_v52 = vsel %vm998_vm3, %v1000_v50, %v996_v51 }
 0x13b   : > { %1009 = vrot.lane.b32.xlu1 %v1001_v52, %s3076_s18  ;;  %1004 = vrot.lane.b32.xlu0 %v1001_v52, %s3077_s0 }
 0x13d   : > { %v922_v4 = vpop.f32.mrf.mxu0 }
 0x13e   : > { %v923_v5 = vadd.f32 %v3590_v34, %v922_v4 }
 0x145   : > { %v925_v35 = vpop.f32.mrf.mxu0 }
 0x146   : > { %v926_v36 = vadd.f32 %v3590_v34, %v925_v35 }
 0x198   : > { %v1007_v56 = vpop.permute.xlu0 %1006 }
 0x199   : > { %v1008_v57 = vsel %vm962_vm4, %v1007_v56, 0.0 }
 0x19a   : > { %v1012_v60 = vmul.f32 %v1008_v57, %v1001_v52 }
 0x1ad   : > { %v1005_v59 = vpop.permute.xlu0 %1004  ;;  %v1010_v1 = vpop.permute.xlu1 %1009 }
 0x1ae   : > { %v1011_v61 = vmul.f32 0.0, %v1005_v59 }
 0x1b0   : > { %v1013_v62 = vadd.f32 %v1012_v60, %v1011_v61 }
 0x1b2   : > { %2710 = vtanh.f32 %v1013_v62  ;;  %v1018_v63 = vsel %vm1016_vm5, %v1013_v62, 0.0 }
 0x1b8   : > { %v2711_v0 = vpop.eup %2710 }
 0x1b9   : > { %v1015_v2 = vmul.f32 %v2711_v0, %v1010_v1 }
 0x1bb   : > { %2553 = vmatmul.msk.f32.vlgmr.msra.gmra.mxu2 %vm1016_vm5, %v1015_v2  ;;  %v1017_v3 = vsel %vm1016_vm5, %v1015_v2, 0.0  ;;  %vm1184_vm5 = vcmp.gt.f32.partialorder %v3606_v58, 3.0 }
 0x23e   : > { %v1036_v6 = vpop.f32.mrf.mxu2 }
 0x23f   : > { %v1039_v7 = vadd.f32 %v1036_v6, %v923_v5 }
 0x241   : > { %v2554_v8 = vmul.f32 -1.442695, %v1039_v7  ;;  %2712 = vtanh.f32 %v1039_v7 }
 0x243   : > { %2714 = vpow2.f32 %v2554_v8 }
 0x247   : > { %v2713_v9 = vpop.eup %2712 }
 0x248   : > { %1062 = vrot.lane.b32.xlu1 %v2713_v9, %s3075_s12 }
 0x249   : > { %v2715_v10 = vpop.eup %2714 }
 0x24a   : > { %v1043_v11 = vadd.f32 1.0, %v2715_v10 }
 0x24c   : > { %2716 = vrcp.f32 %v1043_v11  ;;  %v1055_v15 = vand.u32 2147483648, %v1043_v11  ;;  %v1053_v17 = vand.u32 2147483647, %v1043_v11  ;;  %vm1049_vm7 = vweird.f32 %v1043_v11 }
 0x24e   : > { %v1056_v19 = vor.u32 1.1754944e-38, %v1055_v15  ;;  %vm1054_vm9 = vcmp.eq.f32.partialorder %v1053_v17, 8.507059e+37 }
 0x252   : > { %v2717_v12 = vpop.eup %2716 }
 0x253   : > { %v1045_v13 = vmul.f32 %v2717_v12, %v1043_v11  ;;  %vm1050_vm6 = vweird.f32 %v2717_v12 }
 0x254   : > { %vm1051_vm8 = vmor %vm1049_vm7, %vm1050_vm6 }
 0x255   : > { %v1046_v14 = vsub.f32 1.0, %v1045_v13 }
 0x257   : > { %v1047_v16 = vmul.f32 %v2717_v12, %v1046_v14 }
 0x259   : > { %v1048_v18 = vadd.f32 %v2717_v12, %v1047_v16 }
 0x25b   : > { %v1052_v20 = vsel %vm1051_vm8, %v2717_v12, %v1048_v18 }
 0x25c   : > { %v1057_v21 = vsel %vm1054_vm9, %v1056_v19, %v1052_v20 }
 0x25d   : > { %1060 = vrot.lane.b32.xlu2 %v1057_v21, %s3077_s0 }
 0x265   : > { %1065 = vrot.lane.b32.xlu2 %v1057_v21, %s3076_s18 }
 0x2b7   : > { %v1061_v23 = vpop.permute.xlu2 %1060 }
 0x2b8   : > { %v1067_v26 = vmul.f32 %v1061_v23, %v1018_v63 }
 0x2ba   : > { %v1063_v24 = vpop.permute.xlu1 %1062 }
 0x2bb   : > { %v1064_v25 = vsel %vm962_vm4, %v1063_v24, 0.0 }
 0x2bc   : > { %v1068_v27 = vmul.f32 %v1064_v25, %v1057_v21  ;;  %v878_v21 = vld [vmem:[%s3487_s23 + $0x20] sm:$0xff] }
 0x2bd   : > { %930 = vmatmul.f32.gmra.mxu0 %v878_v21  ;;  %v881_v21 = vld [vmem:[%s3487_s23 + $0x38] sm:$0xff] }
 0x2be   : > { %v1069_v28 = vadd.f32 %v1068_v27, %v1067_v26 }
 0x2bf   : > { %v1066_v31 = vpop.permute.xlu2 %1065 }
 0x2c0   : > { %2718 = vtanh.f32 %v1069_v28  ;;  %v1074_v29 = vsel %vm1072_vm10, %v1069_v28, %v1018_v63 }
 0x2c6   : > { %v2719_v30 = vpop.eup %2718 }
 0x2c7   : > { %v1071_v32 = vmul.f32 %v2719_v30, %v1066_v31 }
 0x2c9   : > { %v1073_v33 = vsel %vm1072_vm10, %v1071_v32, %v1017_v3  ;;  %v928_v3 = vpop.f32.mrf.mxu0  ;;  %vm1240_vm10 = vcmp.gt.f32.partialorder %v3606_v58, 4.0 }
 0x2ca   : > { %1091 = vmatmul.f32.vlgmr.msra.gmra.mxu3 %v1073_v33  ;;  %v929_v4 = vadd.f32 %v3590_v34, %v928_v3 }
 0x34d   : > { %v1092_v37 = vpop.f32.mrf.mxu3 }
 0x34e   : > { %v1095_v38 = vadd.f32 %v1092_v37, %v926_v36 }
 0x350   : > { %v2555_v39 = vmul.f32 -1.442695, %v1095_v38  ;;  %2720 = vtanh.f32 %v1095_v38 }
 0x352   : > { %2722 = vpow2.f32 %v2555_v39 }
 0x356   : > { %v2721_v40 = vpop.eup %2720 }
 0x357   : > { %1118 = vrot.lane.b32.xlu0 %v2721_v40, %s3075_s12 }
 0x358   : > { %v2723_v41 = vpop.eup %2722 }
 0x359   : > { %v1099_v42 = vadd.f32 1.0, %v2723_v41 }
 0x35b   : > { %2724 = vrcp.f32 %v1099_v42  ;;  %v1111_v46 = vand.u32 2147483648, %v1099_v42  ;;  %v1109_v48 = vand.u32 2147483647, %v1099_v42  ;;  %vm1105_vm12 = vweird.f32 %v1099_v42 }
 0x35d   : > { %v1112_v50 = vor.u32 1.1754944e-38, %v1111_v46  ;;  %vm1110_vm14 = vcmp.eq.f32.partialorder %v1109_v48, 8.507059e+37 }
 0x361   : > { %v2725_v43 = vpop.eup %2724 }
 0x362   : > { %v1101_v44 = vmul.f32 %v2725_v43, %v1099_v42  ;;  %vm1106_vm11 = vweird.f32 %v2725_v43 }
 0x363   : > { %vm1107_vm13 = vmor %vm1105_vm12, %vm1106_vm11 }
 0x364   : > { %v1102_v45 = vsub.f32 1.0, %v1101_v44 }
 0x366   : > { %v1103_v47 = vmul.f32 %v2725_v43, %v1102_v45 }
 0x368   : > { %v1104_v49 = vadd.f32 %v2725_v43, %v1103_v47 }
 0x36a   : > { %v1108_v51 = vsel %vm1107_vm13, %v2725_v43, %v1104_v49 }
 0x36b   : > { %v1113_v52 = vsel %vm1110_vm14, %v1112_v50, %v1108_v51 }
 0x36c   : > { %1121 = vrot.lane.b32.xlu2 %v1113_v52, %s3076_s18  ;;  %1116 = vrot.lane.b32.xlu1 %v1113_v52, %s3077_s0 }
 0x3c6   : > { %v1122_v0 = vpop.permute.xlu2 %1121 }
 0x3c9   : > { %v1119_v54 = vpop.permute.xlu0 %1118 }
 0x3ca   : > { %v1120_v56 = vsel %vm962_vm4, %v1119_v54, 0.0 }
 0x3cb   : > { %v1124_v59 = vmul.f32 %v1120_v56, %v1113_v52  ;;  %v879_v52 = vld [vmem:[%s3487_s23 + $0x28] sm:$0xff] }
 0x3cc   : > { %933 = vmatmul.f32.gmra.mxu0 %v879_v52 }
 0x3de   : > { %v1117_v57 = vpop.permute.xlu1 %1116 }
 0x3df   : > { %v1123_v60 = vmul.f32 %v1117_v57, %v1074_v29 }
 0x3e1   : > { %v1125_v61 = vadd.f32 %v1124_v59, %v1123_v60 }
 0x3e3   : > { %2726 = vtanh.f32 %v1125_v61  ;;  %v1130_v62 = vsel %vm1128_vm15, %v1125_v61, %v1074_v29 }
 0x3e9   : > { %v2727_v63 = vpop.eup %2726 }
 0x3ea   : > { %v1127_v1 = vmul.f32 %v2727_v63, %v1122_v0 }
 0x3ec   : > { %v1129_v2 = vsel %vm1128_vm15, %v1127_v1, %v1073_v33  ;;  %v931_v33 = vpop.f32.mrf.mxu0  ;;  %vm1296_vm15 = vcmp.gt.f32.partialorder %v3606_v58, 5.0 }
 0x3ed   : > { %1147 = vmatmul.f32.vlgmr.msrb.gmra.mxu1 %v1129_v2  ;;  %v932_v35 = vadd.f32 %v3590_v34, %v931_v33 }
 0x46a   : > { %v1148_v5 = vpop.f32.mrf.mxu1 }
 0x46b   : > { %v1151_v6 = vadd.f32 %v1148_v5, %v929_v4 }
 0x46d   : > { %v2556_v7 = vmul.f32 -1.442695, %v1151_v6  ;;  %2728 = vtanh.f32 %v1151_v6 }
 0x46f   : > { %2730 = vpow2.f32 %v2556_v7 }
 0x473   : > { %v2729_v8 = vpop.eup %2728 }
 0x474   : > { %1174 = vrot.lane.b32.xlu0 %v2729_v8, %s3075_s12 }
 0x475   : > { %v2731_v9 = vpop.eup %2730 }
 0x476   : > { %v1155_v10 = vadd.f32 1.0, %v2731_v9 }
 0x478   : > { %2732 = vrcp.f32 %v1155_v10  ;;  %v1167_v14 = vand.u32 2147483648, %v1155_v10  ;;  %v1165_v16 = vand.u32 2147483647, %v1155_v10  ;;  %vm1161_vm1 = vweird.f32 %v1155_v10 }
 0x47a   : > { %v1168_v18 = vor.u32 1.1754944e-38, %v1167_v14  ;;  %vm1166_vm3 = vcmp.eq.f32.partialorder %v1165_v16, 8.507059e+37 }
 0x47e   : > { %v2733_v11 = vpop.eup %2732 }
 0x47f   : > { %v1157_v12 = vmul.f32 %v2733_v11, %v1155_v10  ;;  %vm1162_vm0 = vweird.f32 %v2733_v11 }
 0x480   : > { %vm1163_vm2 = vmor %vm1161_vm1, %vm1162_vm0 }
 0x481   : > { %v1158_v13 = vsub.f32 1.0, %v1157_v12 }
 0x483   : > { %v1159_v15 = vmul.f32 %v2733_v11, %v1158_v13 }
 0x485   : > { %v1160_v17 = vadd.f32 %v2733_v11, %v1159_v15 }
 0x487   : > { %v1164_v19 = vsel %vm1163_vm2, %v2733_v11, %v1160_v17 }
 0x488   : > { %v1169_v20 = vsel %vm1166_vm3, %v1168_v18, %v1164_v19 }
 0x489   : > { %1177 = vrot.lane.b32.xlu2 %v1169_v20, %s3076_s18  ;;  %1172 = vrot.lane.b32.xlu1 %v1169_v20, %s3077_s0 }
 0x4e3   : > { %v1178_v30 = vpop.permute.xlu2 %1177 }
 0x4e6   : > { %v1175_v22 = vpop.permute.xlu0 %1174 }
 0x4e7   : > { %v1176_v23 = vsel %vm962_vm4, %v1175_v22, 0.0 }
 0x4e8   : > { %v1180_v25 = vmul.f32 %v1176_v23, %v1169_v20  ;;  %v880_v20 = vld [vmem:[%s3487_s23 + $0x30] sm:$0xff] }
 0x4e9   : > { %936 = vmatmul.f32.gmra.mxu0 %v880_v20  ;;  %v1423_v20 = vld [vmem:[%s3368_s30 + $0x68] sm:$0xff] }
 0x4f1   : > { %939 = vmatmul.f32.gmra.mxu0 %v881_v21  ;;  %v1422_v21 = vld [vmem:[%s3368_s30 + $0x60] sm:$0xff] }
 0x4fb   : > { %v1173_v24 = vpop.permute.xlu1 %1172 }
 0x4fc   : > { %v1179_v26 = vmul.f32 %v1173_v24, %v1130_v62 }
 0x4fe   : > { %v1181_v27 = vadd.f32 %v1180_v25, %v1179_v26 }
 0x500   : > { %2734 = vtanh.f32 %v1181_v27  ;;  %v1186_v28 = vsel %vm1184_vm5, %v1181_v27, %v1130_v62 }
 0x506   : > { %v2735_v29 = vpop.eup %2734 }
 0x507   : > { %v1183_v31 = vmul.f32 %v2735_v29, %v1178_v30 }
 0x509   : > { %v1185_v32 = vsel %vm1184_vm5, %v1183_v31, %v1129_v2  ;;  %v934_v2 = vpop.f32.mrf.mxu0  ;;  %vm1352_vm5 = vcmp.gt.f32.partialorder %v3606_v58, 6.0 }
 0x50a   : > { %1203 = vmatmul.f32.vlgmr.msrb.gmra.mxu2 %v1185_v32  ;;  %v935_v3 = vadd.f32 %v3590_v34, %v934_v2 }
 0x566   : > { %v937_v33 = vpop.f32.mrf.mxu0 }
 0x58d   : > { %v1204_v36 = vpop.f32.mrf.mxu2 }
 0x58e   : > { %v1207_v37 = vadd.f32 %v1204_v36, %v932_v35  ;;  %v940_v35 = vpop.f32.mrf.mxu0  ;;  %v938_v36 = vadd.f32 %v3590_v34, %v937_v33  ;;  %v1410_v33 = vld [vmem:[%s3368_s30] sm:$0xff] }
 0x58f   : > { %v941_v2 = vadd.f32 %v3590_v34, %v940_v35 }
 0x590   : > { %v2557_v38 = vmul.f32 -1.442695, %v1207_v37  ;;  %2736 = vtanh.f32 %v1207_v37 }
 0x592   : > { %2738 = vpow2.f32 %v2557_v38 }
 0x596   : > { %v2737_v39 = vpop.eup %2736 }
 0x597   : > { %1230 = vrot.lane.b32.xlu0 %v2737_v39, %s3075_s12 }
 0x598   : > { %v2739_v40 = vpop.eup %2738 }
 0x599   : > { %v1211_v41 = vadd.f32 1.0, %v2739_v40 }
 0x59b   : > { %2740 = vrcp.f32 %v1211_v41  ;;  %v1223_v45 = vand.u32 2147483648, %v1211_v41  ;;  %v1221_v47 = vand.u32 2147483647, %v1211_v41  ;;  %vm1217_vm7 = vweird.f32 %v1211_v41 }
 0x59d   : > { %v1224_v49 = vor.u32 1.1754944e-38, %v1223_v45  ;;  %vm1222_vm9 = vcmp.eq.f32.partialorder %v1221_v47, 8.507059e+37 }
 0x5a1   : > { %v2741_v42 = vpop.eup %2740 }
 0x5a2   : > { %v1213_v43 = vmul.f32 %v2741_v42, %v1211_v41  ;;  %vm1218_vm6 = vweird.f32 %v2741_v42 }
 0x5a3   : > { %vm1219_vm8 = vmor %vm1217_vm7, %vm1218_vm6 }
 0x5a4   : > { %v1214_v44 = vsub.f32 1.0, %v1213_v43 }
 0x5a6   : > { %v1215_v46 = vmul.f32 %v2741_v42, %v1214_v44 }
 0x5a8   : > { %v1216_v48 = vadd.f32 %v2741_v42, %v1215_v46 }
 0x5aa   : > { %v1220_v50 = vsel %vm1219_vm8, %v2741_v42, %v1216_v48 }
 0x5ab   : > { %v1225_v51 = vsel %vm1222_vm9, %v1224_v49, %v1220_v50 }
 0x5ac   : > { %1233 = vrot.lane.b32.xlu2 %v1225_v51, %s3076_s18  ;;  %1228 = vrot.lane.b32.xlu1 %v1225_v51, %s3077_s0 }
 0x606   : > { %v1234_v63 = vpop.permute.xlu2 %1233 }
 0x609   : > { %v1231_v53 = vpop.permute.xlu0 %1230 }
 0x60a   : > { %v1232_v54 = vsel %vm962_vm4, %v1231_v53, 0.0 }
 0x60b   : > { %v1236_v57 = vmul.f32 %v1232_v54, %v1225_v51 }
 0x61e   : > { %v1229_v56 = vpop.permute.xlu1 %1228 }
 0x61f   : > { %v1235_v59 = vmul.f32 %v1229_v56, %v1186_v28 }
 0x621   : > { %v1237_v60 = vadd.f32 %v1236_v57, %v1235_v59 }
 0x623   : > { %2742 = vtanh.f32 %v1237_v60  ;;  %v1242_v61 = vsel %vm1240_vm10, %v1237_v60, %v1186_v28 }
 0x629   : > { %v2743_v62 = vpop.eup %2742 }
 0x62a   : > { %v1239_v0 = vmul.f32 %v2743_v62, %v1234_v63 }
 0x62c   : > { %v1241_v1 = vsel %vm1240_vm10, %v1239_v0, %v1185_v32  ;;  %vm1408_vm10 = vcmp.gt.f32.partialorder %v3606_v58, 7.0 }
 0x62d   : > { %1259 = vmatmul.f32.vlgmr.msrb.gmra.mxu3 %v1241_v1 }
 0x6b0   : > { %v1260_v4 = vpop.f32.mrf.mxu3 }
 0x6b1   : > { %v1263_v5 = vadd.f32 %v1260_v4, %v935_v3 }
 0x6b3   : > { %v2558_v6 = vmul.f32 -1.442695, %v1263_v5  ;;  %2744 = vtanh.f32 %v1263_v5 }
 0x6b5   : > { %2746 = vpow2.f32 %v2558_v6 }
 0x6b9   : > { %v2745_v7 = vpop.eup %2744 }
 0x6ba   : > { %1286 = vrot.lane.b32.xlu0 %v2745_v7, %s3075_s12 }
 0x6bb   : > { %v2747_v8 = vpop.eup %2746 }
 0x6bc   : > { %v1267_v9 = vadd.f32 1.0, %v2747_v8 }
 0x6be   : > { %2748 = vrcp.f32 %v1267_v9  ;;  %v1279_v13 = vand.u32 2147483648, %v1267_v9  ;;  %v1277_v15 = vand.u32 2147483647, %v1267_v9  ;;  %vm1273_vm12 = vweird.f32 %v1267_v9 }
 0x6c0   : > { %v1280_v17 = vor.u32 1.1754944e-38, %v1279_v13  ;;  %vm1278_vm14 = vcmp.eq.f32.partialorder %v1277_v15, 8.507059e+37 }
 0x6c4   : > { %v2749_v10 = vpop.eup %2748 }
 0x6c5   : > { %v1269_v11 = vmul.f32 %v2749_v10, %v1267_v9  ;;  %vm1274_vm11 = vweird.f32 %v2749_v10 }
 0x6c6   : > { %vm1275_vm13 = vmor %vm1273_vm12, %vm1274_vm11 }
 0x6c7   : > { %v1270_v12 = vsub.f32 1.0, %v1269_v11 }
 0x6c9   : > { %v1271_v14 = vmul.f32 %v2749_v10, %v1270_v12 }
 0x6cb   : > { %v1272_v16 = vadd.f32 %v2749_v10, %v1271_v14 }
 0x6cd   : > { %v1276_v18 = vsel %vm1275_vm13, %v2749_v10, %v1272_v16 }
 0x6ce   : > { %v1281_v19 = vsel %vm1278_vm14, %v1280_v17, %v1276_v18  ;;  %v1425_v18 = vld [vmem:[%s3368_s30 + $0x78] sm:$0xff] }
 0x6cf   : > { %1289 = vrot.lane.b32.xlu2 %v1281_v19, %s3076_s18  ;;  %1284 = vrot.lane.b32.xlu1 %v1281_v19, %s3077_s0 }
 0x6d0   : > { %1430 = vmatpush.msra.mxu2 %v1425_v18 }
 0x729   : > { %v1290_v30 = vpop.permute.xlu2 %1289 }
 0x72c   : > { %v1287_v22 = vpop.permute.xlu0 %1286 }
 0x72d   : > { %v1288_v23 = vsel %vm962_vm4, %v1287_v22, 0.0  ;;  %v1421_v22 = vld [vmem:[%s3368_s30 + $0x58] sm:$0xff] }
 0x72e   : > { %v1292_v25 = vmul.f32 %v1288_v23, %v1281_v19  ;;  %v1424_v19 = vld [vmem:[%s3368_s30 + $0x70] sm:$0xff] }
 0x72f   : > { %1431 = vmatpush.msra.mxu2 %v1424_v19  ;;  %v1420_v23 = vld [vmem:[%s3368_s30 + $0x50] sm:$0xff] }
 0x731   : > { %1432 = vmatpush.msra.mxu2 %v1423_v20 }
 0x733   : > { %1433 = vmatpush.msra.mxu2 %v1422_v21 }
 0x735   : > { %1434 = vmatpush.msra.mxu2 %v1421_v22 }
 0x737   : > { %1435 = vmatpush.msra.mxu2 %v1420_v23 }
 0x741   : > { %v1285_v24 = vpop.permute.xlu1 %1284 }
 0x742   : > { %v1291_v26 = vmul.f32 %v1285_v24, %v1242_v61  ;;  %v1419_v24 = vld [vmem:[%s3368_s30 + $0x48] sm:$0xff] }
 0x743   : > { %1436 = vmatpush.msra.mxu2 %v1419_v24 }
 0x744   : > { %v1293_v27 = vadd.f32 %v1292_v25, %v1291_v26  ;;  %v1418_v25 = vld [vmem:[%s3368_s30 + $0x40] sm:$0xff]  ;;  %v1417_v26 = vld [vmem:[%s3368_s30 + $0x38] sm:$0xff] }
 0x745   : > { %1437 = vmatpush.msra.mxu2 %v1418_v25 }
 0x746   : > { %2750 = vtanh.f32 %v1293_v27  ;;  %v1298_v28 = vsel %vm1296_vm15, %v1293_v27, %v1242_v61  ;;  %v1416_v27 = vld [vmem:[%s3368_s30 + $0x30] sm:$0xff] }
 0x747   : > { %1438 = vmatpush.msra.mxu2 %v1417_v26 }
 0x749   : > { %1439 = vmatpush.msra.mxu2 %v1416_v27 }
 0x74c   : > { %v2751_v29 = vpop.eup %2750 }
 0x74d   : > { %v1295_v31 = vmul.f32 %v2751_v29, %v1290_v30  ;;  %v1414_v29 = vld [vmem:[%s3368_s30 + $0x20] sm:$0xff]  ;;  %v1413_v30 = vld [vmem:[%s3368_s30 + $0x18] sm:$0xff] }
 0x74f   : > { %v1297_v32 = vsel %vm1296_vm15, %v1295_v31, %v1241_v1  ;;  %v1412_v31 = vld [vmem:[%s3368_s30 + $0x10] sm:$0xff] }
 0x750   : > { %1315 = vmatmul.f32.vlgmr.msrb.gmra.mxu0 %v1297_v32 }
 0x7cd   : > { %v1316_v37 = vpop.f32.mrf.mxu0 }
 0x7ce   : > { %v1319_v38 = vadd.f32 %v1316_v37, %v938_v36 }
 0x7d0   : > { %v2559_v39 = vmul.f32 -1.442695, %v1319_v38  ;;  %2752 = vtanh.f32 %v1319_v38 }
 0x7d2   : > { %2754 = vpow2.f32 %v2559_v39 }
 0x7d6   : > { %v2753_v40 = vpop.eup %2752 }
 0x7d7   : > { %1342 = vrot.lane.b32.xlu0 %v2753_v40, %s3075_s12 }
 0x7d8   : > { %v2755_v41 = vpop.eup %2754 }
 0x7d9   : > { %v1323_v42 = vadd.f32 1.0, %v2755_v41 }
 0x7db   : > { %2756 = vrcp.f32 %v1323_v42  ;;  %v1335_v46 = vand.u32 2147483648, %v1323_v42  ;;  %v1333_v48 = vand.u32 2147483647, %v1323_v42  ;;  %vm1329_vm1 = vweird.f32 %v1323_v42 }
 0x7dd   : > { %v1336_v50 = vor.u32 1.1754944e-38, %v1335_v46  ;;  %vm1334_vm3 = vcmp.eq.f32.partialorder %v1333_v48, 8.507059e+37 }
 0x7e1   : > { %v2757_v43 = vpop.eup %2756 }
 0x7e2   : > { %v1325_v44 = vmul.f32 %v2757_v43, %v1323_v42  ;;  %vm1330_vm0 = vweird.f32 %v2757_v43 }
 0x7e3   : > { %vm1331_vm2 = vmor %vm1329_vm1, %vm1330_vm0 }
 0x7e4   : > { %v1326_v45 = vsub.f32 1.0, %v1325_v44 }
 0x7e6   : > { %v1327_v47 = vmul.f32 %v2757_v43, %v1326_v45  ;;  %v2703_v45 = vld [vmem:[%s873_s17] ss:$0 sm:$0xff] }
 0x7e8   : > { %v1328_v49 = vadd.f32 %v2757_v43, %v1327_v47 }
 0x7ea   : > { %v1332_v51 = vsel %vm1331_vm2, %v2757_v43, %v1328_v49 }
 0x7eb   : > { %v1337_v52 = vsel %vm1334_vm3, %v1336_v50, %v1332_v51 }
 0x7ec   : > { %1345 = vrot.lane.b32.xlu2 %v1337_v52, %s3076_s18  ;;  %1340 = vrot.lane.b32.xlu1 %v1337_v52, %s3077_s0 }
 0x846   : > { %v1346_v63 = vpop.permute.xlu2 %1345 }
 0x849   : > { %v1343_v53 = vpop.permute.xlu0 %1342 }
 0x84a   : > { %v1344_v54 = vsel %vm962_vm4, %v1343_v53, 0.0 }
 0x84b   : > { %v1348_v57 = vmul.f32 %v1344_v54, %v1337_v52 }
 0x85e   : > { %v1341_v56 = vpop.permute.xlu1 %1340 }
 0x85f   : > { %v1347_v59 = vmul.f32 %v1341_v56, %v1298_v28 }
 0x861   : > { %v1349_v60 = vadd.f32 %v1348_v57, %v1347_v59 }
 0x863   : > { %2758 = vtanh.f32 %v1349_v60  ;;  %v3657_v61 = vsel %vm1352_vm5, %v1349_v60, %v1298_v28  ;;  %v1415_v28 = vld [vmem:[%s3368_s30 + $0x28] sm:$0xff] }
 0x864   : > { %1440 = vmatpush.msra.mxu2 %v1415_v28 }
 0x866   : > { %1441 = vmatpush.msra.mxu2 %v1414_v29 }
 0x868   : > { %1442 = vmatpush.msra.mxu2 %v1413_v30 }
 0x869   : > { %v2759_v62 = vpop.eup %2758 }
 0x86a   : > { %v1351_v0 = vmul.f32 %v2759_v62, %v1346_v63  ;;  %1443 = vmatpush.msra.mxu2 %v1412_v31 }
 0x86c   : > { %v3659_v1 = vsel %vm1352_vm5, %v1351_v0, %v1297_v32  ;;  %v1411_v32 = vld [vmem:[%s3368_s30 + $0x8] sm:$0xff] }
 0x86d   : > { %1371 = vmatmul.f32.vlgmr.msra.gmra.mxu1 %v3659_v1  ;;  %1444 = vmatpush.msra.mxu2 %v1411_v32 }
 0x86f   : > { %1445 = vmatpush.msra.mxu2 %v1410_v33 }
 0x8ea   : > { %v1372_v3 = vpop.f32.mrf.mxu1 }
 0x8eb   : > { %v1375_v4 = vadd.f32 %v1372_v3, %v941_v2 }
 0x8ed   : > { %v2560_v5 = vmul.f32 -1.442695, %v1375_v4  ;;  %2760 = vtanh.f32 %v1375_v4 }
 0x8ef   : > { %2762 = vpow2.f32 %v2560_v5 }
 0x8f3   : > { %v2761_v6 = vpop.eup %2760 }
 0x8f4   : > { %1398 = vrot.lane.b32.xlu0 %v2761_v6, %s3075_s12 }
 0x8f5   : > { %v2763_v7 = vpop.eup %2762 }
 0x8f6   : > { %v1379_v8 = vadd.f32 1.0, %v2763_v7 }
 0x8f8   : > { %2764 = vrcp.f32 %v1379_v8  ;;  %v1391_v12 = vand.u32 2147483648, %v1379_v8  ;;  %v1389_v34 = vand.u32 2147483647, %v1379_v8  ;;  %vm1385_vm7 = vweird.f32 %v1379_v8 }
 0x8fa   : > { %v1392_v15 = vor.u32 1.1754944e-38, %v1391_v12  ;;  %vm1390_vm9 = vcmp.eq.f32.partialorder %v1389_v34, 8.507059e+37 }
 0x8fe   : > { %v2765_v9 = vpop.eup %2764 }
 0x8ff   : > { %v1381_v10 = vmul.f32 %v2765_v9, %v1379_v8  ;;  %vm1386_vm6 = vweird.f32 %v2765_v9 }
 0x900   : > { %vm1387_vm8 = vmor %vm1385_vm7, %vm1386_vm6 }
 0x901   : > { %v1382_v11 = vsub.f32 1.0, %v1381_v10 }
 0x903   : > { %v1383_v13 = vmul.f32 %v2765_v9, %v1382_v11 }
 0x905   : > { %v1384_v14 = vadd.f32 %v2765_v9, %v1383_v13 }
 0x907   : > { %v1388_v16 = vsel %vm1387_vm8, %v2765_v9, %v1384_v14 }
 0x908   : > { %v1393_v17 = vsel %vm1390_vm9, %v1392_v15, %v1388_v16 }
 0x909   : > { %1401 = vrot.lane.b32.xlu2 %v1393_v17, %s3076_s18  ;;  %1396 = vrot.lane.b32.xlu1 %v1393_v17, %s3077_s0 }
 0x963   : > { %v1402_v42 = vpop.permute.xlu2 %1401 }
 0x966   : > { %v1399_v35 = vpop.permute.xlu0 %1398 }
 0x967   : > { %v1400_v36 = vsel %vm962_vm4, %v1399_v35, 0.0 }
 0x968   : > { %v1404_v38 = vmul.f32 %v1400_v36, %v1393_v17 }
 0x97b   : > { %v1397_v37 = vpop.permute.xlu1 %1396 }
 0x97c   : > { %v1403_v39 = vmul.f32 %v1397_v37, %v3657_v61 }
 0x97e   : > { %v1405_v40 = vadd.f32 %v1404_v38, %v1403_v39 }
 0x980   : > { %2766 = vtanh.f32 %v1405_v40 }
 0x986   : > { %v2767_v41 = vpop.eup %2766 }
 0x987   : > { %v1407_v43 = vmul.f32 %v2767_v41, %v1402_v42 }
 0x989   : > { %v1409_v44 = vsel %vm1408_vm10, %v1407_v43, %v3659_v1 }
 0x98a   : > { %1446 = vmatmul.f32.vlgmr.msra.gmra.mxu2 %v1409_v44 }
 0xa0a   : > { %1453 = sbr.rel (%p2527_p4) target bundleno = 2577 (0xa11), region = 132 }
 0xa0d   : > { %v1447_v46 = vpop.f32.mrf.mxu2 }
 0xa0e   : > { %v3696_v47 = vadd.f32 %v2703_v45, %v1447_v46 }
 0xa10   : > { %1454 = vst [vmem:[#allocation2] sm:$0xff] %v3696_v47 }
 0xa11 PF: > { %p2562_p5 = scmp.ne.s32.totalorder %s3207_s3, 1 }
 0xa12   : > { %s4234_s2 = sld [smem:[#allocation29_spill]] (!%p2562_p5) }
 0xa13   : > { %1458 = sbr.rel (%p2562_p5) target bundleno = 3737 (0xe99), region = 136  ;;  %s4236_s28 = sld [smem:[#allocation26_spill]] (!%p2562_p5) }
 0xa14   : > { %s4237_s13 = sld [smem:[#allocation28_spill]] (!%p2562_p5) }
 0xa15   : > { %s4238_s0 = sld [smem:[#allocation30_spill]] (!%p2562_p5) }
 0xa16   : > { %s4239_s1 = sld [smem:[#allocation32_spill]] (!%p2562_p5) }
 0xa17   : > { %s4240_s27 = sld [smem:[#allocation36_spill]] (!%p2562_p5) }
 0xa18   : > { %v1523_v58 = vld [vmem:[%s4168_s8 + $0x1f0] sm:$0xff]  ;;  %v1524_v48 = vld [vmem:[%s4168_s8 + $0x1f8] sm:$0xff]  ;;  %v1522_v53 = vld [vmem:[%s4168_s8 + $0x1e8] sm:$0xff]  ;;  %s4235_s9 = smov %s4234_s2  ;;  %s4241_s20 = sld [smem:[#allocation34_spill]] }
 0xa19   : > { %v1519_v49 = vld [vmem:[%s4168_s8 + $0x1d0] sm:$0xff]  ;;  %1575 = vmatpush.msra.mxu2 %v1523_v58  ;;  %1595 = vmatpush.msra.mxu3 %v1524_v48  ;;  %v1520_v50 = vld [vmem:[%s4168_s8 + $0x1d8] sm:$0xff]  ;;  %v1518_v54 = vld [vmem:[%s4168_s8 + $0x1c8] sm:$0xff]  ;;  %s4242_s15 = sld [smem:[#allocation37_spill]] }
 0xa1a   : > { %v1515_v51 = vld [vmem:[%s4168_s8 + $0x1b0] sm:$0xff]  ;;  %v1516_v52 = vld [vmem:[%s4168_s8 + $0x1b8] sm:$0xff]  ;;  %1555 = vmatpush.msra.mxu1 %v1522_v53  ;;  %v1521_v59 = vld [vmem:[%s4168_s8 + $0x1e0] sm:$0xff] }
 0xa1b   : > { %1576 = vmatpush.msra.mxu2 %v1519_v49  ;;  %1596 = vmatpush.msra.mxu3 %v1520_v50  ;;  %v1511_v56 = vld [vmem:[%s4168_s8 + $0x190] sm:$0xff]  ;;  %v1512_v57 = vld [vmem:[%s4168_s8 + $0x198] sm:$0xff]  ;;  %v1514_v60 = vld [vmem:[%s4168_s8 + $0x1a8] sm:$0xff] }
 0xa1c   : > { %v1517_v61 = vld [vmem:[%s4168_s8 + $0x1c0] sm:$0xff]  ;;  %1556 = vmatpush.msra.mxu1 %v1518_v54  ;;  %v1507_v62 = vld [vmem:[%s4168_s8 + $0x170] sm:$0xff]  ;;  %v1508_v63 = vld [vmem:[%s4168_s8 + $0x178] sm:$0xff]  ;;  %1535 = vmatpush.msra.mxu0 %v1521_v59 }
 0xa1d   : > { %1577 = vmatpush.msra.mxu2 %v1515_v51  ;;  %1597 = vmatpush.msra.mxu3 %v1516_v52  ;;  %v1510_v0 = vld [vmem:[%s4168_s8 + $0x188] sm:$0xff]  ;;  %v1513_v1 = vld [vmem:[%s4168_s8 + $0x1a0] sm:$0xff]  ;;  %v1503_v2 = vld [vmem:[%s4168_s8 + $0x150] sm:$0xff] }
 0xa1e   : > { %1557 = vmatpush.msra.mxu1 %v1514_v60  ;;  %v1504_v3 = vld [vmem:[%s4168_s8 + $0x158] sm:$0xff]  ;;  %1536 = vmatpush.msra.mxu0 %v1517_v61  ;;  %v1506_v4 = vld [vmem:[%s4168_s8 + $0x168] sm:$0xff]  ;;  %v1509_v5 = vld [vmem:[%s4168_s8 + $0x180] sm:$0xff] }
 0xa1f   : > { %1578 = vmatpush.msra.mxu2 %v1511_v56  ;;  %1598 = vmatpush.msra.mxu3 %v1512_v57  ;;  %v1499_v6 = vld [vmem:[%s4168_s8 + $0x130] sm:$0xff]  ;;  %v1500_v7 = vld [vmem:[%s4168_s8 + $0x138] sm:$0xff]  ;;  %v1502_v8 = vld [vmem:[%s4168_s8 + $0x148] sm:$0xff] }
 0xa20   : > { %1558 = vmatpush.msra.mxu1 %v1510_v0  ;;  %1537 = vmatpush.msra.mxu0 %v1513_v1  ;;  %v1505_v9 = vld [vmem:[%s4168_s8 + $0x160] sm:$0xff]  ;;  %v1495_v10 = vld [vmem:[%s4168_s8 + $0x110] sm:$0xff]  ;;  %v1496_v11 = vld [vmem:[%s4168_s8 + $0x118] sm:$0xff] }
 0xa21   : > { %1579 = vmatpush.msra.mxu2 %v1507_v62  ;;  %1599 = vmatpush.msra.mxu3 %v1508_v63  ;;  %v1498_v12 = vld [vmem:[%s4168_s8 + $0x128] sm:$0xff]  ;;  %v1501_v13 = vld [vmem:[%s4168_s8 + $0x140] sm:$0xff]  ;;  %v1491_v34 = vld [vmem:[%s4168_s8 + $0xf0] sm:$0xff] }
 0xa22   : > { %1559 = vmatpush.msra.mxu1 %v1506_v4  ;;  %1538 = vmatpush.msra.mxu0 %v1509_v5  ;;  %v1492_v14 = vld [vmem:[%s4168_s8 + $0xf8] sm:$0xff]  ;;  %v1494_v15 = vld [vmem:[%s4168_s8 + $0x108] sm:$0xff]  ;;  %v1497_v16 = vld [vmem:[%s4168_s8 + $0x120] sm:$0xff] }
 0xa23   : > { %1580 = vmatpush.msra.mxu2 %v1503_v2  ;;  %1600 = vmatpush.msra.mxu3 %v1504_v3  ;;  %v1487_v17 = vld [vmem:[%s4168_s8 + $0xd0] sm:$0xff]  ;;  %v1488_v18 = vld [vmem:[%s4168_s8 + $0xd8] sm:$0xff]  ;;  %v1490_v19 = vld [vmem:[%s4168_s8 + $0xe8] sm:$0xff] }
 0xa24   : > { %1560 = vmatpush.msra.mxu1 %v1502_v8  ;;  %1539 = vmatpush.msra.mxu0 %v1505_v9  ;;  %v1493_v20 = vld [vmem:[%s4168_s8 + $0x100] sm:$0xff]  ;;  %v1483_v21 = vld [vmem:[%s4168_s8 + $0xb0] sm:$0xff]  ;;  %v1484_v22 = vld [vmem:[%s4168_s8 + $0xb8] sm:$0xff] }
 0xa25   : > { %1581 = vmatpush.msra.mxu2 %v1499_v6  ;;  %1601 = vmatpush.msra.mxu3 %v1500_v7  ;;  %v1486_v23 = vld [vmem:[%s4168_s8 + $0xc8] sm:$0xff]  ;;  %v1489_v24 = vld [vmem:[%s4168_s8 + $0xe0] sm:$0xff]  ;;  %v1479_v25 = vld [vmem:[%s4168_s8 + $0x90] sm:$0xff] }
 0xa26   : > { %1561 = vmatpush.msra.mxu1 %v1498_v12  ;;  %1540 = vmatpush.msra.mxu0 %v1501_v13  ;;  %v1480_v26 = vld [vmem:[%s4168_s8 + $0x98] sm:$0xff]  ;;  %v1482_v27 = vld [vmem:[%s4168_s8 + $0xa8] sm:$0xff]  ;;  %v1485_v28 = vld [vmem:[%s4168_s8 + $0xc0] sm:$0xff] }
 0xa27   : > { %1582 = vmatpush.msra.mxu2 %v1495_v10  ;;  %1602 = vmatpush.msra.mxu3 %v1496_v11  ;;  %v1475_v29 = vld [vmem:[%s4168_s8 + $0x70] sm:$0xff]  ;;  %v1476_v30 = vld [vmem:[%s4168_s8 + $0x78] sm:$0xff]  ;;  %v1478_v31 = vld [vmem:[%s4168_s8 + $0x88] sm:$0xff] }
 0xa28   : > { %1562 = vmatpush.msra.mxu1 %v1494_v15  ;;  %1541 = vmatpush.msra.mxu0 %v1497_v16  ;;  %v1481_v32 = vld [vmem:[%s4168_s8 + $0xa0] sm:$0xff]  ;;  %v1471_v33 = vld [vmem:[%s4168_s8 + $0x50] sm:$0xff]  ;;  %v1472_v35 = vld [vmem:[%s4168_s8 + $0x58] sm:$0xff] }
 0xa29   : > { %1583 = vmatpush.msra.mxu2 %v1491_v34  ;;  %1603 = vmatpush.msra.mxu3 %v1492_v14  ;;  %v1474_v36 = vld [vmem:[%s4168_s8 + $0x68] sm:$0xff]  ;;  %v1477_v37 = vld [vmem:[%s4168_s8 + $0x80] sm:$0xff]  ;;  %v1467_v38 = vld [vmem:[%s4168_s8 + $0x30] sm:$0xff] }
 0xa2a   : > { %1563 = vmatpush.msra.mxu1 %v1490_v19  ;;  %1542 = vmatpush.msra.mxu0 %v1493_v20  ;;  %v1468_v39 = vld [vmem:[%s4168_s8 + $0x38] sm:$0xff]  ;;  %v1470_v40 = vld [vmem:[%s4168_s8 + $0x48] sm:$0xff]  ;;  %v1473_v41 = vld [vmem:[%s4168_s8 + $0x60] sm:$0xff] }
 0xa2b   : > { %1584 = vmatpush.msra.mxu2 %v1487_v17  ;;  %1604 = vmatpush.msra.mxu3 %v1488_v18  ;;  %v1463_v42 = vld [vmem:[%s4168_s8 + $0x10] sm:$0xff]  ;;  %v1464_v43 = vld [vmem:[%s4168_s8 + $0x18] sm:$0xff]  ;;  %v3882_v44 = vld [vmem:[%s4167_s7] sm:$0xff] }
 0xa2c   : > { %1564 = vmatpush.msra.mxu1 %v1486_v23  ;;  %1543 = vmatpush.msra.mxu0 %v1489_v24  ;;  %v1466_v45 = vld [vmem:[%s4168_s8 + $0x28] sm:$0xff]  ;;  %v1469_v46 = vld [vmem:[%s4168_s8 + $0x40] sm:$0xff]  ;;  %v1716_v51 = vld [vmem:[#allocation8 + $0x170] sm:$0xff] }
 0xa2d   : > { %1585 = vmatpush.msra.mxu2 %v1483_v21  ;;  %1605 = vmatpush.msra.mxu3 %v1484_v22  ;;  %v1717_v58 = vld [vmem:[#allocation8 + $0x178] sm:$0xff]  ;;  %v1462_v48 = vld [vmem:[%s4168_s8 + $0x8] sm:$0xff]  ;;  %v1715_v54 = vld [vmem:[#allocation8 + $0x168] sm:$0xff] }
 0xa2e   : > { %1565 = vmatpush.msra.mxu1 %v1482_v27  ;;  %1544 = vmatpush.msra.mxu0 %v1485_v28  ;;  %v1465_v49 = vld [vmem:[%s4168_s8 + $0x20] sm:$0xff]  ;;  %v1674_v57 = vld [vmem:[#allocation8 + $0xf0] sm:$0xff]  ;;  %v1714_v59 = vld [vmem:[#allocation8 + $0x160] sm:$0xff] }
 0xa2f   : > { %1586 = vmatpush.msra.mxu2 %v1479_v25  ;;  %1606 = vmatpush.msra.mxu3 %v1480_v26  ;;  %v1759_v50 = vld [vmem:[#allocation8 + $0x1f8] sm:$0xff]  ;;  %v1758_v60 = vld [vmem:[#allocation8 + $0x1f0] sm:$0xff]  ;;  %v1673_v62 = vld [vmem:[#allocation8 + $0xe8] sm:$0xff] }
 0xa30   : > { %1566 = vmatpush.msra.mxu1 %v1478_v31  ;;  %1545 = vmatpush.msra.mxu0 %v1481_v32  ;;  %v1461_v52 = vld [vmem:[%s4168_s8] sm:$0xff]  ;;  %v1633_v61 = vld [vmem:[#allocation8 + $0x70] sm:$0xff]  ;;  %v1757_v0 = vld [vmem:[#allocation8 + $0x1e8] sm:$0xff] }
 0xa31   : > { %1587 = vmatpush.msra.mxu2 %v1475_v29  ;;  %1607 = vmatpush.msra.mxu3 %v1476_v30  ;;  %v1675_v53 = vld [vmem:[#allocation8 + $0xf8] sm:$0xff]  ;;  %v1632_v1 = vld [vmem:[#allocation8 + $0x68] sm:$0xff]  ;;  %v1672_v2 = vld [vmem:[#allocation8 + $0xe0] sm:$0xff] }
 0xa32   : > { %1567 = vmatpush.msra.mxu1 %v1474_v36  ;;  %1546 = vmatpush.msra.mxu0 %v1477_v37  ;;  %v1634_v56 = vld [vmem:[#allocation8 + $0x78] sm:$0xff]  ;;  %v1712_v3 = vld [vmem:[#allocation8 + $0x150] sm:$0xff]  ;;  %v1756_v4 = vld [vmem:[#allocation8 + $0x1e0] sm:$0xff] }
 0xa33   : > { %1588 = vmatpush.msra.mxu2 %v1471_v33  ;;  %1608 = vmatpush.msra.mxu3 %v1472_v35  ;;  %v1713_v63 = vld [vmem:[#allocation8 + $0x158] sm:$0xff]  ;;  %v1631_v5 = vld [vmem:[#allocation8 + $0x60] sm:$0xff]  ;;  %v1711_v7 = vld [vmem:[#allocation8 + $0x148] sm:$0xff] }
 0xa34   : > { %1568 = vmatpush.msra.mxu1 %v1470_v40  ;;  %1547 = vmatpush.msra.mxu0 %v1473_v41  ;;  %v1671_v6 = vld [vmem:[#allocation8 + $0xd8] sm:$0xff]  ;;  %v1670_v10 = vld [vmem:[#allocation8 + $0xd0] sm:$0xff]  ;;  %v1710_v11 = vld [vmem:[#allocation8 + $0x140] sm:$0xff] }
 0xa35   : > { %1589 = vmatpush.msra.mxu2 %v1467_v38  ;;  %1609 = vmatpush.msra.mxu3 %v1468_v39  ;;  %v1755_v8 = vld [vmem:[#allocation8 + $0x1d8] sm:$0xff]  ;;  %v1754_v12 = vld [vmem:[#allocation8 + $0x1d0] sm:$0xff]  ;;  %v1628_v34 = vld [vmem:[#allocation8 + $0x48] sm:$0xff] }
 0xa36   : > { %1569 = vmatpush.msra.mxu1 %v1466_v45  ;;  %1548 = vmatpush.msra.mxu0 %v1469_v46  ;;  %v1630_v9 = vld [vmem:[#allocation8 + $0x58] sm:$0xff]  ;;  %v1629_v13 = vld [vmem:[#allocation8 + $0x50] sm:$0xff]  ;;  %v1669_v14 = vld [vmem:[#allocation8 + $0xc8] sm:$0xff] }
 0xa37   : > { %1590 = vmatpush.msra.mxu2 %v1463_v42  ;;  %1610 = vmatpush.msra.mxu3 %v1464_v43  ;;  %v1709_v15 = vld [vmem:[#allocation8 + $0x138] sm:$0xff]  ;;  %v1753_v16 = vld [vmem:[#allocation8 + $0x1c8] sm:$0xff]  ;;  %v1627_v17 = vld [vmem:[#allocation8 + $0x40] sm:$0xff] }
 0xa38   : > { %1591 = vmatmul.f32.vlgmr.msra.gmra.mxu2 %v3882_v44  ;;  %1611 = vmatmul.f32.vlgmr.msra.gmra.mxu3 %v3882_v44  ;;  %v1668_v18 = vld [vmem:[#allocation8 + $0xc0] sm:$0xff]  ;;  %v1708_v19 = vld [vmem:[#allocation8 + $0x130] sm:$0xff]  ;;  %v1626_v21 = vld [vmem:[#allocation8 + $0x38] sm:$0xff] }
 0xa39   : > { %1723 = vmatpush.msrb.mxu2 %v1717_v58  ;;  %1765 = vmatpush.msrb.mxu3 %v1759_v50  ;;  %v1752_v20 = vld [vmem:[#allocation8 + $0x1c0] sm:$0xff]  ;;  %v1667_v22 = vld [vmem:[#allocation8 + $0xb8] sm:$0xff]  ;;  %v1707_v23 = vld [vmem:[#allocation8 + $0x128] sm:$0xff] }
 0xa3a   : > { %1570 = vmatpush.msra.mxu1 %v1462_v48  ;;  %1549 = vmatpush.msra.mxu0 %v1465_v49  ;;  %v1751_v24 = vld [vmem:[#allocation8 + $0x1b8] sm:$0xff]  ;;  %v1666_v25 = vld [vmem:[#allocation8 + $0xb0] sm:$0xff]  ;;  %v1706_v26 = vld [vmem:[#allocation8 + $0x120] sm:$0xff] }
 0xa3b   : > { %1571 = vmatmul.f32.vlgmr.msra.gmra.mxu1 %v3882_v44  ;;  %1724 = vmatpush.msrb.mxu2 %v1716_v51  ;;  %v1750_v27 = vld [vmem:[#allocation8 + $0x1b0] sm:$0xff]  ;;  %v1665_v29 = vld [vmem:[#allocation8 + $0xa8] sm:$0xff]  ;;  %v1705_v30 = vld [vmem:[#allocation8 + $0x118] sm:$0xff] }
 0xa3c   : > { %1550 = vmatpush.msra.mxu0 %v1461_v52  ;;  %1681 = vmatpush.msrb.mxu1 %v1675_v53  ;;  %v1625_v28 = vld [vmem:[#allocation8 + $0x30] sm:$0xff]  ;;  %v1749_v31 = vld [vmem:[#allocation8 + $0x1a8] sm:$0xff]  ;;  %v1664_v33 = vld [vmem:[#allocation8 + $0xa0] sm:$0xff] }
 0xa3d   : > { %1551 = vmatmul.f32.vlgmr.msra.gmra.mxu0 %v3882_v44  ;;  %1725 = vmatpush.msrb.mxu2 %v1715_v54  ;;  %v1624_v32 = vld [vmem:[#allocation8 + $0x28] sm:$0xff]  ;;  %v1704_v35 = vld [vmem:[#allocation8 + $0x110] sm:$0xff]  ;;  %v1748_v36 = vld [vmem:[#allocation8 + $0x1a0] sm:$0xff] }
 0xa3e   : > { %1639 = vmatpush.msrb.mxu0 %v1634_v56  ;;  %1682 = vmatpush.msrb.mxu1 %v1674_v57  ;;  %v1623_v37 = vld [vmem:[#allocation8 + $0x20] sm:$0xff]  ;;  %v1663_v38 = vld [vmem:[#allocation8 + $0x98] sm:$0xff]  ;;  %v1703_v39 = vld [vmem:[#allocation8 + $0x108] sm:$0xff] }
 0xa3f   : > { %1726 = vmatpush.msrb.mxu2 %v1714_v59  ;;  %1766 = vmatpush.msrb.mxu3 %v1758_v60  ;;  %v1747_v40 = vld [vmem:[#allocation8 + $0x198] sm:$0xff]  ;;  %v1662_v42 = vld [vmem:[#allocation8 + $0x90] sm:$0xff]  ;;  %v1702_v43 = vld [vmem:[#allocation8 + $0x100] sm:$0xff] }
 0xa40   : > { %1640 = vmatpush.msrb.mxu0 %v1633_v61  ;;  %1683 = vmatpush.msrb.mxu1 %v1673_v62  ;;  %v1622_v41 = vld [vmem:[#allocation8 + $0x18] sm:$0xff]  ;;  %v1621_v45 = vld [vmem:[#allocation8 + $0x10] sm:$0xff]  ;;  %v1661_v58 = vld [vmem:[#allocation8 + $0x88] sm:$0xff] }
 0xa41   : > { %1727 = vmatpush.msrb.mxu2 %v1713_v63  ;;  %1767 = vmatpush.msrb.mxu3 %v1757_v0  ;;  %v2597_v46 = vld [vmem:[%s4234_s2 + $0x178] sm:$0xff]  ;;  %v1620_v48 = vld [vmem:[#allocation8 + $0x8] sm:$0xff]  ;;  %v1660_v50 = vld [vmem:[#allocation8 + $0x80] sm:$0xff] }
 0xa42   : > { %1641 = vmatpush.msrb.mxu0 %v1632_v1  ;;  %1684 = vmatpush.msrb.mxu1 %v1672_v2  ;;  %v2596_v49 = vld [vmem:[%s4235_s9 + $0x170] sm:$0xff]  ;;  %v1619_v51 = vld [vmem:[#allocation8] sm:$0xff]  ;;  %v1832_v52 = vld [vmem:[%s4235_s9 + $0x78] sm:$0xff] }
 0xa43   : > { %1728 = vmatpush.msrb.mxu2 %v1712_v3  ;;  %1768 = vmatpush.msrb.mxu3 %v1756_v4  ;;  %v2581_v53 = vld [vmem:[%s4235_s9 + $0xf8] sm:$0xff]  ;;  %v2595_v54 = vld [vmem:[%s4235_s9 + $0x168] sm:$0xff]  ;;  %v1831_v56 = vld [vmem:[%s4235_s9 + $0x70] sm:$0xff] }
 0xa44   : > { %1642 = vmatpush.msrb.mxu0 %v1631_v5  ;;  %1685 = vmatpush.msrb.mxu1 %v1671_v6  ;;  %v2580_v57 = vld [vmem:[%s4235_s9 + $0xf0] sm:$0xff]  ;;  %v2594_v59 = vld [vmem:[%s4235_s9 + $0x160] sm:$0xff]  ;;  %v1830_v60 = vld [vmem:[%s4235_s9 + $0x68] sm:$0xff] }
 0xa45   : > { %1729 = vmatpush.msrb.mxu2 %v1711_v7  ;;  %1769 = vmatpush.msrb.mxu3 %v1755_v8  ;;  %v2579_v61 = vld [vmem:[%s4235_s9 + $0xe8] sm:$0xff]  ;;  %v2593_v62 = vld [vmem:[%s4235_s9 + $0x158] sm:$0xff]  ;;  %v1829_v63 = vld [vmem:[%s4235_s9 + $0x60] sm:$0xff] }
 0xa46   : > { %1643 = vmatpush.msrb.mxu0 %v1630_v9  ;;  %1686 = vmatpush.msrb.mxu1 %v1670_v10  ;;  %v2578_v0 = vld [vmem:[%s4235_s9 + $0xe0] sm:$0xff]  ;;  %v2592_v1 = vld [vmem:[%s4235_s9 + $0x150] sm:$0xff]  ;;  %v1828_v2 = vld [vmem:[%s4235_s9 + $0x58] sm:$0xff] }
 0xa47   : > { %1730 = vmatpush.msrb.mxu2 %v1710_v11  ;;  %1770 = vmatpush.msrb.mxu3 %v1754_v12  ;;  %v2577_v3 = vld [vmem:[%s4235_s9 + $0xd8] sm:$0xff]  ;;  %v2591_v4 = vld [vmem:[%s4235_s9 + $0x148] sm:$0xff]  ;;  %v1827_v5 = vld [vmem:[%s4235_s9 + $0x50] sm:$0xff] }
 0xa48   : > { %1644 = vmatpush.msrb.mxu0 %v1629_v13  ;;  %1687 = vmatpush.msrb.mxu1 %v1669_v14  ;;  %v2576_v6 = vld [vmem:[%s4235_s9 + $0xd0] sm:$0xff]  ;;  %v2590_v7 = vld [vmem:[%s4235_s9 + $0x140] sm:$0xff]  ;;  %v1826_v8 = vld [vmem:[%s4235_s9 + $0x48] sm:$0xff] }
 0xa49   : > { %1731 = vmatpush.msrb.mxu2 %v1709_v15  ;;  %1771 = vmatpush.msrb.mxu3 %v1753_v16  ;;  %v2575_v9 = vld [vmem:[%s4235_s9 + $0xc8] sm:$0xff]  ;;  %v2589_v10 = vld [vmem:[%s4235_s9 + $0x138] sm:$0xff]  ;;  %v2574_v12 = vld [vmem:[%s4235_s9 + $0xc0] sm:$0xff] }
 0xa4a   : > { %1645 = vmatpush.msrb.mxu0 %v1628_v34  ;;  %1688 = vmatpush.msrb.mxu1 %v1668_v18  ;;  %v1746_v11 = vld [vmem:[#allocation8 + $0x190] sm:$0xff]  ;;  %v1825_v13 = vld [vmem:[%s4235_s9 + $0x40] sm:$0xff]  ;;  %v2588_v34 = vld [vmem:[%s4235_s9 + $0x130] sm:$0xff] }
 0xa4b   : > { %1732 = vmatpush.msrb.mxu2 %v1708_v19  ;;  %1772 = vmatpush.msrb.mxu3 %v1752_v20  ;;  %v1745_v14 = vld [vmem:[#allocation8 + $0x188] sm:$0xff]  ;;  %v2573_v15 = vld [vmem:[%s4235_s9 + $0xb8] sm:$0xff]  ;;  %v1744_v18 = vld [vmem:[#allocation8 + $0x180] sm:$0xff] }
 0xa4c   : > { %1646 = vmatpush.msrb.mxu0 %v1627_v17  ;;  %1689 = vmatpush.msrb.mxu1 %v1667_v22  ;;  %v1824_v16 = vld [vmem:[%s4235_s9 + $0x38] sm:$0xff]  ;;  %v2587_v17 = vld [vmem:[%s4235_s9 + $0x128] sm:$0xff]  ;;  %v2572_v19 = vld [vmem:[%s4235_s9 + $0xb0] sm:$0xff] }
 0xa4d   : > { %1733 = vmatpush.msrb.mxu2 %v1707_v23  ;;  %1773 = vmatpush.msrb.mxu3 %v1751_v24  ;;  %v1823_v20 = vld [vmem:[%s4235_s9 + $0x30] sm:$0xff]  ;;  %v2571_v22 = vld [vmem:[%s4235_s9 + $0xa8] sm:$0xff]  ;;  %v2585_v24 = vld [vmem:[%s4235_s9 + $0x118] sm:$0xff] }
 0xa4e   : > { %1647 = vmatpush.msrb.mxu0 %v1626_v21  ;;  %1690 = vmatpush.msrb.mxu1 %v1666_v25  ;;  %v2586_v21 = vld [vmem:[%s4235_s9 + $0x120] sm:$0xff]  ;;  %v1822_v23 = vld [vmem:[%s4235_s9 + $0x28] sm:$0xff] }
 0xa4f   : > { %1734 = vmatpush.msrb.mxu2 %v1706_v26  ;;  %1774 = vmatpush.msrb.mxu3 %v1750_v27  ;;  %v2570_v25 = vld [vmem:[%s4235_s9 + $0xa0] sm:$0xff]  ;;  %v2584_v27 = vld [vmem:[%s4235_s9 + $0x110] sm:$0xff] }
 0xa50   : > { %1648 = vmatpush.msrb.mxu0 %v1625_v28  ;;  %1691 = vmatpush.msrb.mxu1 %v1665_v29  ;;  %v1821_v26 = vld [vmem:[%s4235_s9 + $0x20] sm:$0xff]  ;;  %v2569_v28 = vld [vmem:[%s4235_s9 + $0x98] sm:$0xff] }
 0xa51   : > { %1735 = vmatpush.msrb.mxu2 %v1705_v30  ;;  %1775 = vmatpush.msrb.mxu3 %v1749_v31  ;;  %v1820_v29 = vld [vmem:[%s4235_s9 + $0x18] sm:$0xff]  ;;  %v2583_v30 = vld [vmem:[%s4235_s9 + $0x108] sm:$0xff]  ;;  %v2568_v31 = vld [vmem:[%s4235_s9 + $0x90] sm:$0xff] }
 0xa52   : > { %1649 = vmatpush.msrb.mxu0 %v1624_v32  ;;  %1692 = vmatpush.msrb.mxu1 %v1664_v33  ;;  %v1819_v32 = vld [vmem:[%s4235_s9 + $0x10] sm:$0xff]  ;;  %v2582_v33 = vld [vmem:[%s4235_s9 + $0x100] sm:$0xff] }
 0xa53   : > { %1736 = vmatpush.msrb.mxu2 %v1704_v35  ;;  %1776 = vmatpush.msrb.mxu3 %v1748_v36  ;;  %v2567_v35 = vld [vmem:[%s4235_s9 + $0x88] sm:$0xff] }
 0xa54   : > { %1650 = vmatpush.msrb.mxu0 %v1623_v37  ;;  %1693 = vmatpush.msrb.mxu1 %v1663_v38  ;;  %v1818_v36 = vld [vmem:[%s4235_s9 + $0x8] sm:$0xff]  ;;  %v2566_v37 = vld [vmem:[%s4235_s9 + $0x80] sm:$0xff] }
 0xa55   : > { %1737 = vmatpush.msrb.mxu2 %v1703_v39  ;;  %1777 = vmatpush.msrb.mxu3 %v1747_v40  ;;  %v1817_v38 = vld [vmem:[%s4235_s9] sm:$0xff]  ;;  %v1948_v40 = vld [vmem:[#allocation10 + $0x70] sm:$0xff] }
 0xa56   : > { %1651 = vmatpush.msrb.mxu0 %v1622_v41  ;;  %1694 = vmatpush.msrb.mxu1 %v1662_v42  ;;  %v1949_v39 = vld [vmem:[#allocation10 + $0x78] sm:$0xff] }
 0xa57   : > { %1738 = vmatpush.msrb.mxu2 %v1702_v43  ;;  %1778 = vmatpush.msrb.mxu3 %v1746_v11  ;;  %v1525_v41 = vld [vmem:[%s4236_s28] sm:$0xf]  ;;  %v1934_v11 = vld [vmem:[#allocation10] sm:$0xff] }
 0xa58   : > { %1652 = vmatpush.msrb.mxu0 %v1621_v45  ;;  %1695 = vmatpush.msrb.mxu1 %v1661_v58  ;;  %v1528_v42 = vperm.slane %v1525_v41, 1  ;;  %v1529_v43 = vperm.slane %v1525_v41, 2  ;;  %v1530_v45 = vperm.slane %v1525_v41, 3  ;;  %v1527_v58 = vperm.slane %v1525_v41, 0 }
 0xa59   : > { %1907 = vmatpush.msra.mxu2 %v2597_v46  ;;  %1779 = vmatpush.msrb.mxu3 %v1745_v14  ;;  %v2062_v14 = vld [vmem:[#allocation13 + $0x170] sm:$0xff] }
 0xa5a   : > { %1653 = vmatpush.msrb.mxu0 %v1620_v48  ;;  %1696 = vmatpush.msrb.mxu1 %v1660_v50 }
 0xa5b   : > { %1908 = vmatpush.msra.mxu2 %v2596_v49  ;;  %1780 = vmatpush.msrb.mxu3 %v1744_v18  ;;  %v2059_v18 = vld [vmem:[#allocation13 + $0x158] sm:$0xff] }
 0xa5c   : > { %1654 = vmatpush.msrb.mxu0 %v1619_v51  ;;  %1870 = vmatpush.msra.mxu1 %v1832_v52 }
 0xa5d   : > { %1909 = vmatpush.msra.mxu2 %v2595_v54  ;;  %1954 = vmatpush.msra.mxu3 %v1949_v39  ;;  %v1985_v39 = vld [vmem:[#allocation11 + $0x50] sm:$0xff] }
 0xa5e   : > { %1850 = vmatpush.msra.mxu0 %v2581_v53  ;;  %1871 = vmatpush.msra.mxu1 %v1831_v56 }
 0xa5f   : > { %1910 = vmatpush.msra.mxu2 %v2594_v59  ;;  %1955 = vmatpush.msra.mxu3 %v1948_v40  ;;  %v2046_v40 = vld [vmem:[#allocation13 + $0xf0] sm:$0xff] }
 0xa60   : > { %1851 = vmatpush.msra.mxu0 %v2580_v57  ;;  %1872 = vmatpush.msra.mxu1 %v1830_v60 }
 0xa61   : > { %1911 = vmatpush.msra.mxu2 %v2593_v62  ;;  %v1947_v62 = vld [vmem:[#allocation10 + $0x68] sm:$0xff] }
 0xa62   : > { %1852 = vmatpush.msra.mxu0 %v2579_v61  ;;  %1873 = vmatpush.msra.mxu1 %v1829_v63  ;;  %v4050_v61 = vld [vmem:[#allocation2] sm:$0xff]  ;;  %v1946_v63 = vld [vmem:[#allocation10 + $0x60] sm:$0xff] }
 0xa63   : > { %1912 = vmatpush.msra.mxu2 %v2592_v1  ;;  %1956 = vmatpush.msra.mxu3 %v1947_v62  ;;  %v1944_v1 = vld [vmem:[#allocation10 + $0x50] sm:$0xff] }
 0xa64   : > { %1853 = vmatpush.msra.mxu0 %v2578_v0  ;;  %1874 = vmatpush.msra.mxu1 %v1828_v2  ;;  %v1945_v0 = vld [vmem:[#allocation10 + $0x58] sm:$0xff]  ;;  %v1943_v2 = vld [vmem:[#allocation10 + $0x48] sm:$0xff] }
 0xa65   : > { %1913 = vmatpush.msra.mxu2 %v2591_v4  ;;  %1957 = vmatpush.msra.mxu3 %v1946_v63  ;;  %v1941_v4 = vld [vmem:[#allocation10 + $0x38] sm:$0xff] }
 0xa66   : > { %1854 = vmatpush.msra.mxu0 %v2577_v3  ;;  %1875 = vmatpush.msra.mxu1 %v1827_v5  ;;  %v1942_v3 = vld [vmem:[#allocation10 + $0x40] sm:$0xff]  ;;  %v1940_v5 = vld [vmem:[#allocation10 + $0x30] sm:$0xff] }
 0xa67   : > { %1914 = vmatpush.msra.mxu2 %v2590_v7  ;;  %1958 = vmatpush.msra.mxu3 %v1945_v0  ;;  %v1938_v7 = vld [vmem:[#allocation10 + $0x20] sm:$0xff]  ;;  %v2038_v0 = vld [vmem:[#allocation13 + $0xb0] sm:$0xff] }
 0xa68   : > { %1855 = vmatpush.msra.mxu0 %v2576_v6  ;;  %1876 = vmatpush.msra.mxu1 %v1826_v8  ;;  %v1939_v6 = vld [vmem:[#allocation10 + $0x28] sm:$0xff]  ;;  %v1937_v8 = vld [vmem:[#allocation10 + $0x18] sm:$0xff] }
 0xa69   : > { %1915 = vmatpush.msra.mxu2 %v2589_v10  ;;  %1959 = vmatpush.msra.mxu3 %v1944_v1  ;;  %v1935_v10 = vld [vmem:[#allocation10 + $0x8] sm:$0xff]  ;;  %v2039_v1 = vld [vmem:[#allocation13 + $0xb8] sm:$0xff] }
 0xa6a   : > { %1856 = vmatpush.msra.mxu0 %v2575_v9  ;;  %1877 = vmatpush.msra.mxu1 %v1825_v13  ;;  %v1936_v9 = vld [vmem:[#allocation10 + $0x10] sm:$0xff]  ;;  %v1990_v13 = vld [vmem:[#allocation11 + $0x78] sm:$0xff] }
 0xa6b   : > { %1916 = vmatpush.msra.mxu2 %v2588_v34  ;;  %1960 = vmatpush.msra.mxu3 %v1943_v2  ;;  %v2061_v34 = vld [vmem:[#allocation13 + $0x168] sm:$0xff]  ;;  %v1981_v2 = vld [vmem:[#allocation11 + $0x30] sm:$0xff] }
 0xa6c   : > { %1857 = vmatpush.msra.mxu0 %v2574_v12  ;;  %1878 = vmatpush.msra.mxu1 %v1824_v16  ;;  %v2768_v12 = vld [vmem:[%s4237_s13 + $0x1] ss:$0 sm:$0xff]  ;;  %v1989_v16 = vld [vmem:[#allocation11 + $0x70] sm:$0xff] }
 0xa6d   : > { %1917 = vmatpush.msra.mxu2 %v2587_v17  ;;  %1961 = vmatpush.msra.mxu3 %v1942_v3  ;;  %v2058_v17 = vld [vmem:[#allocation13 + $0x150] sm:$0xff] }
 0xa6e   : > { %1858 = vmatpush.msra.mxu0 %v2573_v15  ;;  %1879 = vmatpush.msra.mxu1 %v1823_v20  ;;  %v2063_v15 = vld [vmem:[#allocation13 + $0x178] sm:$0xff]  ;;  %v1988_v20 = vld [vmem:[#allocation11 + $0x68] sm:$0xff]  ;;  %v2034_v3 = vld [vmem:[#allocation13 + $0x90] sm:$0xff] }
 0xa6f   : > { %1918 = vmatpush.msra.mxu2 %v2586_v21  ;;  %1962 = vmatpush.msra.mxu3 %v1941_v4  ;;  %v2055_v21 = vld [vmem:[#allocation13 + $0x138] sm:$0xff] }
 0xa70   : > { %1859 = vmatpush.msra.mxu0 %v2572_v19  ;;  %1880 = vmatpush.msra.mxu1 %v1822_v23  ;;  %v2060_v19 = vld [vmem:[#allocation13 + $0x160] sm:$0xff]  ;;  %v2057_v23 = vld [vmem:[#allocation13 + $0x148] sm:$0xff] }
 0xa71   : > { %1919 = vmatpush.msra.mxu2 %v2585_v24  ;;  %1963 = vmatpush.msra.mxu3 %v1940_v5 }
 0xa72   : > { %1860 = vmatpush.msra.mxu0 %v2571_v22  ;;  %1881 = vmatpush.msra.mxu1 %v1821_v26  ;;  %v2056_v22 = vld [vmem:[#allocation13 + $0x140] sm:$0xff] }
 0xa73   : > { %1920 = vmatpush.msra.mxu2 %v2584_v27  ;;  %1964 = vmatpush.msra.mxu3 %v1939_v6  ;;  %v1987_v26 = vld [vmem:[#allocation11 + $0x60] sm:$0xff]  ;;  %v2035_v6 = vld [vmem:[#allocation13 + $0x98] sm:$0xff] }
 0xa74   : > { %1861 = vmatpush.msra.mxu0 %v2570_v25  ;;  %1882 = vmatpush.msra.mxu1 %v1820_v29  ;;  %v2769_v25 = vld [vmem:[%s4237_s13] ss:$0 sm:$0xff]  ;;  %v2052_v27 = vld [vmem:[#allocation13 + $0x120] sm:$0xff]  ;;  %v2053_v29 = vld [vmem:[#allocation13 + $0x128] sm:$0xff] }
 0xa75   : > { %1921 = vmatpush.msra.mxu2 %v2583_v30  ;;  %1965 = vmatpush.msra.mxu3 %v1938_v7  ;;  %v2054_v30 = vld [vmem:[#allocation13 + $0x130] sm:$0xff]  ;;  %v2036_v7 = vld [vmem:[#allocation13 + $0xa0] sm:$0xff] }
 0xa76   : > { %1862 = vmatpush.msra.mxu0 %v2569_v28  ;;  %1883 = vmatpush.msra.mxu1 %v1819_v32  ;;  %v2049_v32 = vld [vmem:[#allocation13 + $0x108] sm:$0xff] }
 0xa77   : > { %1922 = vmatpush.msra.mxu2 %v2582_v33  ;;  %1966 = vmatpush.msra.mxu3 %v1937_v8  ;;  %v1980_v8 = vld [vmem:[#allocation11 + $0x28] sm:$0xff] }
 0xa78   : > { %1863 = vmatpush.msra.mxu0 %v2568_v31  ;;  %1884 = vmatpush.msra.mxu1 %v1818_v36  ;;  %v1986_v31 = vld [vmem:[#allocation11 + $0x58] sm:$0xff]  ;;  %v2050_v36 = vld [vmem:[#allocation13 + $0x110] sm:$0xff] }
 0xa79   : > { %1967 = vmatpush.msra.mxu3 %v1936_v9  ;;  %v2031_v9 = vld [vmem:[#allocation13 + $0x78] sm:$0xff] }
 0xa7a   : > { %1864 = vmatpush.msra.mxu0 %v2567_v35  ;;  %1885 = vmatpush.msra.mxu1 %v1817_v38 }
 0xa7b   : > { %1968 = vmatpush.msra.mxu3 %v1935_v10 }
 0xa7c   : > { %1865 = vmatpush.msra.mxu0 %v2566_v37  ;;  %v2051_v37 = vld [vmem:[#allocation13 + $0x118] sm:$0xff] }
 0xa7d   : > { %1969 = vmatpush.msra.mxu3 %v1934_v11  ;;  %v2772_v11 = vld [vmem:[%s4238_s0] ss:$0 sm:$0xff]  ;;  %s4247_s0 = sld [smem:[#allocation38_spill]] }
 0xab8   : > { %v1572_v46 = vpop.f32.mrf.mxu1 }
 0xab9   : > { %v1573_v48 = vadd.f32 %v1572_v46, %v1528_v42  ;;  %v2047_v42 = vld [vmem:[#allocation13 + $0xf8] sm:$0xff]  ;;  %v1984_v46 = vld [vmem:[#allocation11 + $0x48] sm:$0xff] }
 0xaba   : > { %v1552_v54 = vpop.f32.mrf.mxu0 }
 0xabb   : > { %v1592_v49 = vpop.f32.mrf.mxu2  ;;  %v1612_v50 = vpop.f32.mrf.mxu3  ;;  %v1616_v51 = vmax.f32 %v1573_v48, 0.0  ;;  %v1553_v56 = vadd.f32 %v1552_v54, %v1527_v58  ;;  %v2043_v58 = vld [vmem:[#allocation13 + $0xd8] sm:$0xff]  ;;  %v2044_v48 = vld [vmem:[#allocation13 + $0xe0] sm:$0xff]  ;;  %v2041_v54 = vld [vmem:[#allocation13 + $0xc8] sm:$0xff] }
 0xabc   : > { %v1593_v52 = vadd.f32 %v1592_v49, %v1529_v43  ;;  %v1613_v53 = vadd.f32 %v1612_v50, %v1530_v45  ;;  %v2048_v43 = vld [vmem:[#allocation13 + $0x100] sm:$0xff]  ;;  %v2045_v49 = vld [vmem:[#allocation13 + $0xe8] sm:$0xff] }
 0xabd   : > { %1697 = vmatmul.f32.vlgmr.msrb.gmra.mxu1 %v1616_v51  ;;  %v1615_v60 = vmax.f32 %v1553_v56, 0.0  ;;  %v2042_v56 = vld [vmem:[#allocation13 + $0xd0] sm:$0xff] }
 0xabe   : > { %v1617_v57 = vmax.f32 %v1593_v52, 0.0  ;;  %v1618_v59 = vmax.f32 %v1613_v53, 0.0  ;;  %2072 = vmatpush.msrb.mxu1 %v2061_v34  ;;  %v1983_v52 = vld [vmem:[#allocation11 + $0x40] sm:$0xff] }
 0xabf   : > { %1655 = vmatmul.f32.vlgmr.msrb.gmra.mxu0 %v1615_v60  ;;  %v2040_v53 = vld [vmem:[#allocation13 + $0xc0] sm:$0xff]  ;;  %v2037_v60 = vld [vmem:[#allocation13 + $0xa8] sm:$0xff] }
 0xac0   : > { %1739 = vmatmul.f32.vlgmr.msrb.gmra.mxu2 %v1617_v57  ;;  %1781 = vmatmul.f32.vlgmr.msrb.gmra.mxu3 %v1618_v59  ;;  %v1982_v59 = vld [vmem:[#allocation11 + $0x38] sm:$0xff] }
 0xac1   : > { %1995 = vmatpush.msrb.mxu0 %v1990_v13  ;;  %2092 = vmatpush.msrb.mxu2 %v2062_v14  ;;  %v2033_v13 = vld [vmem:[#allocation13 + $0x88] sm:$0xff] }
 0xac2   : > { %2112 = vmatpush.msrb.mxu3 %v2063_v15  ;;  %2073 = vmatpush.msrb.mxu1 %v2058_v17  ;;  %v1979_v17 = vld [vmem:[#allocation11 + $0x20] sm:$0xff] }
 0xac3   : > { %1996 = vmatpush.msrb.mxu0 %v1989_v16  ;;  %2093 = vmatpush.msrb.mxu2 %v2059_v18  ;;  %v2028_v18 = vld [vmem:[#allocation13 + $0x60] sm:$0xff] }
 0xac4   : > { %2113 = vmatpush.msrb.mxu3 %v2060_v19  ;;  %2074 = vmatpush.msrb.mxu1 %v2055_v21  ;;  %v2029_v19 = vld [vmem:[#allocation13 + $0x68] sm:$0xff]  ;;  %v1978_v21 = vld [vmem:[#allocation11 + $0x18] sm:$0xff] }
 0xac5   : > { %1886 = vmatmul.f32.vlgmr.msra.gmra.mxu1 %v3882_v44  ;;  %1997 = vmatpush.msrb.mxu0 %v1988_v20  ;;  %v2030_v20 = vld [vmem:[#allocation13 + $0x70] sm:$0xff] }
 0xac6   : > { %2094 = vmatpush.msrb.mxu2 %v2056_v22  ;;  %2114 = vmatpush.msrb.mxu3 %v2057_v23  ;;  %v2025_v22 = vld [vmem:[#allocation13 + $0x48] sm:$0xff]  ;;  %v2026_v23 = vld [vmem:[#allocation13 + $0x50] sm:$0xff] }
 0xac7   : > { %1866 = vmatmul.f32.vlgmr.msra.gmra.mxu0 %v3696_v47  ;;  %2075 = vmatpush.msrb.mxu1 %v2052_v27  ;;  %v2023_v27 = vld [vmem:[#allocation13 + $0x38] sm:$0xff] }
 0xac8   : > { %1923 = vmatmul.f32.vlgmr.msra.gmra.mxu2 %v4050_v61  ;;  %1998 = vmatpush.msrb.mxu0 %v1987_v26  ;;  %v2022_v26 = vld [vmem:[#allocation13 + $0x30] sm:$0xff] }
 0xac9   : > { %2095 = vmatpush.msrb.mxu2 %v2053_v29  ;;  %2115 = vmatpush.msrb.mxu3 %v2054_v30  ;;  %v1976_v29 = vld [vmem:[#allocation11 + $0x8] sm:$0xff]  ;;  %v2019_v30 = vld [vmem:[#allocation13 + $0x18] sm:$0xff] }
 0xaca   : > { %1999 = vmatpush.msrb.mxu0 %v1986_v31  ;;  %2076 = vmatpush.msrb.mxu1 %v2049_v32  ;;  %v2020_v31 = vld [vmem:[#allocation13 + $0x20] sm:$0xff]  ;;  %v2021_v32 = vld [vmem:[#allocation13 + $0x28] sm:$0xff] }
 0xacb   : > { %2096 = vmatpush.msrb.mxu2 %v2050_v36  ;;  %2116 = vmatpush.msrb.mxu3 %v2051_v37  ;;  %v2017_v36 = vld [vmem:[#allocation13 + $0x8] sm:$0xff]  ;;  %v2018_v37 = vld [vmem:[#allocation13 + $0x10] sm:$0xff] }
 0xacc   : > { %2000 = vmatpush.msrb.mxu0 %v1985_v39  ;;  %2077 = vmatpush.msrb.mxu1 %v2046_v40  ;;  %v2773_v40 = vld [vmem:[%s4239_s1] ss:$0 sm:$0xff] }
 0xacd   : > { %2097 = vmatpush.msrb.mxu2 %v2047_v42  ;;  %2117 = vmatpush.msrb.mxu3 %v2048_v43 }
 0xace   : > { %2001 = vmatpush.msrb.mxu0 %v1984_v46  ;;  %2078 = vmatpush.msrb.mxu1 %v2043_v58  ;;  %v2774_v46 = vld [vmem:[%s4241_s20] ss:$0 sm:$0xff] }
 0xacf   : > { %2098 = vmatpush.msrb.mxu2 %v2044_v48  ;;  %2118 = vmatpush.msrb.mxu3 %v2045_v49 }
 0xad0   : > { %2002 = vmatpush.msrb.mxu0 %v1983_v52  ;;  %2079 = vmatpush.msrb.mxu1 %v2040_v53 }
 0xad1   : > { %2099 = vmatpush.msrb.mxu2 %v2041_v54  ;;  %2119 = vmatpush.msrb.mxu3 %v2042_v56 }
 0xad2   : > { %2003 = vmatpush.msrb.mxu0 %v1982_v59  ;;  %2080 = vmatpush.msrb.mxu1 %v2037_v60 }
 0xad3   : > { %2100 = vmatpush.msrb.mxu2 %v2038_v0  ;;  %2120 = vmatpush.msrb.mxu3 %v2039_v1  ;;  %v2292_v1 = vmul.f32 %v3696_v47, %v3696_v47 }
 0xad4   : > { %2004 = vmatpush.msrb.mxu0 %v1981_v2  ;;  %2081 = vmatpush.msrb.mxu1 %v2034_v3 }
 0xad5   : > { %2101 = vmatpush.msrb.mxu2 %v2035_v6  ;;  %2121 = vmatpush.msrb.mxu3 %v2036_v7 }
 0xad6   : > { %2005 = vmatpush.msrb.mxu0 %v1980_v8  ;;  %2082 = vmatpush.msrb.mxu1 %v2031_v9 }
 0xad7   : > { %2122 = vmatpush.msrb.mxu3 %v2033_v13 }
 0xad8   : > { %2006 = vmatpush.msrb.mxu0 %v1979_v17  ;;  %2083 = vmatpush.msrb.mxu1 %v2028_v18 }
 0xad9   : > { %2123 = vmatpush.msrb.mxu3 %v2030_v20 }
 0xada   : > { %2007 = vmatpush.msrb.mxu0 %v1978_v21  ;;  %2084 = vmatpush.msrb.mxu1 %v2025_v22 }
 0xadc   : > { %2085 = vmatpush.msrb.mxu1 %v2022_v26 }
 0xade   : > { %2086 = vmatpush.msrb.mxu1 %v2019_v30 }
 0xb3a   : > { %v1698_v24 = vpop.f32.mrf.mxu1 }
 0xb3b   : > { %v1699_v28 = vadd.f32 %v2768_v12, %v1698_v24  ;;  %v2032_v12 = vld [vmem:[#allocation13 + $0x80] sm:$0xff]  ;;  %v2027_v24 = vld [vmem:[#allocation13 + $0x58] sm:$0xff] }
 0xb3c   : > { %v1656_v35 = vpop.f32.mrf.mxu0  ;;  %2102 = vmatpush.msrb.mxu2 %v2032_v12  ;;  %2124 = vmatpush.msrb.mxu3 %v2027_v24 }
 0xb3d   : > { %v1788_v33 = vsub.f32 0.0, %v1699_v28  ;;  %v1657_v38 = vadd.f32 %v2769_v25, %v1656_v35  ;;  %v1977_v25 = vld [vmem:[#allocation11 + $0x10] sm:$0xff]  ;;  %v2024_v28 = vld [vmem:[#allocation13 + $0x40] sm:$0xff] }
 0xb3e   : > { %2103 = vmatpush.msrb.mxu2 %v2029_v19  ;;  %2008 = vmatpush.msrb.mxu0 %v1977_v25  ;;  %v2016_v35 = vld [vmem:[#allocation13] sm:$0xff] }
 0xb3f   : > { %v1789_v41 = vmul.f32 1.442695, %v1788_v33  ;;  %v1785_v45 = vsub.f32 %v1657_v38, %v4050_v61  ;;  %2125 = vmatpush.msrb.mxu3 %v2024_v28  ;;  %v1975_v33 = vld [vmem:[#allocation11] sm:$0xff]  ;;  %2087 = vmatpush.msrb.mxu1 %v2016_v35  ;;  %v2146_v38 = vmul.f32 %v3882_v44, %v3882_v44  ;;  %v2064_v44 = vld [vmem:[%s4240_s27] sm:$0x7] }
 0xb40   : > { %2104 = vmatpush.msrb.mxu2 %v2026_v23  ;;  %2009 = vmatpush.msrb.mxu0 %v1976_v29  ;;  %v2066_v58 = vperm.slane %v2064_v44, 0  ;;  %v2067_v54 = vperm.slane %v2064_v44, 1  ;;  %v2068_v56 = vperm.slane %v2064_v44, 2 }
 0xb41   : > { %2775 = vpow2.f32 %v1789_v41  ;;  %v1786_v50 = vmul.f32 %v1785_v45, %v1785_v45  ;;  %2126 = vmatpush.msrb.mxu3 %v2021_v32  ;;  %2147 = vadd.xlane.f32.xlu2 %v2146_v38  ;;  %v2219_v45 = vmul.f32 %v4050_v61, %v4050_v61 }
 0xb42   : > { %v1887_v57 = vpop.f32.mrf.mxu1  ;;  %2105 = vmatpush.msrb.mxu2 %v2023_v27  ;;  %2010 = vmatpush.msrb.mxu0 %v1975_v33 }
 0xb43   : > { %v4062_v51 = vpop.f32.mrf.mxu2  ;;  %v1787_v62 = vmul.f32 -0.5, %v1786_v50  ;;  %2127 = vmatpush.msrb.mxu3 %v2018_v37  ;;  %v4071_v39 = vpop.f32.mrf.mxu3  ;;  %v2807_v37 = vld [vmem:[%s4167_s7] sm:$0xff] }
 0xb44   : > { %v1867_v63 = vpop.f32.mrf.mxu0  ;;  %2106 = vmatpush.msrb.mxu2 %v2020_v31 }
 0xb45   : > { %v1888_v5 = vadd.f32 %v1887_v57, %v1867_v63 }
 0xb46   : > { %2107 = vmatpush.msrb.mxu2 %v2017_v36 }
 0xb47   : > { %v2776_v4 = vpop.eup %2775 }
 0xb48   : > { %v4064_v10 = vmul.f32 %v2776_v4, %v1787_v62 }
 0xb49   : > { %2220 = vadd.xlane.f32.xlu2 %v2219_v45 }
 0xb4b   : > { %v1924_v34 = vpop.f32.mrf.mxu2 }
 0xb4c   : > { %v1927_v14 = vadd.f32 %v1924_v34, %v1888_v5 }
 0xb4e   : > { %v1932_v15 = vadd.f32 %v2772_v11, %v1927_v14 }
 0xb50   : > { %2777 = vtanh.f32 %v1932_v15 }
 0xb56   : > { %v2778_v16 = vpop.eup %2777 }
 0xb57   : > { %1970 = vmatmul.f32.vlgmr.msra.gmra.mxu3 %v2778_v16 }
 0xbb4   : > { %v2148_v2 = vpop.xlane.xlu2 %2147 }
 0xbb5   : > { %vm2155_vm4 = vweird.f32 %v2148_v2 }
 0xbbc   : > { %v2221_v3 = vpop.xlane.xlu2 %2220 }
 0xbbd   : > { %vm2228_vm0 = vweird.f32 %v2221_v3 }
 0xbda   : > { %v1971_v41 = vpop.f32.mrf.mxu3 }
 0xbdb   : > { %v1972_v42 = vadd.f32 %v2773_v40, %v1971_v41 }
 0xbdd   : > { %2779 = vtanh.f32 %v1972_v42 }
 0xbde   : > { %2781 = vrsqrt.f32 %v2148_v2 }
 0xbdf   : > { %2783 = vrsqrt.f32 %v2221_v3 }
 0xbe3   : > { %v2780_v43 = vpop.eup %2779 }
 0xbe4   : > { %2011 = vmatmul.f32.vlgmr.msrb.gmra.mxu0 %v2780_v43  ;;  %2088 = vmatmul.f32.vlgmr.msrb.gmra.mxu1 %v2780_v43  ;;  %v2782_v4 = vpop.eup %2781 }
 0xbe5   : > { %2108 = vmatmul.f32.vlgmr.msrb.gmra.mxu2 %v2780_v43  ;;  %2128 = vmatmul.f32.vlgmr.msrb.gmra.mxu3 %v2780_v43  ;;  %v2150_v5 = vmul.f32 %v2782_v4, %v2148_v2  ;;  %v4097_v7 = vpop.eup %2783  ;;  %vm2156_vm11 = vweird.f32 %v2782_v4 }
 0xbe6   : > { %v2223_v11 = vmul.f32 %v4097_v7, %v2221_v3  ;;  %vm4101_vm12 = vmor %vm2155_vm4, %vm2156_vm11  ;;  %vm2229_vm1 = vweird.f32 %v4097_v7 }
 0xbe7   : > { %v2151_v6 = vmul.f32 %v2782_v4, %v2150_v5  ;;  %vm4112_vm2 = vmor %vm2228_vm0, %vm2229_vm1 }
 0xbe8   : > { %v2224_v34 = vmul.f32 %v4097_v7, %v2223_v11 }
 0xbe9   : > { %v2152_v9 = vmul.f32 0.5, %v2151_v6 }
 0xbea   : > { %v2225_v19 = vmul.f32 0.5, %v2224_v34 }
 0xbeb   : > { %v2153_v13 = vsub.f32 1.5, %v2152_v9 }
 0xbec   : > { %v2226_v26 = vsub.f32 1.5, %v2225_v19  ;;  %v2770_v19 = vld [vmem:[%s4237_s13 + $0x2] ss:$0 sm:$0xff] }
 0xbed   : > { %v2154_v18 = vmul.f32 %v2782_v4, %v2153_v13 }
 0xbee   : > { %v2227_v40 = vmul.f32 %v4097_v7, %v2226_v26 }
 0xbef   : > { %v2158_v25 = vsel %vm4101_vm12, %v2782_v4, %v2154_v18  ;;  %vm2183_vm12 = vcmask 64512  }
 0xbf0   : > { %v2159_v38 = vmul.f32 %v2807_v37, %v2158_v25  ;;  %v1741_v25 = vadd.f32 %v2770_v19, %v4062_v51 }
 0xc61   : > { %v2012_v48 = vpop.f32.mrf.mxu0  ;;  %v2089_v49 = vpop.f32.mrf.mxu1 }
 0xc62   : > { %v2013_v50 = vadd.f32 %v2774_v46, %v2012_v48  ;;  %v2090_v52 = vadd.f32 %v2089_v49, %v2066_v58  ;;  %v2231_v49 = vsel %vm4112_vm2, %v4097_v7, %v2227_v40 }
 0xc64   : > { %2015 = vst [vmem:[%s4242_s15] sm:$0xff] %v2013_v50  ;;  %v2132_v53 = vmul.f32 %v2090_v52, %v2090_v52 }
 0xc66   : > { %2133 = vadd.xlane.f32.xlu1 %v2132_v53 }
 0xc68   : > { %v2109_v57 = vpop.f32.mrf.mxu2  ;;  %v2129_v59 = vpop.f32.mrf.mxu3 }
 0xc69   : > { %v4087_v60 = vadd.f32 %v2109_v57, %v2067_v54  ;;  %v4089_v62 = vadd.f32 %v2129_v59, %v2068_v56 }
 0xc6b   : > { %v2278_v63 = vmul.f32 %v4089_v62, %v4089_v62  ;;  %v2205_v0 = vmul.f32 %v4087_v60, %v4087_v60 }
 0xc6d   : > { %2279 = vadd.xlane.f32.xlu0 %v2278_v63  ;;  %v2232_v63 = vmul.f32 %v2231_v49, %v4050_v61 }
 0xc6e   : > { %2206 = vadd.xlane.f32.xlu1 %v2205_v0 }
 0xc75   : > { %2293 = vadd.xlane.f32.xlu0 %v2292_v1 }
 0xcd9   : > { %v2134_v8 = vpop.xlane.xlu1 %2133 }
 0xcda   : > { %2785 = vrsqrt.f32 %v2134_v8  ;;  %vm2141_vm14 = vweird.f32 %v2134_v8 }
 0xce0   : > { %v2786_v12 = vpop.eup %2785  ;;  %v2280_v14 = vpop.xlane.xlu0 %2279 }
 0xce1   : > { %v2136_v15 = vmul.f32 %v2786_v12, %v2134_v8  ;;  %2787 = vrsqrt.f32 %v2280_v14  ;;  %v2207_v16 = vpop.xlane.xlu1 %2206  ;;  %vm2142_vm13 = vweird.f32 %v2786_v12  ;;  %vm2287_vm6 = vweird.f32 %v2280_v14 }
 0xce2   : > { %2789 = vrsqrt.f32 %v2207_v16  ;;  %vm2143_vm15 = vmor %vm2141_vm14, %vm2142_vm13  ;;  %vm2214_vm8 = vweird.f32 %v2207_v16  ;;  %vm2351_vm13 = vcmp.eq.s32.totalorder %v3597_v55, 0  ;;  %vm2353_vm14 = vcmp.eq.s32.totalorder %v3597_v55, 1 }
 0xce3   : > { %v2137_v17 = vmul.f32 %v2786_v12, %v2136_v15 }
 0xce5   : > { %v2138_v21 = vmul.f32 0.5, %v2137_v17 }
 0xce7   : > { %v2788_v22 = vpop.eup %2787  ;;  %v2139_v23 = vsub.f32 1.5, %v2138_v21 }
 0xce8   : > { %v2790_v24 = vpop.eup %2789  ;;  %v2282_v27 = vmul.f32 %v2788_v22, %v2280_v14  ;;  %v2294_v28 = vpop.xlane.xlu0 %2293  ;;  %vm2288_vm3 = vweird.f32 %v2788_v22  ;;  %v2771_v14 = vld [vmem:[%s4237_s13 + $0x3] ss:$0 sm:$0xff] }
 0xce9   : > { %v2140_v29 = vmul.f32 %v2786_v12, %v2139_v23  ;;  %v2209_v30 = vmul.f32 %v2790_v24, %v2207_v16  ;;  %2791 = vrsqrt.f32 %v2294_v28  ;;  %vm2215_vm5 = vweird.f32 %v2790_v24  ;;  %vm2289_vm7 = vmor %vm2287_vm6, %vm2288_vm3 }
 0xcea   : > { %v2283_v31 = vmul.f32 %v2788_v22, %v2282_v27  ;;  %vm2216_vm9 = vmor %vm2214_vm8, %vm2215_vm5  ;;  %vm2301_vm4 = vweird.f32 %v2294_v28  ;;  %v1783_v18 = vadd.f32 %v2771_v14, %v4071_v39  ;;  %v1792_v39 = vsub.f32 %v1741_v25, %v3696_v47 }
 0xceb   : > { %v2144_v32 = vsel %vm2143_vm15, %v2786_v12, %v2140_v29  ;;  %v2210_v33 = vmul.f32 %v2790_v24, %v2209_v30 }
 0xcec   : > { %v2284_v35 = vmul.f32 0.5, %v2283_v31  ;;  %v2145_v36 = vmul.f32 %v2144_v32, %v2090_v52  ;;  %v1795_v20 = vsub.f32 0.0, %v1783_v18  ;;  %v1793_v29 = vmul.f32 %v1792_v39, %v1792_v39 }
 0xced   : > { %v2211_v41 = vmul.f32 0.5, %v2210_v33 }
 0xcee   : > { %v2285_v43 = vsub.f32 1.5, %v2284_v35  ;;  %2178 = vmatpush.xpose.msra.mxu0 %v2145_v36  ;;  %v4116_v45 = vmul.f32 %v2159_v38, %v2145_v36  ;;  %v1796_v27 = vmul.f32 1.442695, %v1795_v20  ;;  %v1794_v32 = vmul.f32 -0.5, %v1793_v29 }
 0xcef   : > { %v2792_v44 = vpop.eup %2791  ;;  %v2212_v46 = vsub.f32 1.5, %v2211_v41 }
 0xcf0   : > { %v2286_v58 = vmul.f32 %v2788_v22, %v2285_v43  ;;  %v2296_v48 = vmul.f32 %v2792_v44, %v2294_v28  ;;  %vm2302_vm10 = vweird.f32 %v2792_v44 }
 0xcf1   : > { %v2213_v50 = vmul.f32 %v2790_v24, %v2212_v46  ;;  %2179 = vmatmul.f32.vlgmr.msra.gmra.mxu0 %v2159_v38  ;;  %vm2303_vm11 = vmor %vm2301_vm4, %vm2302_vm10 }
 0xcf2   : > { %v2290_v52 = vsel %vm2289_vm7, %v2788_v22, %v2286_v58  ;;  %v2297_v53 = vmul.f32 %v2792_v44, %v2296_v48 }
 0xcf3   : > { %v2217_v54 = vsel %vm2216_vm9, %v2790_v24, %v2213_v50  ;;  %v2291_v56 = vmul.f32 %v2290_v52, %v4089_v62 }
 0xcf4   : > { %v2298_v57 = vmul.f32 0.5, %v2297_v53  ;;  %v2218_v59 = vmul.f32 %v2217_v54, %v4087_v60 }
 0xcf5   : > { %2324 = vmatpush.xpose.msra.mxu2 %v2291_v56 }
 0xcf6   : > { %v2299_v0 = vsub.f32 1.5, %v2298_v57  ;;  %2251 = vmatpush.xpose.msra.mxu1 %v2218_v59  ;;  %v2233_v1 = vmul.f32 %v2232_v63, %v2218_v59 }
 0xcf8   : > { %v2300_v2 = vmul.f32 %v2792_v44, %v2299_v0 }
 0xcf9   : > { %2252 = vmatmul.f32.vlgmr.msra.gmra.mxu1 %v2232_v63 }
 0xcfa   : > { %v2304_v3 = vsel %vm2303_vm11, %v2792_v44, %v2300_v2 }
 0xcfb   : > { %v2305_v4 = vmul.f32 %v2304_v3, %v3696_v47 }
 0xcfd   : > { %2325 = vmatmul.f32.vlgmr.msra.gmra.mxu2 %v2305_v4  ;;  %v2306_v5 = vmul.f32 %v2305_v4, %v2291_v56 }
 0xd6e   : > { %v2180_v62 = vpop.f32.mrf.mxu0 }
 0xd6f   : > { %v2184_v60 = vsel %vm2183_vm12, %v2180_v62, -inf }
 0xd70   : > { %2185 = vmax.xlane.f32.xlu0 %v2184_v60 }
 0xd76   : > { %v2253_v61 = vpop.f32.mrf.mxu1 }
 0xd77   : > { %v2256_v6 = vsel %vm2183_vm12, %v2253_v61, -inf }
 0xd78   : > { %2257 = vmax.xlane.f32.xlu1 %v2256_v6 }
 0xd80   : > { %v2326_v7 = vpop.f32.mrf.mxu2 }
 0xd81   : > { %v2329_v8 = vsel %vm2183_vm12, %v2326_v7, -inf }
 0xd82   : > { %2330 = vmax.xlane.f32.xlu2 %v2329_v8 }
 0xde3   : > { %v2186_v9 = vpop.xlane.xlu0 %2185 }
 0xde4   : > { %v2187_v11 = vsub.f32 %v2180_v62, %v2186_v9 }
 0xde6   : > { %v2188_v12 = vmul.f32 1.442695, %v2187_v11 }
 0xde8   : > { %2793 = vpow2.f32 %v2188_v12 }
 0xdeb   : > { %v2258_v13 = vpop.xlane.xlu1 %2257 }
 0xdec   : > { %v2259_v34 = vsub.f32 %v2253_v61, %v2258_v13 }
 0xdee   : > { %v2794_v15 = vpop.eup %2793  ;;  %v2260_v16 = vmul.f32 1.442695, %v2259_v34 }
 0xdef   : > { %v2190_v17 = vsel %vm2183_vm12, %v2794_v15, 0.0 }
 0xdf0   : > { %2795 = vpow2.f32 %v2260_v16  ;;  %2191 = vadd.xlane.f32.xlu0 %v2190_v17 }
 0xdf5   : > { %v2331_v21 = vpop.xlane.xlu2 %2330 }
 0xdf6   : > { %v2796_v22 = vpop.eup %2795  ;;  %v2332_v23 = vsub.f32 %v2326_v7, %v2331_v21 }
 0xdf7   : > { %v2262_v24 = vsel %vm2183_vm12, %v2796_v22, 0.0 }
 0xdf8   : > { %v2333_v26 = vmul.f32 1.442695, %v2332_v23  ;;  %2263 = vadd.xlane.f32.xlu1 %v2262_v24  ;;  %2161 = vadd.xlane.f32.xlu0 %v4116_v45 }
 0xdfa   : > { %2797 = vpow2.f32 %v2333_v26 }
 0xdfb   : > { %2799 = vpow2.f32 %v1796_v27 }
 0xe00   : > { %v2798_v28 = vpop.eup %2797  ;;  %2234 = vadd.xlane.f32.xlu1 %v2233_v1  ;;  %1799 = vadd.xlane.f32.xlu0 %v4064_v10 }
 0xe01   : > { %v2335_v30 = vsel %vm2183_vm12, %v2798_v28, 0.0  ;;  %v2800_v31 = vpop.eup %2799 }
 0xe02   : > { %2336 = vadd.xlane.f32.xlu2 %v2335_v30  ;;  %v1798_v51 = vmul.f32 %v2800_v31, %v1794_v32 }
 0xe08   : > { %1807 = vadd.xlane.f32.xlu1 %v1798_v51 }
 0xe0a   : > { %2307 = vadd.xlane.f32.xlu2 %v2306_v5 }
 0xe63   : > { %v2192_v33 = vpop.xlane.xlu0 %2191 }
 0xe64   : > { %2801 = vlog2.f32 %v2192_v33 }
 0xe6a   : > { %v2802_v35 = vpop.eup %2801 }
 0xe6b   : > { %v2194_v36 = vmul.f32 0.6931472, %v2802_v35  ;;  %v2264_v37 = vpop.xlane.xlu1 %2263  ;;  %v2162_v47 = vpop.xlane.xlu0 %2161 }
 0xe6c   : > { %2803 = vlog2.f32 %v2264_v37 }
 0xe6d   : > { %v2195_v38 = vadd.f32 %v2194_v36, %v2186_v9 }
 0xe6f   : > { %v2196_v40 = vsub.f32 %v2162_v47, %v2195_v38 }
 0xe71   : > { %v2197_v10 = vrot.slane %v2196_v40, 4 }
 0xe72   : > { %v2804_v41 = vpop.eup %2803 }
 0xe73   : > { %v2266_v42 = vmul.f32 0.6931472, %v2804_v41  ;;  %v2235_v43 = vpop.xlane.xlu1 %2234  ;;  %v1800_v45 = vpop.xlane.xlu0 %1799  ;;  %v2198_v58 = vadd.f32 %v2197_v10, %v2196_v40 }
 0xe74   : > { %v1801_v49 = vrot.slane %v1800_v45, 4 }
 0xe75   : > { %v2267_v44 = vadd.f32 %v2266_v42, %v2258_v13  ;;  %v2337_v46 = vpop.xlane.xlu2 %2336  ;;  %v2199_v52 = vrot.slane %v2198_v58, 2 }
 0xe76   : > { %2805 = vlog2.f32 %v2337_v46  ;;  %v1802_v54 = vadd.f32 %v1801_v49, %v1800_v45 }
 0xe77   : > { %v2268_v48 = vsub.f32 %v2235_v43, %v2267_v44  ;;  %v2200_v2 = vadd.f32 %v2199_v52, %v2198_v58 }
 0xe78   : > { %v1803_v4 = vrot.slane %v1802_v54, 2 }
 0xe79   : > { %v2269_v50 = vrot.slane %v2268_v48, 4  ;;  %v2201_v8 = vrot.slane %v2200_v2, 1 }
 0xe7a   : > { %v1804_v9 = vadd.f32 %v1803_v4, %v1802_v54 }
 0xe7b   : > { %v2270_v53 = vadd.f32 %v2269_v50, %v2268_v48  ;;  %v1808_v56 = vpop.xlane.xlu1 %1807  ;;  %v2202_v14 = vadd.f32 %v2201_v8, %v2200_v2 }
 0xe7c   : > { %v2806_v57 = vpop.eup %2805  ;;  %v1809_v59 = vrot.slane %v1808_v56, 4  ;;  %v1805_v15 = vrot.slane %v1804_v9, 1 }
 0xe7d   : > { %v2271_v63 = vrot.slane %v2270_v53, 2  ;;  %v2339_v0 = vmul.f32 0.6931472, %v2806_v57  ;;  %v2308_v60 = vpop.xlane.xlu2 %2307  ;;  %v2203_v20 = vmul.f32 0.125, %v2202_v14 }
 0xe7e   : > { %v1810_v1 = vadd.f32 %v1809_v59, %v1808_v56  ;;  %v1806_v22 = vadd.f32 %v1805_v15, %v1804_v9 }
 0xe7f   : > { %v2272_v3 = vadd.f32 %v2271_v63, %v2270_v53  ;;  %v2340_v5 = vadd.f32 %v2339_v0, %v2331_v21  ;;  %v2204_v26 = vsub.f32 0.0, %v2203_v20 }
 0xe80   : > { %v1811_v62 = vrot.slane %v1810_v1, 2 }
 0xe81   : > { %v2273_v61 = vrot.slane %v2272_v3, 1  ;;  %v2341_v6 = vsub.f32 %v2308_v60, %v2340_v5 }
 0xe82   : > { %v1812_v7 = vadd.f32 %v1811_v62, %v1810_v1 }
 0xe83   : > { %v2342_v11 = vrot.slane %v2341_v6, 4  ;;  %v2274_v12 = vadd.f32 %v2273_v61, %v2272_v3 }
 0xe84   : > { %v1813_v13 = vrot.slane %v1812_v7, 1 }
 0xe85   : > { %v2343_v34 = vadd.f32 %v2342_v11, %v2341_v6  ;;  %v2275_v17 = vmul.f32 0.125, %v2274_v12 }
 0xe86   : > { %v1814_v18 = vadd.f32 %v1813_v13, %v1812_v7 }
 0xe87   : > { %v2344_v16 = vrot.slane %v2343_v34, 2  ;;  %v2276_v23 = vsub.f32 0.0, %v2275_v17 }
 0xe88   : > { %v1815_v24 = vadd.f32 %v1814_v18, %v1806_v22 }
 0xe89   : > { %v2345_v19 = vadd.f32 %v2344_v16, %v2343_v34  ;;  %v2277_v39 = vadd.f32 %v2276_v23, %v2204_v26 }
 0xe8a   : > { %v1816_v28 = vmul.f32 0.125, %v1815_v24 }
 0xe8b   : > { %v2346_v21 = vrot.slane %v2345_v19, 1 }
 0xe8c   : > { %v2352_v31 = vsel %vm2351_vm13, %v1816_v28, 0.0 }
 0xe8d   : > { %v2347_v25 = vadd.f32 %v2346_v21, %v2345_v19 }
 0xe8f   : > { %v2348_v27 = vmul.f32 0.125, %v2347_v25 }
 0xe91   : > { %v2349_v29 = vsub.f32 0.0, %v2348_v27 }
 0xe93   : > { %v2350_v30 = vadd.f32 %v2349_v29, %v2277_v39 }
 0xe95   : > { %v2354_v32 = vsel %vm2353_vm14, %v2350_v30, 0.0 }
 0xe96   : > { %v2355_v51 = vadd.f32 %v2354_v32, %v2352_v31 }
 0xe98   : > { %2356 = vst [vmem:[%s4247_s0] sm:$0x1] %v2355_v51 }
 0xe99 PF: > { %s4248_s27 = sld [smem:[#allocation18_spill]]  ;;  %s4250_s2 = smov %s3056_s25 }
 0xe9a   : > { %s4249_s21 = sld [smem:[#allocation19_spill]]  ;;  %s4251_s25 = smov %s3060_s26 }
 0xe9f   : > { %p37_p4 = scmp.ge.s32.totalorder %s4248_s27, 4  }
 0xea0   : > { %s4252_s26 = smov %s4249_s21 }
 0xea1   :  { %39 = sbr.rel (!%p37_p4) target bundleno = 27 (0x1b), region = 212 }
 0xea6   :  { %2374 = vsyncpa [#allocation4], 1 }
 0xea7   :  { %2376 = vsyncpa [#allocation4 + $0x1], 1 }
 0xea8   :  { %2377 = vsyncpa [#allocation6], 1 }
 0xea9   :  { %2379 = vsyncpa [#allocation6 + $0x1], 1 }
 0xeaa   :  { %2380 = vsyncpa [#allocation9], 1 }
 0xeab   :  { %2381 = vsyncpa [#allocation12], 1 }

</bundles_post_ra>
